<compile_context>
chip_gen: v7x
topology: tpu7x:2x2x1
jax: 0.10.0
libtpu: 0.0.40
codegen_flags: <defaults>
</compile_context>

<pallas_src>
import functools

import jax
import jax.numpy as jnp
from jax.experimental import pallas as pl
from jax.experimental.pallas import tpu as pltpu


LANE = 128  # lane width; also the zero-halo pad on each side of the flat map


# ----------------------------------------------------------------------------
# Fused kernel: whole ParallelBlock for one image per grid step
# ----------------------------------------------------------------------------
def _pb_kernel(*refs, H, W, cin_pad, c, n_branches, n_stages, convs_per_block,
               c_stage_max, buf_w):
    HW = H * W
    n_rest = n_branches * n_stages * (convs_per_block - 1)

    # ---- unpack refs: inputs, output, scratch --------------------------------
    i = 0
    x_ref = refs[i]; i += 1                       # (1, cin_pad, HW)
    masks_ref = refs[i]; i += 1                   # (2, HW) 0/1 column masks
    w0_refs = refs[i:i + n_stages]; i += n_stages # ganged conv0 weights / stage
    b0_refs = refs[i:i + n_stages]; i += n_stages
    if n_rest:
        wr_ref = refs[i]                          # (n_rest, c, 9*2c)
        br_ref = refs[i + 1]                      # (n_rest, c, 1)
        i += 2
    out_ref = refs[i]; i += 1                     # (1, nb*c, HW)
    buf_ref = refs[i]                             # (2, c_stage_max, buf_w) VMEM

    # Zero the staging buffer's left/right halo pads every step (megacore-safe;
    # the interior is always fully rewritten before it is read).
    pad_r = buf_w - LANE - HW
    buf_ref[:, :, 0:LANE] = jnp.zeros((2, c_stage_max, LANE), jnp.float32)
    buf_ref[:, :, LANE + HW:buf_w] = jnp.zeros((2, c_stage_max, pad_r),
                                               jnp.float32)

    mask_neg = masks_ref[0:1, :]                  # valid where col-1 >= 0
    mask_pos = masks_ref[1:2, :]                  # valid where col+1 <  W

    slot_ctr = [0]

    def im2col(m):
        """[ci, HW] -> [9*ci, HW] patch matrix (tap-major, channel-minor)."""
        ci = m.shape[0]
        slot = slot_ctr[0] & 1                    # alternate slots: next store
        slot_ctr[0] += 1                          # overlaps the older loads
        buf_ref[slot, 0:ci, LANE:LANE + HW] = m   # aligned, unmasked store
        parts = []
        for dh in (-1, 0, 1):
            for dw in (-1, 0, 1):
                d = dh * W + dw
                v = buf_ref[slot, 0:ci, LANE + d:LANE + d + HW]
                if dw == -1:                      # column wrap-around fix-up
                    v = v * mask_neg
                elif dw == 1:
                    v = v * mask_pos
                parts.append(v)
        return jnp.concatenate(parts, axis=0)     # sublane-aligned concat

    def conv(patch, w, b):
        # w: [co, K]   patch: [K, HW]   b: [co, 1] -- one MXU dot per conv.
        return jnp.dot(w, patch, preferred_element_type=jnp.float32) + b

    def silu(v):                                  # exp/recip land on the EUP
        return v * jax.nn.sigmoid(v)

    def rest_idx(br, st, k):
        return (br * n_stages + st) * (convs_per_block - 1) + (k - 1)

    x = x_ref[0].astype(jnp.float32)              # [cin_pad, HW]

    branch_maps = []
    for st in range(n_stages):
        if st == 0:
            xin = x
        else:
            # act(cat(branch_outs)) == cat(act(branch_outs)); channels stay
            # branch-major to match the conv0 weight layout.
            xin = jnp.concatenate([silu(m) for m in branch_maps], axis=0)
        # All branches' conv0 share this input: ganged along co, one dot.
        y0 = conv(im2col(xin), w0_refs[st][...], b0_refs[st][...])  # [nb*c,HW]
        new_maps = []
        for br in range(n_branches):
            xb = y0[br * c:(br + 1) * c, :]       # sublane-aligned slice
            cmaps = [xb]
            for k in range(1, convs_per_block):
                idx = rest_idx(br, st, k)
                mean_map = cmaps[0]
                for mm in cmaps[1:]:
                    mean_map = mean_map + mm
                if len(cmaps) > 1:
                    mean_map = mean_map * (1.0 / len(cmaps))
                # conv(cat([mean, act(xb)])) as ONE dot with K = 9*2c.
                patch = jnp.concatenate([im2col(mean_map), im2col(silu(xb))],
                                        axis=0)
                xb = conv(patch, wr_ref[idx], br_ref[idx])
                cmaps.append(xb)
            new_maps.append(xb)
        branch_maps = new_maps

    # Lane-dense, pre-concatenated output (last dim = HW >= 128).
    out_ref[0] = jnp.concatenate(branch_maps, axis=0).astype(out_ref.dtype)


# ----------------------------------------------------------------------------
# Wrapper: NCHW in, NCHW out (PyTorch convention)
# ----------------------------------------------------------------------------
def parallel_block(params, x_nchw):
    N, cin, H, W = x_nchw.shape
    HW = H * W
    n_branches = len(params)
    n_stages = len(params[0])
    convs_per_block = len(params[0][0])
    c = params[0][0][0][0].shape[-1]              # common out-channels
    assert W + 1 <= LANE

    # Pad input channels to a sublane multiple so every in-kernel concat and
    # staging store stays (8,128)-aligned.  The spatial reshape is free.
    cin_pad = max(8, ((cin + 7) // 8) * 8)
    x = x_nchw
    if cin_pad != cin:
        x = jnp.pad(x, ((0, 0), (0, cin_pad - cin), (0, 0), (0, 0)))
    x = x.reshape(N, cin_pad, HW)

    def flatten_w(w):
        # [3,3,ci,co] (HWIO) -> [co, 9*ci], K ordered (tap, channel).
        co = w.shape[-1]
        return jnp.transpose(w, (3, 0, 1, 2)).reshape(co, -1)

    def flatten_w_concat_input(w, splits):
        # Conv whose input is a channel-concat: K ordered (map, tap, channel)
        # to match the kernel's per-map im2col concatenation.
        parts, off = [], 0
        for ci in splits:
            parts.append(flatten_w(w[:, :, off:off + ci, :]))
            off += ci
        return jnp.concatenate(parts, axis=1)

    # conv0 of every stage: same input for every branch -> gang along co.
    w0_list, b0_list = [], []
    for st in range(n_stages):
        ws, bs = [], []
        for br in range(n_branches):
            w, b = params[br][st][0]
            assert w.shape[:2] == (3, 3) and w.shape[3] == c
            if st == 0:
                assert w.shape[2] == cin
                w = jnp.pad(w, ((0, 0), (0, 0), (0, cin_pad - cin), (0, 0)))
            else:
                assert w.shape[2] == n_branches * c
            ws.append(flatten_w(w))
            bs.append(b.reshape(-1, 1))
        w0_list.append(jnp.concatenate(ws, axis=0))   # [nb*c, 9*ci]
        b0_list.append(jnp.concatenate(bs, axis=0))   # [nb*c, 1]

    # Remaining convs (input = cat([mean, act]), ci = 2c): packed arrays.
    wr_list, brl_list = [], []
    for br in range(n_branches):
        for st in range(n_stages):
            for k in range(1, convs_per_block):
                w, b = params[br][st][k]
                assert w.shape == (3, 3, 2 * c, c)
                wr_list.append(flatten_w_concat_input(w, [c, c]))  # [c, 18c]
                brl_list.append(b.reshape(-1, 1))                  # [c, 1]

    # Column wrap-around masks for the +/-1 lane shifts of the flat HW axis.
    col = jnp.arange(HW, dtype=jnp.int32) % W
    masks = jnp.stack([(col >= 1).astype(jnp.float32),
                       (col <= W - 2).astype(jnp.float32)], axis=0)  # (2, HW)

    c_stage_max = max(cin_pad, n_branches * c)
    buf_w = LANE * (2 + pl.cdiv(HW, LANE))        # lane-aligned haloed buffer

    inputs = [x, masks] + w0_list + b0_list
    in_specs = [
        pl.BlockSpec((1, cin_pad, HW), lambda n: (n, 0, 0)),
        pl.BlockSpec(masks.shape, lambda n: (0, 0)),
    ]
    in_specs += [pl.BlockSpec(w.shape, lambda n: (0, 0)) for w in w0_list]
    in_specs += [pl.BlockSpec(b.shape, lambda n: (0, 0)) for b in b0_list]
    if wr_list:
        w_rest = jnp.stack(wr_list, axis=0)       # [n_rest, c, 18c]
        b_rest = jnp.stack(brl_list, axis=0)      # [n_rest, c, 1]
        inputs += [w_rest, b_rest]
        in_specs += [pl.BlockSpec(w_rest.shape, lambda n: (0, 0, 0)),
                     pl.BlockSpec(b_rest.shape, lambda n: (0, 0, 0))]

    kernel = functools.partial(
        _pb_kernel, H=H, W=W, cin_pad=cin_pad, c=c, n_branches=n_branches,
        n_stages=n_stages, convs_per_block=convs_per_block,
        c_stage_max=c_stage_max, buf_w=buf_w)

    out = pl.pallas_call(
        kernel,
        out_shape=jax.ShapeDtypeStruct((N, n_branches * c, HW), x_nchw.dtype),
        grid=(N,),                                # one image per step
        in_specs=in_specs,
        out_specs=pl.BlockSpec((1, n_branches * c, HW), lambda n: (n, 0, 0)),
        scratch_shapes=[pltpu.VMEM((2, c_stage_max, buf_w), jnp.float32)],
        compiler_params=pltpu.CompilerParams(
            dimension_semantics=("parallel",)),   # v7x: 2 TCs share the batch
    )(*inputs)

    return out.reshape(N, n_branches * c, H, W)   # free reshape, already NCHW


# ----------------------------------------------------------------------------
# Pure-JAX reference (correctness spot-check)
# ----------------------------------------------------------------------------
def _conv_ref(x, w, b):
    y = jax.lax.conv_general_dilated(
        x, w, window_strides=(1, 1), padding="SAME",
        dimension_numbers=("NHWC", "HWIO", "NHWC"),
        precision=jax.lax.Precision.HIGHEST)
    return y + b.reshape(1, 1, 1, -1)


def _silu_ref(v):
    return v * jax.nn.sigmoid(v)


def parallel_block_ref(params, x_nchw):
    x = jnp.transpose(x_nchw, (0, 2, 3, 1))

    def dense_block(block, xin):
        w, b = block[0]
        xx = _conv_ref(xin, w, b)
        cmaps = [xx]
        for (w, b) in block[1:]:
            xa = _silu_ref(xx)
            mean = jnp.mean(jnp.stack(cmaps, 0), 0)
            xx = _conv_ref(jnp.concatenate([mean, xa], -1), w, b)
            cmaps.append(xx)
        return xx

    nb, ns = len(params), len(params[0])
    xl = [dense_block(params[i][0], x) for i in range(nb)]
    for j in range(1, ns):
        xa = _silu_ref(jnp.concatenate(xl, -1))
        xl = [dense_block(params[i][j], xa) for i in range(nb)]
    y = jnp.concatenate(xl, -1)
    return jnp.transpose(y, (0, 3, 1, 2))


# ----------------------------------------------------------------------------
# Deterministic synthetic parameters (params[branch][stage] = [(w, b), ...])
# ----------------------------------------------------------------------------
def _make_conv_param(key, cin, cout):
    kw, kb = jax.random.split(key)
    fan_in = 9 * cin
    w = jax.random.normal(kw, (3, 3, cin, cout), jnp.float32) * (2.0 / fan_in) ** 0.5
    b = jax.random.normal(kb, (1, cout), jnp.float32) * 0.01
    return (w, b)


def build_params(key, cin=4, c=8, n_branches=2):
    stage_specs = [
        [(cin, c), (2 * c, c)],                 # stage 0 DenseBlock
        [(n_branches * c, c), (2 * c, c)],      # stage 1 DenseBlock
    ]
    params = []
    for _ in range(n_branches):
        branch = []
        for spec in stage_specs:
            block = []
            for (ci, co) in spec:
                key, sub = jax.random.split(key)
                block.append(_make_conv_param(sub, ci, co))
            branch.append(block)
        params.append(branch)
    return params


# ----------------------------------------------------------------------------
if __name__ == "__main__":
    key = jax.random.PRNGKey(0)
    kx, kp = jax.random.split(key)

    x = jax.random.normal(kx, (2, 4, 16, 16), jnp.float32)   # NCHW input
    params = build_params(kp, cin=4, c=8, n_branches=2)

    y = jax.block_until_ready(jax.jit(parallel_block)(params, x))
    assert y.shape == (2, 16, 16, 16), y.shape
    assert bool(jnp.all(jnp.isfinite(y)))

    # Correctness spot-check against the pure-JAX reference.
    y_ref = jax.block_until_ready(jax.jit(parallel_block_ref)(params, x))
    max_err = float(jnp.max(jnp.abs(y - y_ref)))
    assert max_err < 2e-2, max_err

    print("KERNEL_OK")
</pallas_src>

<mosaic_0001>
module attributes {stable_mosaic.version = 11 : i64} {
  func.func @_pb_kernel(%arg0: i32, %arg1: memref<1x8x256xf32, #tpu.memory_space<vmem>>, %arg2: memref<2x256xf32, #tpu.memory_space<vmem>>, %arg3: memref<16x72xf32, #tpu.memory_space<vmem>>, %arg4: memref<16x144xf32, #tpu.memory_space<vmem>>, %arg5: memref<16x1xf32, #tpu.memory_space<vmem>>, %arg6: memref<16x1xf32, #tpu.memory_space<vmem>>, %arg7: memref<4x8x144xf32, #tpu.memory_space<vmem>>, %arg8: memref<4x8x1xf32, #tpu.memory_space<vmem>>, %arg9: memref<1x16x256xf32, #tpu.memory_space<vmem>>, %arg10: memref<2x16x512xf32, #tpu.memory_space<vmem>>) attributes {dimension_semantics = [#tpu.dimension_semantics<parallel>], iteration_bounds = array<i64: 2>, scalar_prefetch = 0 : i64, scratch_operands = 1 : i64, tpu.core_type = #tpu.core_type<tc>, window_params = [{transform_indices = @transform_0, window_bounds = array<i64: 1, 8, 256>}, {pipeline_mode = #tpu.pipeline_mode<synchronous>, transform_indices = @transform_1, window_bounds = array<i64: 2, 256>}, {pipeline_mode = #tpu.pipeline_mode<synchronous>, transform_indices = @transform_2, window_bounds = array<i64: 16, 72>}, {pipeline_mode = #tpu.pipeline_mode<synchronous>, transform_indices = @transform_3, window_bounds = array<i64: 16, 144>}, {pipeline_mode = #tpu.pipeline_mode<synchronous>, transform_indices = @transform_4, window_bounds = array<i64: 16, 1>}, {pipeline_mode = #tpu.pipeline_mode<synchronous>, transform_indices = @transform_5, window_bounds = array<i64: 16, 1>}, {pipeline_mode = #tpu.pipeline_mode<synchronous>, transform_indices = @transform_6, window_bounds = array<i64: 4, 8, 144>}, {pipeline_mode = #tpu.pipeline_mode<synchronous>, transform_indices = @transform_7, window_bounds = array<i64: 4, 8, 1>}, {transform_indices = @transform_8, window_bounds = array<i64: 1, 16, 256>}]} {
    %cst = arith.constant 0.000000e+00 : f32
    %0 = vector.broadcast %cst : f32 to vector<2x16x128xf32>
    %c0 = arith.constant 0 : index
    %c0_0 = arith.constant 0 : index
    %c0_1 = arith.constant 0 : index
    %1 = vector.load %arg10[%c0, %c0_0, %c0_1] : memref<2x16x512xf32, #tpu.memory_space<vmem>>, vector<2x16x128xf32>
    tpu.vector_store %arg10[%c0, %c0_0, %c0_1], %0 {strides = array<i32>} : memref<2x16x512xf32, #tpu.memory_space<vmem>>, vector<2x16x128xf32>,
    %cst_2 = arith.constant 0.000000e+00 : f32
    %2 = vector.broadcast %cst_2 : f32 to vector<2x16x128xf32>
    %c0_3 = arith.constant 0 : index
    %c0_4 = arith.constant 0 : index
    %c384 = arith.constant 384 : index
    %3 = vector.load %arg10[%c0_3, %c0_4, %c384] : memref<2x16x512xf32, #tpu.memory_space<vmem>>, vector<2x16x128xf32>
    tpu.vector_store %arg10[%c0_3, %c0_4, %c384], %2 {strides = array<i32>} : memref<2x16x512xf32, #tpu.memory_space<vmem>>, vector<2x16x128xf32>,
    %c0_5 = arith.constant 0 : index
    %c0_6 = arith.constant 0 : index
    %4 = vector.load %arg2[%c0_5, %c0_6] : memref<2x256xf32, #tpu.memory_space<vmem>>, vector<1x256xf32>
    %c1 = arith.constant 1 : index
    %c0_7 = arith.constant 0 : index
    %5 = vector.load %arg2[%c1, %c0_7] : memref<2x256xf32, #tpu.memory_space<vmem>>, vector<1x256xf32>
    %c0_8 = arith.constant 0 : index
    %c0_9 = arith.constant 0 : index
    %c0_10 = arith.constant 0 : index
    %6 = vector.load %arg1[%c0_8, %c0_9, %c0_10] : memref<1x8x256xf32, #tpu.memory_space<vmem>>, vector<1x8x256xf32>
    %7 = vector.shape_cast %6 : vector<1x8x256xf32> to vector<8x256xf32>
    %c0_11 = arith.constant 0 : index
    %c0_12 = arith.constant 0 : index
    %c128 = arith.constant 128 : index
    %8 = vector.load %arg10[%c0_11, %c0_12, %c128] : memref<2x16x512xf32, #tpu.memory_space<vmem>>, vector<1x8x256xf32>
    %9 = vector.shape_cast %8 : vector<1x8x256xf32> to vector<8x256xf32>
    %10 = vector.shape_cast %7 : vector<8x256xf32> to vector<1x8x256xf32>
    tpu.vector_store %arg10[%c0_11, %c0_12, %c128], %10 {strides = array<i32>} : memref<2x16x512xf32, #tpu.memory_space<vmem>>, vector<1x8x256xf32>,
    %c0_13 = arith.constant 0 : index
    %c0_14 = arith.constant 0 : index
    %c111 = arith.constant 111 : index
    %11 = vector.load %arg10[%c0_13, %c0_14, %c111] : memref<2x16x512xf32, #tpu.memory_space<vmem>>, vector<1x8x256xf32>
    %12 = vector.shape_cast %11 : vector<1x8x256xf32> to vector<8x256xf32>
    %13 = vector.broadcast %4 : vector<1x256xf32> to vector<8x256xf32>
    %14 = arith.mulf %12, %13 : vector<8x256xf32>
    %c0_15 = arith.constant 0 : index
    %c0_16 = arith.constant 0 : index
    %c112 = arith.constant 112 : index
    %15 = vector.load %arg10[%c0_15, %c0_16, %c112] : memref<2x16x512xf32, #tpu.memory_space<vmem>>, vector<1x8x256xf32>
    %16 = vector.shape_cast %15 : vector<1x8x256xf32> to vector<8x256xf32>
    %c0_17 = arith.constant 0 : index
    %c0_18 = arith.constant 0 : index
    %c113 = arith.constant 113 : index
    %17 = vector.load %arg10[%c0_17, %c0_18, %c113] : memref<2x16x512xf32, #tpu.memory_space<vmem>>, vector<1x8x256xf32>
    %18 = vector.shape_cast %17 : vector<1x8x256xf32> to vector<8x256xf32>
    %19 = vector.broadcast %5 : vector<1x256xf32> to vector<8x256xf32>
    %20 = arith.mulf %18, %19 : vector<8x256xf32>
    %c0_19 = arith.constant 0 : index
    %c0_20 = arith.constant 0 : index
    %c127 = arith.constant 127 : index
    %21 = vector.load %arg10[%c0_19, %c0_20, %c127] : memref<2x16x512xf32, #tpu.memory_space<vmem>>, vector<1x8x256xf32>
    %22 = vector.shape_cast %21 : vector<1x8x256xf32> to vector<8x256xf32>
    %23 = vector.broadcast %4 : vector<1x256xf32> to vector<8x256xf32>
    %24 = arith.mulf %22, %23 : vector<8x256xf32>
    %c0_21 = arith.constant 0 : index
    %c0_22 = arith.constant 0 : index
    %c128_23 = arith.constant 128 : index
    %25 = vector.load %arg10[%c0_21, %c0_22, %c128_23] : memref<2x16x512xf32, #tpu.memory_space<vmem>>, vector<1x8x256xf32>
    %26 = vector.shape_cast %25 : vector<1x8x256xf32> to vector<8x256xf32>
    %c0_24 = arith.constant 0 : index
    %c0_25 = arith.constant 0 : index
    %c129 = arith.constant 129 : index
    %27 = vector.load %arg10[%c0_24, %c0_25, %c129] : memref<2x16x512xf32, #tpu.memory_space<vmem>>, vector<1x8x256xf32>
    %28 = vector.shape_cast %27 : vector<1x8x256xf32> to vector<8x256xf32>
    %29 = vector.broadcast %5 : vector<1x256xf32> to vector<8x256xf32>
    %30 = arith.mulf %28, %29 : vector<8x256xf32>
    %c0_26 = arith.constant 0 : index
    %c0_27 = arith.constant 0 : index
    %c143 = arith.constant 143 : index
    %31 = vector.load %arg10[%c0_26, %c0_27, %c143] : memref<2x16x512xf32, #tpu.memory_space<vmem>>, vector<1x8x256xf32>
    %32 = vector.shape_cast %31 : vector<1x8x256xf32> to vector<8x256xf32>
    %33 = vector.broadcast %4 : vector<1x256xf32> to vector<8x256xf32>
    %34 = arith.mulf %32, %33 : vector<8x256xf32>
    %c0_28 = arith.constant 0 : index
    %c0_29 = arith.constant 0 : index
    %c144 = arith.constant 144 : index
    %35 = vector.load %arg10[%c0_28, %c0_29, %c144] : memref<2x16x512xf32, #tpu.memory_space<vmem>>, vector<1x8x256xf32>
    %36 = vector.shape_cast %35 : vector<1x8x256xf32> to vector<8x256xf32>
    %c0_30 = arith.constant 0 : index
    %c0_31 = arith.constant 0 : index
    %c145 = arith.constant 145 : index
    %37 = vector.load %arg10[%c0_30, %c0_31, %c145] : memref<2x16x512xf32, #tpu.memory_space<vmem>>, vector<1x8x256xf32>
    %38 = vector.shape_cast %37 : vector<1x8x256xf32> to vector<8x256xf32>
    %39 = vector.broadcast %5 : vector<1x256xf32> to vector<8x256xf32>
    %40 = arith.mulf %38, %39 : vector<8x256xf32>
    %41 = tpu.concatenate %14, %16, %20, %24, %26, %30, %34, %36, %40 in 0 : vector<8x256xf32>, vector<8x256xf32>, vector<8x256xf32>, vector<8x256xf32>, vector<8x256xf32>, vector<8x256xf32>, vector<8x256xf32>, vector<8x256xf32>, vector<8x256xf32> -> vector<72x256xf32>
    %c0_32 = arith.constant 0 : index
    %c0_33 = arith.constant 0 : index
    %42 = vector.load %arg3[%c0_32, %c0_33] : memref<16x72xf32, #tpu.memory_space<vmem>>, vector<16x72xf32>
    %c0_34 = arith.constant 0 : index
    %c0_35 = arith.constant 0 : index
    %43 = vector.load %arg5[%c0_34, %c0_35] : memref<16x1xf32, #tpu.memory_space<vmem>>, vector<16x1xf32>
    %cst_36 = arith.constant dense<0.000000e+00> : vector<16x256xf32>
    %44 = tpu.matmul %42, %41, %cst_36 {dimension_numbers = #tpu.dot_dimension_numbers<[1], [0], [0], [1], [0, 0, 1, 1], [], []>} : vector<16x72xf32>, vector<72x256xf32>, vector<16x256xf32> -> vector<16x256xf32>
    %45 = vector.broadcast %43 : vector<16x1xf32> to vector<16x256xf32>
    %46 = arith.addf %44, %45 : vector<16x256xf32>
    %47 = vector.extract_strided_slice %46 {offsets = [0, 0], sizes = [8, 256], strides = [1, 1]} : vector<16x256xf32> to vector<8x256xf32>
    %c1_37 = arith.constant 1 : index
    %c0_38 = arith.constant 0 : index
    %c128_39 = arith.constant 128 : index
    %48 = vector.load %arg10[%c1_37, %c0_38, %c128_39] : memref<2x16x512xf32, #tpu.memory_space<vmem>>, vector<1x8x256xf32>
    %49 = vector.shape_cast %48 : vector<1x8x256xf32> to vector<8x256xf32>
    %50 = vector.shape_cast %47 : vector<8x256xf32> to vector<1x8x256xf32>
    tpu.vector_store %arg10[%c1_37, %c0_38, %c128_39], %50 {strides = array<i32>} : memref<2x16x512xf32, #tpu.memory_space<vmem>>, vector<1x8x256xf32>,
    %c1_40 = arith.constant 1 : index
    %c0_41 = arith.constant 0 : index
    %c111_42 = arith.constant 111 : index
    %51 = vector.load %arg10[%c1_40, %c0_41, %c111_42] : memref<2x16x512xf32, #tpu.memory_space<vmem>>, vector<1x8x256xf32>
    %52 = vector.shape_cast %51 : vector<1x8x256xf32> to vector<8x256xf32>
    %53 = vector.broadcast %4 : vector<1x256xf32> to vector<8x256xf32>
    %54 = arith.mulf %52, %53 : vector<8x256xf32>
    %c1_43 = arith.constant 1 : index
    %c0_44 = arith.constant 0 : index
    %c112_45 = arith.constant 112 : index
    %55 = vector.load %arg10[%c1_43, %c0_44, %c112_45] : memref<2x16x512xf32, #tpu.memory_space<vmem>>, vector<1x8x256xf32>
    %56 = vector.shape_cast %55 : vector<1x8x256xf32> to vector<8x256xf32>
    %c1_46 = arith.constant 1 : index
    %c0_47 = arith.constant 0 : index
    %c113_48 = arith.constant 113 : index
    %57 = vector.load %arg10[%c1_46, %c0_47, %c113_48] : memref<2x16x512xf32, #tpu.memory_space<vmem>>, vector<1x8x256xf32>
    %58 = vector.shape_cast %57 : vector<1x8x256xf32> to vector<8x256xf32>
    %59 = vector.broadcast %5 : vector<1x256xf32> to vector<8x256xf32>
    %60 = arith.mulf %58, %59 : vector<8x256xf32>
    %c1_49 = arith.constant 1 : index
    %c0_50 = arith.constant 0 : index
    %c127_51 = arith.constant 127 : index
    %61 = vector.load %arg10[%c1_49, %c0_50, %c127_51] : memref<2x16x512xf32, #tpu.memory_space<vmem>>, vector<1x8x256xf32>
    %62 = vector.shape_cast %61 : vector<1x8x256xf32> to vector<8x256xf32>
    %63 = vector.broadcast %4 : vector<1x256xf32> to vector<8x256xf32>
    %64 = arith.mulf %62, %63 : vector<8x256xf32>
    %c1_52 = arith.constant 1 : index
    %c0_53 = arith.constant 0 : index
    %c128_54 = arith.constant 128 : index
    %65 = vector.load %arg10[%c1_52, %c0_53, %c128_54] : memref<2x16x512xf32, #tpu.memory_space<vmem>>, vector<1x8x256xf32>
    %66 = vector.shape_cast %65 : vector<1x8x256xf32> to vector<8x256xf32>
    %c1_55 = arith.constant 1 : index
    %c0_56 = arith.constant 0 : index
    %c129_57 = arith.constant 129 : index
    %67 = vector.load %arg10[%c1_55, %c0_56, %c129_57] : memref<2x16x512xf32, #tpu.memory_space<vmem>>, vector<1x8x256xf32>
    %68 = vector.shape_cast %67 : vector<1x8x256xf32> to vector<8x256xf32>
    %69 = vector.broadcast %5 : vector<1x256xf32> to vector<8x256xf32>
    %70 = arith.mulf %68, %69 : vector<8x256xf32>
    %c1_58 = arith.constant 1 : index
    %c0_59 = arith.constant 0 : index
    %c143_60 = arith.constant 143 : index
    %71 = vector.load %arg10[%c1_58, %c0_59, %c143_60] : memref<2x16x512xf32, #tpu.memory_space<vmem>>, vector<1x8x256xf32>
    %72 = vector.shape_cast %71 : vector<1x8x256xf32> to vector<8x256xf32>
    %73 = vector.broadcast %4 : vector<1x256xf32> to vector<8x256xf32>
    %74 = arith.mulf %72, %73 : vector<8x256xf32>
    %c1_61 = arith.constant 1 : index
    %c0_62 = arith.constant 0 : index
    %c144_63 = arith.constant 144 : index
    %75 = vector.load %arg10[%c1_61, %c0_62, %c144_63] : memref<2x16x512xf32, #tpu.memory_space<vmem>>, vector<1x8x256xf32>
    %76 = vector.shape_cast %75 : vector<1x8x256xf32> to vector<8x256xf32>
    %c1_64 = arith.constant 1 : index
    %c0_65 = arith.constant 0 : index
    %c145_66 = arith.constant 145 : index
    %77 = vector.load %arg10[%c1_64, %c0_65, %c145_66] : memref<2x16x512xf32, #tpu.memory_space<vmem>>, vector<1x8x256xf32>
    %78 = vector.shape_cast %77 : vector<1x8x256xf32> to vector<8x256xf32>
    %79 = vector.broadcast %5 : vector<1x256xf32> to vector<8x256xf32>
    %80 = arith.mulf %78, %79 : vector<8x256xf32>
    %81 = tpu.concatenate %54, %56, %60, %64, %66, %70, %74, %76, %80 in 0 : vector<8x256xf32>, vector<8x256xf32>, vector<8x256xf32>, vector<8x256xf32>, vector<8x256xf32>, vector<8x256xf32>, vector<8x256xf32>, vector<8x256xf32>, vector<8x256xf32> -> vector<72x256xf32>
    %82 = arith.negf %47 : vector<8x256xf32>
    %83 = math.exp %82 : vector<8x256xf32>
    %cst_67 = arith.constant 1.000000e+00 : f32
    %84 = vector.broadcast %cst_67 : f32 to vector<8x256xf32>
    %85 = arith.addf %84, %83 : vector<8x256xf32>
    %86 = arith.divf %84, %85 : vector<8x256xf32>
    %87 = arith.mulf %47, %86 : vector<8x256xf32>
    %c0_68 = arith.constant 0 : index
    %c0_69 = arith.constant 0 : index
    %c128_70 = arith.constant 128 : index
    %88 = vector.load %arg10[%c0_68, %c0_69, %c128_70] : memref<2x16x512xf32, #tpu.memory_space<vmem>>, vector<1x8x256xf32>
    %89 = vector.shape_cast %88 : vector<1x8x256xf32> to vector<8x256xf32>
    %90 = vector.shape_cast %87 : vector<8x256xf32> to vector<1x8x256xf32>
    tpu.vector_store %arg10[%c0_68, %c0_69, %c128_70], %90 {strides = array<i32>} : memref<2x16x512xf32, #tpu.memory_space<vmem>>, vector<1x8x256xf32>,
    %c0_71 = arith.constant 0 : index
    %c0_72 = arith.constant 0 : index
    %c111_73 = arith.constant 111 : index
    %91 = vector.load %arg10[%c0_71, %c0_72, %c111_73] : memref<2x16x512xf32, #tpu.memory_space<vmem>>, vector<1x8x256xf32>
    %92 = vector.shape_cast %91 : vector<1x8x256xf32> to vector<8x256xf32>
    %93 = vector.broadcast %4 : vector<1x256xf32> to vector<8x256xf32>
    %94 = arith.mulf %92, %93 : vector<8x256xf32>
    %c0_74 = arith.constant 0 : index
    %c0_75 = arith.constant 0 : index
    %c112_76 = arith.constant 112 : index
    %95 = vector.load %arg10[%c0_74, %c0_75, %c112_76] : memref<2x16x512xf32, #tpu.memory_space<vmem>>, vector<1x8x256xf32>
    %96 = vector.shape_cast %95 : vector<1x8x256xf32> to vector<8x256xf32>
    %c0_77 = arith.constant 0 : index
    %c0_78 = arith.constant 0 : index
    %c113_79 = arith.constant 113 : index
    %97 = vector.load %arg10[%c0_77, %c0_78, %c113_79] : memref<2x16x512xf32, #tpu.memory_space<vmem>>, vector<1x8x256xf32>
    %98 = vector.shape_cast %97 : vector<1x8x256xf32> to vector<8x256xf32>
    %99 = vector.broadcast %5 : vector<1x256xf32> to vector<8x256xf32>
    %100 = arith.mulf %98, %99 : vector<8x256xf32>
    %c0_80 = arith.constant 0 : index
    %c0_81 = arith.constant 0 : index
    %c127_82 = arith.constant 127 : index
    %101 = vector.load %arg10[%c0_80, %c0_81, %c127_82] : memref<2x16x512xf32, #tpu.memory_space<vmem>>, vector<1x8x256xf32>
    %102 = vector.shape_cast %101 : vector<1x8x256xf32> to vector<8x256xf32>
    %103 = vector.broadcast %4 : vector<1x256xf32> to vector<8x256xf32>
    %104 = arith.mulf %102, %103 : vector<8x256xf32>
    %c0_83 = arith.constant 0 : index
    %c0_84 = arith.constant 0 : index
    %c128_85 = arith.constant 128 : index
    %105 = vector.load %arg10[%c0_83, %c0_84, %c128_85] : memref<2x16x512xf32, #tpu.memory_space<vmem>>, vector<1x8x256xf32>
    %106 = vector.shape_cast %105 : vector<1x8x256xf32> to vector<8x256xf32>
    %c0_86 = arith.constant 0 : index
    %c0_87 = arith.constant 0 : index
    %c129_88 = arith.constant 129 : index
    %107 = vector.load %arg10[%c0_86, %c0_87, %c129_88] : memref<2x16x512xf32, #tpu.memory_space<vmem>>, vector<1x8x256xf32>
    %108 = vector.shape_cast %107 : vector<1x8x256xf32> to vector<8x256xf32>
    %109 = vector.broadcast %5 : vector<1x256xf32> to vector<8x256xf32>
    %110 = arith.mulf %108, %109 : vector<8x256xf32>
    %c0_89 = arith.constant 0 : index
    %c0_90 = arith.constant 0 : index
    %c143_91 = arith.constant 143 : index
    %111 = vector.load %arg10[%c0_89, %c0_90, %c143_91] : memref<2x16x512xf32, #tpu.memory_space<vmem>>, vector<1x8x256xf32>
    %112 = vector.shape_cast %111 : vector<1x8x256xf32> to vector<8x256xf32>
    %113 = vector.broadcast %4 : vector<1x256xf32> to vector<8x256xf32>
    %114 = arith.mulf %112, %113 : vector<8x256xf32>
    %c0_92 = arith.constant 0 : index
    %c0_93 = arith.constant 0 : index
    %c144_94 = arith.constant 144 : index
    %115 = vector.load %arg10[%c0_92, %c0_93, %c144_94] : memref<2x16x512xf32, #tpu.memory_space<vmem>>, vector<1x8x256xf32>
    %116 = vector.shape_cast %115 : vector<1x8x256xf32> to vector<8x256xf32>
    %c0_95 = arith.constant 0 : index
    %c0_96 = arith.constant 0 : index
    %c145_97 = arith.constant 145 : index
    %117 = vector.load %arg10[%c0_95, %c0_96, %c145_97] : memref<2x16x512xf32, #tpu.memory_space<vmem>>, vector<1x8x256xf32>
    %118 = vector.shape_cast %117 : vector<1x8x256xf32> to vector<8x256xf32>
    %119 = vector.broadcast %5 : vector<1x256xf32> to vector<8x256xf32>
    %120 = arith.mulf %118, %119 : vector<8x256xf32>
    %121 = tpu.concatenate %94, %96, %100, %104, %106, %110, %114, %116, %120 in 0 : vector<8x256xf32>, vector<8x256xf32>, vector<8x256xf32>, vector<8x256xf32>, vector<8x256xf32>, vector<8x256xf32>, vector<8x256xf32>, vector<8x256xf32>, vector<8x256xf32> -> vector<72x256xf32>
    %122 = tpu.concatenate %81, %121 in 0 : vector<72x256xf32>, vector<72x256xf32> -> vector<144x256xf32>
    %c0_98 = arith.constant 0 : index
    %c0_99 = arith.constant 0 : index
    %c0_100 = arith.constant 0 : index
    %123 = vector.load %arg7[%c0_98, %c0_99, %c0_100] : memref<4x8x144xf32, #tpu.memory_space<vmem>>, vector<1x8x144xf32>
    %124 = vector.shape_cast %123 : vector<1x8x144xf32> to vector<8x144xf32>
    %c0_101 = arith.constant 0 : index
    %c0_102 = arith.constant 0 : index
    %c0_103 = arith.constant 0 : index
    %125 = vector.load %arg8[%c0_101, %c0_102, %c0_103] : memref<4x8x1xf32, #tpu.memory_space<vmem>>, vector<1x8x1xf32>
    %126 = vector.shape_cast %125 : vector<1x8x1xf32> to vector<8x1xf32>
    %cst_104 = arith.constant dense<0.000000e+00> : vector<8x256xf32>
    %127 = tpu.matmul %124, %122, %cst_104 {dimension_numbers = #tpu.dot_dimension_numbers<[1], [0], [0], [1], [0, 0, 1, 1], [], []>} : vector<8x144xf32>, vector<144x256xf32>, vector<8x256xf32> -> vector<8x256xf32>
    %128 = vector.broadcast %126 : vector<8x1xf32> to vector<8x256xf32>
    %129 = arith.addf %127, %128 : vector<8x256xf32>
    %130 = vector.extract_strided_slice %46 {offsets = [8, 0], sizes = [8, 256], strides = [1, 1]} : vector<16x256xf32> to vector<8x256xf32>
    %c1_105 = arith.constant 1 : index
    %c0_106 = arith.constant 0 : index
    %c128_107 = arith.constant 128 : index
    %131 = vector.load %arg10[%c1_105, %c0_106, %c128_107] : memref<2x16x512xf32, #tpu.memory_space<vmem>>, vector<1x8x256xf32>
    %132 = vector.shape_cast %131 : vector<1x8x256xf32> to vector<8x256xf32>
    %133 = vector.shape_cast %130 : vector<8x256xf32> to vector<1x8x256xf32>
    tpu.vector_store %arg10[%c1_105, %c0_106, %c128_107], %133 {strides = array<i32>} : memref<2x16x512xf32, #tpu.memory_space<vmem>>, vector<1x8x256xf32>,
    %c1_108 = arith.constant 1 : index
    %c0_109 = arith.constant 0 : index
    %c111_110 = arith.constant 111 : index
    %134 = vector.load %arg10[%c1_108, %c0_109, %c111_110] : memref<2x16x512xf32, #tpu.memory_space<vmem>>, vector<1x8x256xf32>
    %135 = vector.shape_cast %134 : vector<1x8x256xf32> to vector<8x256xf32>
    %136 = vector.broadcast %4 : vector<1x256xf32> to vector<8x256xf32>
    %137 = arith.mulf %135, %136 : vector<8x256xf32>
    %c1_111 = arith.constant 1 : index
    %c0_112 = arith.constant 0 : index
    %c112_113 = arith.constant 112 : index
    %138 = vector.load %arg10[%c1_111, %c0_112, %c112_113] : memref<2x16x512xf32, #tpu.memory_space<vmem>>, vector<1x8x256xf32>
    %139 = vector.shape_cast %138 : vector<1x8x256xf32> to vector<8x256xf32>
    %c1_114 = arith.constant 1 : index
    %c0_115 = arith.constant 0 : index
    %c113_116 = arith.constant 113 : index
    %140 = vector.load %arg10[%c1_114, %c0_115, %c113_116] : memref<2x16x512xf32, #tpu.memory_space<vmem>>, vector<1x8x256xf32>
    %141 = vector.shape_cast %140 : vector<1x8x256xf32> to vector<8x256xf32>
    %142 = vector.broadcast %5 : vector<1x256xf32> to vector<8x256xf32>
    %143 = arith.mulf %141, %142 : vector<8x256xf32>
    %c1_117 = arith.constant 1 : index
    %c0_118 = arith.constant 0 : index
    %c127_119 = arith.constant 127 : index
    %144 = vector.load %arg10[%c1_117, %c0_118, %c127_119] : memref<2x16x512xf32, #tpu.memory_space<vmem>>, vector<1x8x256xf32>
    %145 = vector.shape_cast %144 : vector<1x8x256xf32> to vector<8x256xf32>
    %146 = vector.broadcast %4 : vector<1x256xf32> to vector<8x256xf32>
    %147 = arith.mulf %145, %146 : vector<8x256xf32>
    %c1_120 = arith.constant 1 : index
    %c0_121 = arith.constant 0 : index
    %c128_122 = arith.constant 128 : index
    %148 = vector.load %arg10[%c1_120, %c0_121, %c128_122] : memref<2x16x512xf32, #tpu.memory_space<vmem>>, vector<1x8x256xf32>
    %149 = vector.shape_cast %148 : vector<1x8x256xf32> to vector<8x256xf32>
    %c1_123 = arith.constant 1 : index
    %c0_124 = arith.constant 0 : index
    %c129_125 = arith.constant 129 : index
    %150 = vector.load %arg10[%c1_123, %c0_124, %c129_125] : memref<2x16x512xf32, #tpu.memory_space<vmem>>, vector<1x8x256xf32>
    %151 = vector.shape_cast %150 : vector<1x8x256xf32> to vector<8x256xf32>
    %152 = vector.broadcast %5 : vector<1x256xf32> to vector<8x256xf32>
    %153 = arith.mulf %151, %152 : vector<8x256xf32>
    %c1_126 = arith.constant 1 : index
    %c0_127 = arith.constant 0 : index
    %c143_128 = arith.constant 143 : index
    %154 = vector.load %arg10[%c1_126, %c0_127, %c143_128] : memref<2x16x512xf32, #tpu.memory_space<vmem>>, vector<1x8x256xf32>
    %155 = vector.shape_cast %154 : vector<1x8x256xf32> to vector<8x256xf32>
    %156 = vector.broadcast %4 : vector<1x256xf32> to vector<8x256xf32>
    %157 = arith.mulf %155, %156 : vector<8x256xf32>
    %c1_129 = arith.constant 1 : index
    %c0_130 = arith.constant 0 : index
    %c144_131 = arith.constant 144 : index
    %158 = vector.load %arg10[%c1_129, %c0_130, %c144_131] : memref<2x16x512xf32, #tpu.memory_space<vmem>>, vector<1x8x256xf32>
    %159 = vector.shape_cast %158 : vector<1x8x256xf32> to vector<8x256xf32>
    %c1_132 = arith.constant 1 : index
    %c0_133 = arith.constant 0 : index
    %c145_134 = arith.constant 145 : index
    %160 = vector.load %arg10[%c1_132, %c0_133, %c145_134] : memref<2x16x512xf32, #tpu.memory_space<vmem>>, vector<1x8x256xf32>
    %161 = vector.shape_cast %160 : vector<1x8x256xf32> to vector<8x256xf32>
    %162 = vector.broadcast %5 : vector<1x256xf32> to vector<8x256xf32>
    %163 = arith.mulf %161, %162 : vector<8x256xf32>
    %164 = tpu.concatenate %137, %139, %143, %147, %149, %153, %157, %159, %163 in 0 : vector<8x256xf32>, vector<8x256xf32>, vector<8x256xf32>, vector<8x256xf32>, vector<8x256xf32>, vector<8x256xf32>, vector<8x256xf32>, vector<8x256xf32>, vector<8x256xf32> -> vector<72x256xf32>
    %165 = arith.negf %130 : vector<8x256xf32>
    %166 = math.exp %165 : vector<8x256xf32>
    %cst_135 = arith.constant 1.000000e+00 : f32
    %167 = vector.broadcast %cst_135 : f32 to vector<8x256xf32>
    %168 = arith.addf %167, %166 : vector<8x256xf32>
    %169 = arith.divf %167, %168 : vector<8x256xf32>
    %170 = arith.mulf %130, %169 : vector<8x256xf32>
    %c0_136 = arith.constant 0 : index
    %c0_137 = arith.constant 0 : index
    %c128_138 = arith.constant 128 : index
    %171 = vector.load %arg10[%c0_136, %c0_137, %c128_138] : memref<2x16x512xf32, #tpu.memory_space<vmem>>, vector<1x8x256xf32>
    %172 = vector.shape_cast %171 : vector<1x8x256xf32> to vector<8x256xf32>
    %173 = vector.shape_cast %170 : vector<8x256xf32> to vector<1x8x256xf32>
    tpu.vector_store %arg10[%c0_136, %c0_137, %c128_138], %173 {strides = array<i32>} : memref<2x16x512xf32, #tpu.memory_space<vmem>>, vector<1x8x256xf32>,
    %c0_139 = arith.constant 0 : index
    %c0_140 = arith.constant 0 : index
    %c111_141 = arith.constant 111 : index
    %174 = vector.load %arg10[%c0_139, %c0_140, %c111_141] : memref<2x16x512xf32, #tpu.memory_space<vmem>>, vector<1x8x256xf32>
    %175 = vector.shape_cast %174 : vector<1x8x256xf32> to vector<8x256xf32>
    %176 = vector.broadcast %4 : vector<1x256xf32> to vector<8x256xf32>
    %177 = arith.mulf %175, %176 : vector<8x256xf32>
    %c0_142 = arith.constant 0 : index
    %c0_143 = arith.constant 0 : index
    %c112_144 = arith.constant 112 : index
    %178 = vector.load %arg10[%c0_142, %c0_143, %c112_144] : memref<2x16x512xf32, #tpu.memory_space<vmem>>, vector<1x8x256xf32>
    %179 = vector.shape_cast %178 : vector<1x8x256xf32> to vector<8x256xf32>
    %c0_145 = arith.constant 0 : index
    %c0_146 = arith.constant 0 : index
    %c113_147 = arith.constant 113 : index
    %180 = vector.load %arg10[%c0_145, %c0_146, %c113_147] : memref<2x16x512xf32, #tpu.memory_space<vmem>>, vector<1x8x256xf32>
    %181 = vector.shape_cast %180 : vector<1x8x256xf32> to vector<8x256xf32>
    %182 = vector.broadcast %5 : vector<1x256xf32> to vector<8x256xf32>
    %183 = arith.mulf %181, %182 : vector<8x256xf32>
    %c0_148 = arith.constant 0 : index
    %c0_149 = arith.constant 0 : index
    %c127_150 = arith.constant 127 : index
    %184 = vector.load %arg10[%c0_148, %c0_149, %c127_150] : memref<2x16x512xf32, #tpu.memory_space<vmem>>, vector<1x8x256xf32>
    %185 = vector.shape_cast %184 : vector<1x8x256xf32> to vector<8x256xf32>
    %186 = vector.broadcast %4 : vector<1x256xf32> to vector<8x256xf32>
    %187 = arith.mulf %185, %186 : vector<8x256xf32>
    %c0_151 = arith.constant 0 : index
    %c0_152 = arith.constant 0 : index
    %c128_153 = arith.constant 128 : index
    %188 = vector.load %arg10[%c0_151, %c0_152, %c128_153] : memref<2x16x512xf32, #tpu.memory_space<vmem>>, vector<1x8x256xf32>
    %189 = vector.shape_cast %188 : vector<1x8x256xf32> to vector<8x256xf32>
    %c0_154 = arith.constant 0 : index
    %c0_155 = arith.constant 0 : index
    %c129_156 = arith.constant 129 : index
    %190 = vector.load %arg10[%c0_154, %c0_155, %c129_156] : memref<2x16x512xf32, #tpu.memory_space<vmem>>, vector<1x8x256xf32>
    %191 = vector.shape_cast %190 : vector<1x8x256xf32> to vector<8x256xf32>
    %192 = vector.broadcast %5 : vector<1x256xf32> to vector<8x256xf32>
    %193 = arith.mulf %191, %192 : vector<8x256xf32>
    %c0_157 = arith.constant 0 : index
    %c0_158 = arith.constant 0 : index
    %c143_159 = arith.constant 143 : index
    %194 = vector.load %arg10[%c0_157, %c0_158, %c143_159] : memref<2x16x512xf32, #tpu.memory_space<vmem>>, vector<1x8x256xf32>
    %195 = vector.shape_cast %194 : vector<1x8x256xf32> to vector<8x256xf32>
    %196 = vector.broadcast %4 : vector<1x256xf32> to vector<8x256xf32>
    %197 = arith.mulf %195, %196 : vector<8x256xf32>
    %c0_160 = arith.constant 0 : index
    %c0_161 = arith.constant 0 : index
    %c144_162 = arith.constant 144 : index
    %198 = vector.load %arg10[%c0_160, %c0_161, %c144_162] : memref<2x16x512xf32, #tpu.memory_space<vmem>>, vector<1x8x256xf32>
    %199 = vector.shape_cast %198 : vector<1x8x256xf32> to vector<8x256xf32>
    %c0_163 = arith.constant 0 : index
    %c0_164 = arith.constant 0 : index
    %c145_165 = arith.constant 145 : index
    %200 = vector.load %arg10[%c0_163, %c0_164, %c145_165] : memref<2x16x512xf32, #tpu.memory_space<vmem>>, vector<1x8x256xf32>
    %201 = vector.shape_cast %200 : vector<1x8x256xf32> to vector<8x256xf32>
    %202 = vector.broadcast %5 : vector<1x256xf32> to vector<8x256xf32>
    %203 = arith.mulf %201, %202 : vector<8x256xf32>
    %204 = tpu.concatenate %177, %179, %183, %187, %189, %193, %197, %199, %203 in 0 : vector<8x256xf32>, vector<8x256xf32>, vector<8x256xf32>, vector<8x256xf32>, vector<8x256xf32>, vector<8x256xf32>, vector<8x256xf32>, vector<8x256xf32>, vector<8x256xf32> -> vector<72x256xf32>
    %205 = tpu.concatenate %164, %204 in 0 : vector<72x256xf32>, vector<72x256xf32> -> vector<144x256xf32>
    %c2 = arith.constant 2 : index
    %c0_166 = arith.constant 0 : index
    %c0_167 = arith.constant 0 : index
    %206 = vector.load %arg7[%c2, %c0_166, %c0_167] : memref<4x8x144xf32, #tpu.memory_space<vmem>>, vector<1x8x144xf32>
    %207 = vector.shape_cast %206 : vector<1x8x144xf32> to vector<8x144xf32>
    %c2_168 = arith.constant 2 : index
    %c0_169 = arith.constant 0 : index
    %c0_170 = arith.constant 0 : index
    %208 = vector.load %arg8[%c2_168, %c0_169, %c0_170] : memref<4x8x1xf32, #tpu.memory_space<vmem>>, vector<1x8x1xf32>
    %209 = vector.shape_cast %208 : vector<1x8x1xf32> to vector<8x1xf32>
    %cst_171 = arith.constant dense<0.000000e+00> : vector<8x256xf32>
    %210 = tpu.matmul %207, %205, %cst_171 {dimension_numbers = #tpu.dot_dimension_numbers<[1], [0], [0], [1], [0, 0, 1, 1], [], []>} : vector<8x144xf32>, vector<144x256xf32>, vector<8x256xf32> -> vector<8x256xf32>
    %211 = vector.broadcast %209 : vector<8x1xf32> to vector<8x256xf32>
    %212 = arith.addf %210, %211 : vector<8x256xf32>
    %213 = arith.negf %129 : vector<8x256xf32>
    %214 = math.exp %213 : vector<8x256xf32>
    %cst_172 = arith.constant 1.000000e+00 : f32
    %215 = vector.broadcast %cst_172 : f32 to vector<8x256xf32>
    %216 = arith.addf %215, %214 : vector<8x256xf32>
    %217 = arith.divf %215, %216 : vector<8x256xf32>
    %218 = arith.mulf %129, %217 : vector<8x256xf32>
    %219 = arith.negf %212 : vector<8x256xf32>
    %220 = math.exp %219 : vector<8x256xf32>
    %cst_173 = arith.constant 1.000000e+00 : f32
    %221 = vector.broadcast %cst_173 : f32 to vector<8x256xf32>
    %222 = arith.addf %221, %220 : vector<8x256xf32>
    %223 = arith.divf %221, %222 : vector<8x256xf32>
    %224 = arith.mulf %212, %223 : vector<8x256xf32>
    %225 = tpu.concatenate %218, %224 in 0 : vector<8x256xf32>, vector<8x256xf32> -> vector<16x256xf32>
    %c1_174 = arith.constant 1 : index
    %c0_175 = arith.constant 0 : index
    %c128_176 = arith.constant 128 : index
    %226 = vector.load %arg10[%c1_174, %c0_175, %c128_176] : memref<2x16x512xf32, #tpu.memory_space<vmem>>, vector<1x16x256xf32>
    %227 = vector.shape_cast %226 : vector<1x16x256xf32> to vector<16x256xf32>
    %228 = vector.shape_cast %225 : vector<16x256xf32> to vector<1x16x256xf32>
    tpu.vector_store %arg10[%c1_174, %c0_175, %c128_176], %228 {strides = array<i32>} : memref<2x16x512xf32, #tpu.memory_space<vmem>>, vector<1x16x256xf32>,
    %c1_177 = arith.constant 1 : index
    %c0_178 = arith.constant 0 : index
    %c111_179 = arith.constant 111 : index
    %229 = vector.load %arg10[%c1_177, %c0_178, %c111_179] : memref<2x16x512xf32, #tpu.memory_space<vmem>>, vector<1x16x256xf32>
    %230 = vector.shape_cast %229 : vector<1x16x256xf32> to vector<16x256xf32>
    %231 = vector.broadcast %4 : vector<1x256xf32> to vector<16x256xf32>
    %232 = arith.mulf %230, %231 : vector<16x256xf32>
    %c1_180 = arith.constant 1 : index
    %c0_181 = arith.constant 0 : index
    %c112_182 = arith.constant 112 : index
    %233 = vector.load %arg10[%c1_180, %c0_181, %c112_182] : memref<2x16x512xf32, #tpu.memory_space<vmem>>, vector<1x16x256xf32>
    %234 = vector.shape_cast %233 : vector<1x16x256xf32> to vector<16x256xf32>
    %c1_183 = arith.constant 1 : index
    %c0_184 = arith.constant 0 : index
    %c113_185 = arith.constant 113 : index
    %235 = vector.load %arg10[%c1_183, %c0_184, %c113_185] : memref<2x16x512xf32, #tpu.memory_space<vmem>>, vector<1x16x256xf32>
    %236 = vector.shape_cast %235 : vector<1x16x256xf32> to vector<16x256xf32>
    %237 = vector.broadcast %5 : vector<1x256xf32> to vector<16x256xf32>
    %238 = arith.mulf %236, %237 : vector<16x256xf32>
    %c1_186 = arith.constant 1 : index
    %c0_187 = arith.constant 0 : index
    %c127_188 = arith.constant 127 : index
    %239 = vector.load %arg10[%c1_186, %c0_187, %c127_188] : memref<2x16x512xf32, #tpu.memory_space<vmem>>, vector<1x16x256xf32>
    %240 = vector.shape_cast %239 : vector<1x16x256xf32> to vector<16x256xf32>
    %241 = vector.broadcast %4 : vector<1x256xf32> to vector<16x256xf32>
    %242 = arith.mulf %240, %241 : vector<16x256xf32>
    %c1_189 = arith.constant 1 : index
    %c0_190 = arith.constant 0 : index
    %c128_191 = arith.constant 128 : index
    %243 = vector.load %arg10[%c1_189, %c0_190, %c128_191] : memref<2x16x512xf32, #tpu.memory_space<vmem>>, vector<1x16x256xf32>
    %244 = vector.shape_cast %243 : vector<1x16x256xf32> to vector<16x256xf32>
    %c1_192 = arith.constant 1 : index
    %c0_193 = arith.constant 0 : index
    %c129_194 = arith.constant 129 : index
    %245 = vector.load %arg10[%c1_192, %c0_193, %c129_194] : memref<2x16x512xf32, #tpu.memory_space<vmem>>, vector<1x16x256xf32>
    %246 = vector.shape_cast %245 : vector<1x16x256xf32> to vector<16x256xf32>
    %247 = vector.broadcast %5 : vector<1x256xf32> to vector<16x256xf32>
    %248 = arith.mulf %246, %247 : vector<16x256xf32>
    %c1_195 = arith.constant 1 : index
    %c0_196 = arith.constant 0 : index
    %c143_197 = arith.constant 143 : index
    %249 = vector.load %arg10[%c1_195, %c0_196, %c143_197] : memref<2x16x512xf32, #tpu.memory_space<vmem>>, vector<1x16x256xf32>
    %250 = vector.shape_cast %249 : vector<1x16x256xf32> to vector<16x256xf32>
    %251 = vector.broadcast %4 : vector<1x256xf32> to vector<16x256xf32>
    %252 = arith.mulf %250, %251 : vector<16x256xf32>
    %c1_198 = arith.constant 1 : index
    %c0_199 = arith.constant 0 : index
    %c144_200 = arith.constant 144 : index
    %253 = vector.load %arg10[%c1_198, %c0_199, %c144_200] : memref<2x16x512xf32, #tpu.memory_space<vmem>>, vector<1x16x256xf32>
    %254 = vector.shape_cast %253 : vector<1x16x256xf32> to vector<16x256xf32>
    %c1_201 = arith.constant 1 : index
    %c0_202 = arith.constant 0 : index
    %c145_203 = arith.constant 145 : index
    %255 = vector.load %arg10[%c1_201, %c0_202, %c145_203] : memref<2x16x512xf32, #tpu.memory_space<vmem>>, vector<1x16x256xf32>
    %256 = vector.shape_cast %255 : vector<1x16x256xf32> to vector<16x256xf32>
    %257 = vector.broadcast %5 : vector<1x256xf32> to vector<16x256xf32>
    %258 = arith.mulf %256, %257 : vector<16x256xf32>
    %259 = tpu.concatenate %232, %234, %238, %242, %244, %248, %252, %254, %258 in 0 : vector<16x256xf32>, vector<16x256xf32>, vector<16x256xf32>, vector<16x256xf32>, vector<16x256xf32>, vector<16x256xf32>, vector<16x256xf32>, vector<16x256xf32>, vector<16x256xf32> -> vector<144x256xf32>
    %c0_204 = arith.constant 0 : index
    %c0_205 = arith.constant 0 : index
    %260 = vector.load %arg4[%c0_204, %c0_205] : memref<16x144xf32, #tpu.memory_space<vmem>>, vector<16x144xf32>
    %c0_206 = arith.constant 0 : index
    %c0_207 = arith.constant 0 : index
    %261 = vector.load %arg6[%c0_206, %c0_207] : memref<16x1xf32, #tpu.memory_space<vmem>>, vector<16x1xf32>
    %cst_208 = arith.constant dense<0.000000e+00> : vector<16x256xf32>
    %262 = tpu.matmul %260, %259, %cst_208 {dimension_numbers = #tpu.dot_dimension_numbers<[1], [0], [0], [1], [0, 0, 1, 1], [], []>} : vector<16x144xf32>, vector<144x256xf32>, vector<16x256xf32> -> vector<16x256xf32>
    %263 = vector.broadcast %261 : vector<16x1xf32> to vector<16x256xf32>
    %264 = arith.addf %262, %263 : vector<16x256xf32>
    %265 = vector.extract_strided_slice %264 {offsets = [0, 0], sizes = [8, 256], strides = [1, 1]} : vector<16x256xf32> to vector<8x256xf32>
    %c0_209 = arith.constant 0 : index
    %c0_210 = arith.constant 0 : index
    %c128_211 = arith.constant 128 : index
    %266 = vector.load %arg10[%c0_209, %c0_210, %c128_211] : memref<2x16x512xf32, #tpu.memory_space<vmem>>, vector<1x8x256xf32>
    %267 = vector.shape_cast %266 : vector<1x8x256xf32> to vector<8x256xf32>
    %268 = vector.shape_cast %265 : vector<8x256xf32> to vector<1x8x256xf32>
    tpu.vector_store %arg10[%c0_209, %c0_210, %c128_211], %268 {strides = array<i32>} : memref<2x16x512xf32, #tpu.memory_space<vmem>>, vector<1x8x256xf32>,
    %c0_212 = arith.constant 0 : index
    %c0_213 = arith.constant 0 : index
    %c111_214 = arith.constant 111 : index
    %269 = vector.load %arg10[%c0_212, %c0_213, %c111_214] : memref<2x16x512xf32, #tpu.memory_space<vmem>>, vector<1x8x256xf32>
    %270 = vector.shape_cast %269 : vector<1x8x256xf32> to vector<8x256xf32>
    %271 = vector.broadcast %4 : vector<1x256xf32> to vector<8x256xf32>
    %272 = arith.mulf %270, %271 : vector<8x256xf32>
    %c0_215 = arith.constant 0 : index
    %c0_216 = arith.constant 0 : index
    %c112_217 = arith.constant 112 : index
    %273 = vector.load %arg10[%c0_215, %c0_216, %c112_217] : memref<2x16x512xf32, #tpu.memory_space<vmem>>, vector<1x8x256xf32>
    %274 = vector.shape_cast %273 : vector<1x8x256xf32> to vector<8x256xf32>
    %c0_218 = arith.constant 0 : index
    %c0_219 = arith.constant 0 : index
    %c113_220 = arith.constant 113 : index
    %275 = vector.load %arg10[%c0_218, %c0_219, %c113_220] : memref<2x16x512xf32, #tpu.memory_space<vmem>>, vector<1x8x256xf32>
    %276 = vector.shape_cast %275 : vector<1x8x256xf32> to vector<8x256xf32>
    %277 = vector.broadcast %5 : vector<1x256xf32> to vector<8x256xf32>
    %278 = arith.mulf %276, %277 : vector<8x256xf32>
    %c0_221 = arith.constant 0 : index
    %c0_222 = arith.constant 0 : index
    %c127_223 = arith.constant 127 : index
    %279 = vector.load %arg10[%c0_221, %c0_222, %c127_223] : memref<2x16x512xf32, #tpu.memory_space<vmem>>, vector<1x8x256xf32>
    %280 = vector.shape_cast %279 : vector<1x8x256xf32> to vector<8x256xf32>
    %281 = vector.broadcast %4 : vector<1x256xf32> to vector<8x256xf32>
    %282 = arith.mulf %280, %281 : vector<8x256xf32>
    %c0_224 = arith.constant 0 : index
    %c0_225 = arith.constant 0 : index
    %c128_226 = arith.constant 128 : index
    %283 = vector.load %arg10[%c0_224, %c0_225, %c128_226] : memref<2x16x512xf32, #tpu.memory_space<vmem>>, vector<1x8x256xf32>
    %284 = vector.shape_cast %283 : vector<1x8x256xf32> to vector<8x256xf32>
    %c0_227 = arith.constant 0 : index
    %c0_228 = arith.constant 0 : index
    %c129_229 = arith.constant 129 : index
    %285 = vector.load %arg10[%c0_227, %c0_228, %c129_229] : memref<2x16x512xf32, #tpu.memory_space<vmem>>, vector<1x8x256xf32>
    %286 = vector.shape_cast %285 : vector<1x8x256xf32> to vector<8x256xf32>
    %287 = vector.broadcast %5 : vector<1x256xf32> to vector<8x256xf32>
    %288 = arith.mulf %286, %287 : vector<8x256xf32>
    %c0_230 = arith.constant 0 : index
    %c0_231 = arith.constant 0 : index
    %c143_232 = arith.constant 143 : index
    %289 = vector.load %arg10[%c0_230, %c0_231, %c143_232] : memref<2x16x512xf32, #tpu.memory_space<vmem>>, vector<1x8x256xf32>
    %290 = vector.shape_cast %289 : vector<1x8x256xf32> to vector<8x256xf32>
    %291 = vector.broadcast %4 : vector<1x256xf32> to vector<8x256xf32>
    %292 = arith.mulf %290, %291 : vector<8x256xf32>
    %c0_233 = arith.constant 0 : index
    %c0_234 = arith.constant 0 : index
    %c144_235 = arith.constant 144 : index
    %293 = vector.load %arg10[%c0_233, %c0_234, %c144_235] : memref<2x16x512xf32, #tpu.memory_space<vmem>>, vector<1x8x256xf32>
    %294 = vector.shape_cast %293 : vector<1x8x256xf32> to vector<8x256xf32>
    %c0_236 = arith.constant 0 : index
    %c0_237 = arith.constant 0 : index
    %c145_238 = arith.constant 145 : index
    %295 = vector.load %arg10[%c0_236, %c0_237, %c145_238] : memref<2x16x512xf32, #tpu.memory_space<vmem>>, vector<1x8x256xf32>
    %296 = vector.shape_cast %295 : vector<1x8x256xf32> to vector<8x256xf32>
    %297 = vector.broadcast %5 : vector<1x256xf32> to vector<8x256xf32>
    %298 = arith.mulf %296, %297 : vector<8x256xf32>
    %299 = tpu.concatenate %272, %274, %278, %282, %284, %288, %292, %294, %298 in 0 : vector<8x256xf32>, vector<8x256xf32>, vector<8x256xf32>, vector<8x256xf32>, vector<8x256xf32>, vector<8x256xf32>, vector<8x256xf32>, vector<8x256xf32>, vector<8x256xf32> -> vector<72x256xf32>
    %300 = arith.negf %265 : vector<8x256xf32>
    %301 = math.exp %300 : vector<8x256xf32>
    %cst_239 = arith.constant 1.000000e+00 : f32
    %302 = vector.broadcast %cst_239 : f32 to vector<8x256xf32>
    %303 = arith.addf %302, %301 : vector<8x256xf32>
    %304 = arith.divf %302, %303 : vector<8x256xf32>
    %305 = arith.mulf %265, %304 : vector<8x256xf32>
    %c1_240 = arith.constant 1 : index
    %c0_241 = arith.constant 0 : index
    %c128_242 = arith.constant 128 : index
    %306 = vector.load %arg10[%c1_240, %c0_241, %c128_242] : memref<2x16x512xf32, #tpu.memory_space<vmem>>, vector<1x8x256xf32>
    %307 = vector.shape_cast %306 : vector<1x8x256xf32> to vector<8x256xf32>
    %308 = vector.shape_cast %305 : vector<8x256xf32> to vector<1x8x256xf32>
    tpu.vector_store %arg10[%c1_240, %c0_241, %c128_242], %308 {strides = array<i32>} : memref<2x16x512xf32, #tpu.memory_space<vmem>>, vector<1x8x256xf32>,
    %c1_243 = arith.constant 1 : index
    %c0_244 = arith.constant 0 : index
    %c111_245 = arith.constant 111 : index
    %309 = vector.load %arg10[%c1_243, %c0_244, %c111_245] : memref<2x16x512xf32, #tpu.memory_space<vmem>>, vector<1x8x256xf32>
    %310 = vector.shape_cast %309 : vector<1x8x256xf32> to vector<8x256xf32>
    %311 = vector.broadcast %4 : vector<1x256xf32> to vector<8x256xf32>
    %312 = arith.mulf %310, %311 : vector<8x256xf32>
    %c1_246 = arith.constant 1 : index
    %c0_247 = arith.constant 0 : index
    %c112_248 = arith.constant 112 : index
    %313 = vector.load %arg10[%c1_246, %c0_247, %c112_248] : memref<2x16x512xf32, #tpu.memory_space<vmem>>, vector<1x8x256xf32>
    %314 = vector.shape_cast %313 : vector<1x8x256xf32> to vector<8x256xf32>
    %c1_249 = arith.constant 1 : index
    %c0_250 = arith.constant 0 : index
    %c113_251 = arith.constant 113 : index
    %315 = vector.load %arg10[%c1_249, %c0_250, %c113_251] : memref<2x16x512xf32, #tpu.memory_space<vmem>>, vector<1x8x256xf32>
    %316 = vector.shape_cast %315 : vector<1x8x256xf32> to vector<8x256xf32>
    %317 = vector.broadcast %5 : vector<1x256xf32> to vector<8x256xf32>
    %318 = arith.mulf %316, %317 : vector<8x256xf32>
    %c1_252 = arith.constant 1 : index
    %c0_253 = arith.constant 0 : index
    %c127_254 = arith.constant 127 : index
    %319 = vector.load %arg10[%c1_252, %c0_253, %c127_254] : memref<2x16x512xf32, #tpu.memory_space<vmem>>, vector<1x8x256xf32>
    %320 = vector.shape_cast %319 : vector<1x8x256xf32> to vector<8x256xf32>
    %321 = vector.broadcast %4 : vector<1x256xf32> to vector<8x256xf32>
    %322 = arith.mulf %320, %321 : vector<8x256xf32>
    %c1_255 = arith.constant 1 : index
    %c0_256 = arith.constant 0 : index
    %c128_257 = arith.constant 128 : index
    %323 = vector.load %arg10[%c1_255, %c0_256, %c128_257] : memref<2x16x512xf32, #tpu.memory_space<vmem>>, vector<1x8x256xf32>
    %324 = vector.shape_cast %323 : vector<1x8x256xf32> to vector<8x256xf32>
    %c1_258 = arith.constant 1 : index
    %c0_259 = arith.constant 0 : index
    %c129_260 = arith.constant 129 : index
    %325 = vector.load %arg10[%c1_258, %c0_259, %c129_260] : memref<2x16x512xf32, #tpu.memory_space<vmem>>, vector<1x8x256xf32>
    %326 = vector.shape_cast %325 : vector<1x8x256xf32> to vector<8x256xf32>
    %327 = vector.broadcast %5 : vector<1x256xf32> to vector<8x256xf32>
    %328 = arith.mulf %326, %327 : vector<8x256xf32>
    %c1_261 = arith.constant 1 : index
    %c0_262 = arith.constant 0 : index
    %c143_263 = arith.constant 143 : index
    %329 = vector.load %arg10[%c1_261, %c0_262, %c143_263] : memref<2x16x512xf32, #tpu.memory_space<vmem>>, vector<1x8x256xf32>
    %330 = vector.shape_cast %329 : vector<1x8x256xf32> to vector<8x256xf32>
    %331 = vector.broadcast %4 : vector<1x256xf32> to vector<8x256xf32>
    %332 = arith.mulf %330, %331 : vector<8x256xf32>
    %c1_264 = arith.constant 1 : index
    %c0_265 = arith.constant 0 : index
    %c144_266 = arith.constant 144 : index
    %333 = vector.load %arg10[%c1_264, %c0_265, %c144_266] : memref<2x16x512xf32, #tpu.memory_space<vmem>>, vector<1x8x256xf32>
    %334 = vector.shape_cast %333 : vector<1x8x256xf32> to vector<8x256xf32>
    %c1_267 = arith.constant 1 : index
    %c0_268 = arith.constant 0 : index
    %c145_269 = arith.constant 145 : index
    %335 = vector.load %arg10[%c1_267, %c0_268, %c145_269] : memref<2x16x512xf32, #tpu.memory_space<vmem>>, vector<1x8x256xf32>
    %336 = vector.shape_cast %335 : vector<1x8x256xf32> to vector<8x256xf32>
    %337 = vector.broadcast %5 : vector<1x256xf32> to vector<8x256xf32>
    %338 = arith.mulf %336, %337 : vector<8x256xf32>
    %339 = tpu.concatenate %312, %314, %318, %322, %324, %328, %332, %334, %338 in 0 : vector<8x256xf32>, vector<8x256xf32>, vector<8x256xf32>, vector<8x256xf32>, vector<8x256xf32>, vector<8x256xf32>, vector<8x256xf32>, vector<8x256xf32>, vector<8x256xf32> -> vector<72x256xf32>
    %340 = tpu.concatenate %299, %339 in 0 : vector<72x256xf32>, vector<72x256xf32> -> vector<144x256xf32>
    %c1_270 = arith.constant 1 : index
    %c0_271 = arith.constant 0 : index
    %c0_272 = arith.constant 0 : index
    %341 = vector.load %arg7[%c1_270, %c0_271, %c0_272] : memref<4x8x144xf32, #tpu.memory_space<vmem>>, vector<1x8x144xf32>
    %342 = vector.shape_cast %341 : vector<1x8x144xf32> to vector<8x144xf32>
    %c1_273 = arith.constant 1 : index
    %c0_274 = arith.constant 0 : index
    %c0_275 = arith.constant 0 : index
    %343 = vector.load %arg8[%c1_273, %c0_274, %c0_275] : memref<4x8x1xf32, #tpu.memory_space<vmem>>, vector<1x8x1xf32>
    %344 = vector.shape_cast %343 : vector<1x8x1xf32> to vector<8x1xf32>
    %cst_276 = arith.constant dense<0.000000e+00> : vector<8x256xf32>
    %345 = tpu.matmul %342, %340, %cst_276 {dimension_numbers = #tpu.dot_dimension_numbers<[1], [0], [0], [1], [0, 0, 1, 1], [], []>} : vector<8x144xf32>, vector<144x256xf32>, vector<8x256xf32> -> vector<8x256xf32>
    %346 = vector.broadcast %344 : vector<8x1xf32> to vector<8x256xf32>
    %347 = arith.addf %345, %346 : vector<8x256xf32>
    %348 = vector.extract_strided_slice %264 {offsets = [8, 0], sizes = [8, 256], strides = [1, 1]} : vector<16x256xf32> to vector<8x256xf32>
    %c0_277 = arith.constant 0 : index
    %c0_278 = arith.constant 0 : index
    %c128_279 = arith.constant 128 : index
    %349 = vector.load %arg10[%c0_277, %c0_278, %c128_279] : memref<2x16x512xf32, #tpu.memory_space<vmem>>, vector<1x8x256xf32>
    %350 = vector.shape_cast %349 : vector<1x8x256xf32> to vector<8x256xf32>
    %351 = vector.shape_cast %348 : vector<8x256xf32> to vector<1x8x256xf32>
    tpu.vector_store %arg10[%c0_277, %c0_278, %c128_279], %351 {strides = array<i32>} : memref<2x16x512xf32, #tpu.memory_space<vmem>>, vector<1x8x256xf32>,
    %c0_280 = arith.constant 0 : index
    %c0_281 = arith.constant 0 : index
    %c111_282 = arith.constant 111 : index
    %352 = vector.load %arg10[%c0_280, %c0_281, %c111_282] : memref<2x16x512xf32, #tpu.memory_space<vmem>>, vector<1x8x256xf32>
    %353 = vector.shape_cast %352 : vector<1x8x256xf32> to vector<8x256xf32>
    %354 = vector.broadcast %4 : vector<1x256xf32> to vector<8x256xf32>
    %355 = arith.mulf %353, %354 : vector<8x256xf32>
    %c0_283 = arith.constant 0 : index
    %c0_284 = arith.constant 0 : index
    %c112_285 = arith.constant 112 : index
    %356 = vector.load %arg10[%c0_283, %c0_284, %c112_285] : memref<2x16x512xf32, #tpu.memory_space<vmem>>, vector<1x8x256xf32>
    %357 = vector.shape_cast %356 : vector<1x8x256xf32> to vector<8x256xf32>
    %c0_286 = arith.constant 0 : index
    %c0_287 = arith.constant 0 : index
    %c113_288 = arith.constant 113 : index
    %358 = vector.load %arg10[%c0_286, %c0_287, %c113_288] : memref<2x16x512xf32, #tpu.memory_space<vmem>>, vector<1x8x256xf32>
    %359 = vector.shape_cast %358 : vector<1x8x256xf32> to vector<8x256xf32>
    %360 = vector.broadcast %5 : vector<1x256xf32> to vector<8x256xf32>
    %361 = arith.mulf %359, %360 : vector<8x256xf32>
    %c0_289 = arith.constant 0 : index
    %c0_290 = arith.constant 0 : index
    %c127_291 = arith.constant 127 : index
    %362 = vector.load %arg10[%c0_289, %c0_290, %c127_291] : memref<2x16x512xf32, #tpu.memory_space<vmem>>, vector<1x8x256xf32>
    %363 = vector.shape_cast %362 : vector<1x8x256xf32> to vector<8x256xf32>
    %364 = vector.broadcast %4 : vector<1x256xf32> to vector<8x256xf32>
    %365 = arith.mulf %363, %364 : vector<8x256xf32>
    %c0_292 = arith.constant 0 : index
    %c0_293 = arith.constant 0 : index
    %c128_294 = arith.constant 128 : index
    %366 = vector.load %arg10[%c0_292, %c0_293, %c128_294] : memref<2x16x512xf32, #tpu.memory_space<vmem>>, vector<1x8x256xf32>
    %367 = vector.shape_cast %366 : vector<1x8x256xf32> to vector<8x256xf32>
    %c0_295 = arith.constant 0 : index
    %c0_296 = arith.constant 0 : index
    %c129_297 = arith.constant 129 : index
    %368 = vector.load %arg10[%c0_295, %c0_296, %c129_297] : memref<2x16x512xf32, #tpu.memory_space<vmem>>, vector<1x8x256xf32>
    %369 = vector.shape_cast %368 : vector<1x8x256xf32> to vector<8x256xf32>
    %370 = vector.broadcast %5 : vector<1x256xf32> to vector<8x256xf32>
    %371 = arith.mulf %369, %370 : vector<8x256xf32>
    %c0_298 = arith.constant 0 : index
    %c0_299 = arith.constant 0 : index
    %c143_300 = arith.constant 143 : index
    %372 = vector.load %arg10[%c0_298, %c0_299, %c143_300] : memref<2x16x512xf32, #tpu.memory_space<vmem>>, vector<1x8x256xf32>
    %373 = vector.shape_cast %372 : vector<1x8x256xf32> to vector<8x256xf32>
    %374 = vector.broadcast %4 : vector<1x256xf32> to vector<8x256xf32>
    %375 = arith.mulf %373, %374 : vector<8x256xf32>
    %c0_301 = arith.constant 0 : index
    %c0_302 = arith.constant 0 : index
    %c144_303 = arith.constant 144 : index
    %376 = vector.load %arg10[%c0_301, %c0_302, %c144_303] : memref<2x16x512xf32, #tpu.memory_space<vmem>>, vector<1x8x256xf32>
    %377 = vector.shape_cast %376 : vector<1x8x256xf32> to vector<8x256xf32>
    %c0_304 = arith.constant 0 : index
    %c0_305 = arith.constant 0 : index
    %c145_306 = arith.constant 145 : index
    %378 = vector.load %arg10[%c0_304, %c0_305, %c145_306] : memref<2x16x512xf32, #tpu.memory_space<vmem>>, vector<1x8x256xf32>
    %379 = vector.shape_cast %378 : vector<1x8x256xf32> to vector<8x256xf32>
    %380 = vector.broadcast %5 : vector<1x256xf32> to vector<8x256xf32>
    %381 = arith.mulf %379, %380 : vector<8x256xf32>
    %382 = tpu.concatenate %355, %357, %361, %365, %367, %371, %375, %377, %381 in 0 : vector<8x256xf32>, vector<8x256xf32>, vector<8x256xf32>, vector<8x256xf32>, vector<8x256xf32>, vector<8x256xf32>, vector<8x256xf32>, vector<8x256xf32>, vector<8x256xf32> -> vector<72x256xf32>
    %383 = arith.negf %348 : vector<8x256xf32>
    %384 = math.exp %383 : vector<8x256xf32>
    %cst_307 = arith.constant 1.000000e+00 : f32
    %385 = vector.broadcast %cst_307 : f32 to vector<8x256xf32>
    %386 = arith.addf %385, %384 : vector<8x256xf32>
    %387 = arith.divf %385, %386 : vector<8x256xf32>
    %388 = arith.mulf %348, %387 : vector<8x256xf32>
    %c1_308 = arith.constant 1 : index
    %c0_309 = arith.constant 0 : index
    %c128_310 = arith.constant 128 : index
    %389 = vector.load %arg10[%c1_308, %c0_309, %c128_310] : memref<2x16x512xf32, #tpu.memory_space<vmem>>, vector<1x8x256xf32>
    %390 = vector.shape_cast %389 : vector<1x8x256xf32> to vector<8x256xf32>
    %391 = vector.shape_cast %388 : vector<8x256xf32> to vector<1x8x256xf32>
    tpu.vector_store %arg10[%c1_308, %c0_309, %c128_310], %391 {strides = array<i32>} : memref<2x16x512xf32, #tpu.memory_space<vmem>>, vector<1x8x256xf32>,
    %c1_311 = arith.constant 1 : index
    %c0_312 = arith.constant 0 : index
    %c111_313 = arith.constant 111 : index
    %392 = vector.load %arg10[%c1_311, %c0_312, %c111_313] : memref<2x16x512xf32, #tpu.memory_space<vmem>>, vector<1x8x256xf32>
    %393 = vector.shape_cast %392 : vector<1x8x256xf32> to vector<8x256xf32>
    %394 = vector.broadcast %4 : vector<1x256xf32> to vector<8x256xf32>
    %395 = arith.mulf %393, %394 : vector<8x256xf32>
    %c1_314 = arith.constant 1 : index
    %c0_315 = arith.constant 0 : index
    %c112_316 = arith.constant 112 : index
    %396 = vector.load %arg10[%c1_314, %c0_315, %c112_316] : memref<2x16x512xf32, #tpu.memory_space<vmem>>, vector<1x8x256xf32>
    %397 = vector.shape_cast %396 : vector<1x8x256xf32> to vector<8x256xf32>
    %c1_317 = arith.constant 1 : index
    %c0_318 = arith.constant 0 : index
    %c113_319 = arith.constant 113 : index
    %398 = vector.load %arg10[%c1_317, %c0_318, %c113_319] : memref<2x16x512xf32, #tpu.memory_space<vmem>>, vector<1x8x256xf32>
    %399 = vector.shape_cast %398 : vector<1x8x256xf32> to vector<8x256xf32>
    %400 = vector.broadcast %5 : vector<1x256xf32> to vector<8x256xf32>
    %401 = arith.mulf %399, %400 : vector<8x256xf32>
    %c1_320 = arith.constant 1 : index
    %c0_321 = arith.constant 0 : index
    %c127_322 = arith.constant 127 : index
    %402 = vector.load %arg10[%c1_320, %c0_321, %c127_322] : memref<2x16x512xf32, #tpu.memory_space<vmem>>, vector<1x8x256xf32>
    %403 = vector.shape_cast %402 : vector<1x8x256xf32> to vector<8x256xf32>
    %404 = vector.broadcast %4 : vector<1x256xf32> to vector<8x256xf32>
    %405 = arith.mulf %403, %404 : vector<8x256xf32>
    %c1_323 = arith.constant 1 : index
    %c0_324 = arith.constant 0 : index
    %c128_325 = arith.constant 128 : index
    %406 = vector.load %arg10[%c1_323, %c0_324, %c128_325] : memref<2x16x512xf32, #tpu.memory_space<vmem>>, vector<1x8x256xf32>
    %407 = vector.shape_cast %406 : vector<1x8x256xf32> to vector<8x256xf32>
    %c1_326 = arith.constant 1 : index
    %c0_327 = arith.constant 0 : index
    %c129_328 = arith.constant 129 : index
    %408 = vector.load %arg10[%c1_326, %c0_327, %c129_328] : memref<2x16x512xf32, #tpu.memory_space<vmem>>, vector<1x8x256xf32>
    %409 = vector.shape_cast %408 : vector<1x8x256xf32> to vector<8x256xf32>
    %410 = vector.broadcast %5 : vector<1x256xf32> to vector<8x256xf32>
    %411 = arith.mulf %409, %410 : vector<8x256xf32>
    %c1_329 = arith.constant 1 : index
    %c0_330 = arith.constant 0 : index
    %c143_331 = arith.constant 143 : index
    %412 = vector.load %arg10[%c1_329, %c0_330, %c143_331] : memref<2x16x512xf32, #tpu.memory_space<vmem>>, vector<1x8x256xf32>
    %413 = vector.shape_cast %412 : vector<1x8x256xf32> to vector<8x256xf32>
    %414 = vector.broadcast %4 : vector<1x256xf32> to vector<8x256xf32>
    %415 = arith.mulf %413, %414 : vector<8x256xf32>
    %c1_332 = arith.constant 1 : index
    %c0_333 = arith.constant 0 : index
    %c144_334 = arith.constant 144 : index
    %416 = vector.load %arg10[%c1_332, %c0_333, %c144_334] : memref<2x16x512xf32, #tpu.memory_space<vmem>>, vector<1x8x256xf32>
    %417 = vector.shape_cast %416 : vector<1x8x256xf32> to vector<8x256xf32>
    %c1_335 = arith.constant 1 : index
    %c0_336 = arith.constant 0 : index
    %c145_337 = arith.constant 145 : index
    %418 = vector.load %arg10[%c1_335, %c0_336, %c145_337] : memref<2x16x512xf32, #tpu.memory_space<vmem>>, vector<1x8x256xf32>
    %419 = vector.shape_cast %418 : vector<1x8x256xf32> to vector<8x256xf32>
    %420 = vector.broadcast %5 : vector<1x256xf32> to vector<8x256xf32>
    %421 = arith.mulf %419, %420 : vector<8x256xf32>
    %422 = tpu.concatenate %395, %397, %401, %405, %407, %411, %415, %417, %421 in 0 : vector<8x256xf32>, vector<8x256xf32>, vector<8x256xf32>, vector<8x256xf32>, vector<8x256xf32>, vector<8x256xf32>, vector<8x256xf32>, vector<8x256xf32>, vector<8x256xf32> -> vector<72x256xf32>
    %423 = tpu.concatenate %382, %422 in 0 : vector<72x256xf32>, vector<72x256xf32> -> vector<144x256xf32>
    %c3 = arith.constant 3 : index
    %c0_338 = arith.constant 0 : index
    %c0_339 = arith.constant 0 : index
    %424 = vector.load %arg7[%c3, %c0_338, %c0_339] : memref<4x8x144xf32, #tpu.memory_space<vmem>>, vector<1x8x144xf32>
    %425 = vector.shape_cast %424 : vector<1x8x144xf32> to vector<8x144xf32>
    %c3_340 = arith.constant 3 : index
    %c0_341 = arith.constant 0 : index
    %c0_342 = arith.constant 0 : index
    %426 = vector.load %arg8[%c3_340, %c0_341, %c0_342] : memref<4x8x1xf32, #tpu.memory_space<vmem>>, vector<1x8x1xf32>
    %427 = vector.shape_cast %426 : vector<1x8x1xf32> to vector<8x1xf32>
    %cst_343 = arith.constant dense<0.000000e+00> : vector<8x256xf32>
    %428 = tpu.matmul %425, %423, %cst_343 {dimension_numbers = #tpu.dot_dimension_numbers<[1], [0], [0], [1], [0, 0, 1, 1], [], []>} : vector<8x144xf32>, vector<144x256xf32>, vector<8x256xf32> -> vector<8x256xf32>
    %429 = vector.broadcast %427 : vector<8x1xf32> to vector<8x256xf32>
    %430 = arith.addf %428, %429 : vector<8x256xf32>
    %431 = tpu.concatenate %347, %430 in 0 : vector<8x256xf32>, vector<8x256xf32> -> vector<16x256xf32>
    %c0_344 = arith.constant 0 : index
    %c0_345 = arith.constant 0 : index
    %c0_346 = arith.constant 0 : index
    %432 = vector.load %arg9[%c0_344, %c0_345, %c0_346] : memref<1x16x256xf32, #tpu.memory_space<vmem>>, vector<1x16x256xf32>
    %433 = vector.shape_cast %432 : vector<1x16x256xf32> to vector<16x256xf32>
    %434 = vector.shape_cast %431 : vector<16x256xf32> to vector<1x16x256xf32>
    tpu.vector_store %arg9[%c0_344, %c0_345, %c0_346], %434 {strides = array<i32>} : memref<1x16x256xf32, #tpu.memory_space<vmem>>, vector<1x16x256xf32>,
    return
  }
  func.func @transform_0(%arg0: i32) -> (i32, i32, i32) {
    %c0_i32 = arith.constant 0 : i32
    %c0_i32_0 = arith.constant 0 : i32
    %c0_i32_1 = arith.constant 0 : i32
    return %arg0, %c0_i32, %c0_i32_0 : i32, i32, i32
  }
  func.func @transform_1(%arg0: i32) -> (i32, i32) {
    %c0_i32 = arith.constant 0 : i32
    %c0_i32_0 = arith.constant 0 : i32
    %c0_i32_1 = arith.constant 0 : i32
    return %c0_i32, %c0_i32_0 : i32, i32
  }
  func.func @transform_2(%arg0: i32) -> (i32, i32) {
    %c0_i32 = arith.constant 0 : i32
    %c0_i32_0 = arith.constant 0 : i32
    %c0_i32_1 = arith.constant 0 : i32
    return %c0_i32, %c0_i32_0 : i32, i32
  }
  func.func @transform_3(%arg0: i32) -> (i32, i32) {
    %c0_i32 = arith.constant 0 : i32
    %c0_i32_0 = arith.constant 0 : i32
    %c0_i32_1 = arith.constant 0 : i32
    return %c0_i32, %c0_i32_0 : i32, i32
  }
  func.func @transform_4(%arg0: i32) -> (i32, i32) {
    %c0_i32 = arith.constant 0 : i32
    %c0_i32_0 = arith.constant 0 : i32
    %c0_i32_1 = arith.constant 0 : i32
    return %c0_i32, %c0_i32_0 : i32, i32
  }
  func.func @transform_5(%arg0: i32) -> (i32, i32) {
    %c0_i32 = arith.constant 0 : i32
    %c0_i32_0 = arith.constant 0 : i32
    %c0_i32_1 = arith.constant 0 : i32
    return %c0_i32, %c0_i32_0 : i32, i32
  }
  func.func @transform_6(%arg0: i32) -> (i32, i32, i32) {
    %c0_i32 = arith.constant 0 : i32
    %c0_i32_0 = arith.constant 0 : i32
    %c0_i32_1 = arith.constant 0 : i32
    %c0_i32_2 = arith.constant 0 : i32
    return %c0_i32, %c0_i32_0, %c0_i32_1 : i32, i32, i32
  }
  func.func @transform_7(%arg0: i32) -> (i32, i32, i32) {
    %c0_i32 = arith.constant 0 : i32
    %c0_i32_0 = arith.constant 0 : i32
    %c0_i32_1 = arith.constant 0 : i32
    %c0_i32_2 = arith.constant 0 : i32
    return %c0_i32, %c0_i32_0, %c0_i32_1 : i32, i32, i32
  }
  func.func @transform_8(%arg0: i32) -> (i32, i32, i32) {
    %c0_i32 = arith.constant 0 : i32
    %c0_i32_0 = arith.constant 0 : i32
    %c0_i32_1 = arith.constant 0 : i32
    return %arg0, %c0_i32, %c0_i32_0 : i32, i32, i32
  }
}

</mosaic_0001>

<bundles_post_ra>
// kernel: parallel_block.1
= control target key start
LH: loop header
LB: loop body
LE: loop exit
PB: predicated region body
PF: predicated region fallthrough
CT: control target
= control target key end

     0   :  { %s4963_s27 = smov 0   ;;  %s6480_s0 = inlined_call_operand.vmem [shape: f32[2,8,256], index: 0, kind: input, shape index: {}]   ;;  %s6481_s1 = inlined_call_operand.vmem [shape: f32[2,256], index: 1, kind: input, shape index: {}]   ;;  %s6482_s2 = inlined_call_operand.vmem [shape: f32[16,72], index: 2, kind: input, shape index: {}]   ;;  %s6483_s3 = inlined_call_operand.vmem [shape: f32[16,144], index: 3, kind: input, shape index: {}]   ;;  %s6484_s4 = inlined_call_operand.vmem [shape: f32[16,1], index: 4, kind: input, shape index: {}]   ;;  %s6485_s5 = inlined_call_operand.vmem [shape: f32[16,1], index: 5, kind: input, shape index: {}]   ;;  %s6486_s6 = inlined_call_operand.vmem [shape: f32[4,8,144], index: 6, kind: input, shape index: {}]   ;;  %s6487_s7 = inlined_call_operand.vmem [shape: f32[4,8,1], index: 7, kind: input, shape index: {}]   ;;  %s6488_s8 = inlined_call_operand.vmem [shape: f32[2,16,256], index: 8, kind: output, shape index: {}]  }
   0x1 LB: > { %s3240_s28 = sadd.s32 4294967295, %s4902_s27   ;;  %p3244_p0 = scmp.ge.s32.totalorder %s4902_s27, 1  ;;  %s4902_s27 = sphi %s4963_s27, %s18_s27  }
   0x2   : > { %p262_p1 = scmp.lt.s32.totalorder %s4902_s27, 3 }
   0x4   : > { %p263_p2 = pnand %p3244_p0, %p262_p1 }
   0x5   : > { %v325_v0 = vlaneseq (!%p263_p2)  ;;  %v4904_v1 = vmov (!%p263_p2), 0.0   ;;  %v3249_v3 = vld [vmem:[%s6481_s1 + $0x1] ss:$2 sm:$0x3] (!%p263_p2)  ;;  %s4905_s11 = smov (!%p263_p2), 113   ;;  %s4906_s12 = smov (!%p263_p2), 127  }
   0x6   : > { %266 = sbr.rel (%p263_p2) target bundleno = 2292 (0x8f4), region = 52  ;;  %679 = vmatprep.mubr.f32.mxu0 (!%p263_p2), %v4904_v1  ;;  %v314_v4 = vld [vmem:[%s6481_s1] ss:$2 sm:$0x3] (!%p263_p2)  ;;  %p296_p3 = scmp.lt.s32.totalorder (!%p263_p2), %s3240_s28, 1  ;;  %vm370_vm0 = vcmask (!%p263_p2), 1039360  }
   0x7   : > { %v326_v2 = vshrl.u32 (!%p263_p2), %v325_v0, 7  ;;  %s4907_s13 = smov (!%p263_p2), 1   ;;  %s4908_s15 = smov (!%p263_p2), 15   ;;  %vm358_vm1 = vcmask (!%p263_p2), 924672   ;;  %vm383_vm2 = vcmask (!%p263_p2), 7168   ;;  %vm395_vm3 = vcmask (!%p263_p2), 121856  }
   0x8   : > { %s4909_s19 = smov (!%p263_p2), 17   ;;  %s4910_s20 = smov (!%p263_p2), 111   ;;  %vm407_vm4 = vcmask (!%p263_p2), 138240   ;;  %v4917_v53 = vmov (!%p263_p2), 0   ;;  %vm337_vm5 = vcmask (!%p263_p2), 908288   ;;  %vm447_vm6 = vcmask (!%p263_p2), 916480  }
   0x9   : > { %v327_v5 = vsub.s32 (!%p263_p2), 0, %v326_v2  ;;  %v331_v6 = vsub.s32 (!%p263_p2), 1, %v326_v2  ;;  %s4911_s21 = smov (!%p263_p2), 112   ;;  %s4912_s22 = smov (!%p263_p2), 126   ;;  %3597 = vset.pattern.permute.xlu0 (!%p263_p2), %v4917_v53  ;;  %3596 = vset.pattern.permute.xlu1 (!%p263_p2), %v4917_v53  ;;  %vm435_vm7 = vcmask (!%p263_p2), 1031168   ;;  %vm486_vm8 = vcmask (!%p263_p2), 777216  }
   0xa   : > { %s4913_s23 = smov (!%p263_p2), 95   ;;  %s4914_s24 = smov (!%p263_p2), 110   ;;  %vm464_vm9 = vcmask (!%p263_p2), 900096   ;;  %vm476_vm10 = vcmask (!%p263_p2), 785408   ;;  %vm498_vm11 = vcmask (!%p263_p2), 769024   ;;  %vm608_vm12 = vcmask (!%p263_p2), 588800  }
   0xb   : > { %v349_v7 = vrot.slane (!%p263_p2), %v3249_v3, %v327_v5  ;;  %v328_v8 = vrot.slane (!%p263_p2), %v314_v4, %v327_v5  ;;  %v353_v9 = vrot.slane (!%p263_p2), %v3249_v3, %v331_v6  ;;  %v332_v10 = vrot.slane (!%p263_p2), %v314_v4, %v331_v6  ;;  %s4915_s25 = smov (!%p263_p2), 96   ;;  %s4916_s26 = smov (!%p263_p2), 94  }
   0xc   : > { %vm1109_vm13 = vcmask (!%p263_p2), 130048  }
   0xd   : > { %354 = vrot.lane.b32.xlu0 %v349_v7, %s4905_s11  ;;  %366 = vrot.lane.b32.xlu1 %v328_v8, %s4906_s12  ;;  %s6490_s28 = smov (!%p296_p3, %s3240_s28), 1 }
   0xe   : > { %s3281_s14 = sshll.u32 %s6490_s28, 4  ;;  %s3282_s9 = sshll.u32 %s6490_s28, 5 }
   0xf   : > { %s300_s18 = scalar_lea.vmem %s6480_s0, %s3281_s14 }
  0x10   : > { %v4988_v11 = vld [vmem:[%s300_s18] sm:$0xff]  ;;  %v4990_v12 = vld [vmem:[%s300_s18 + $0x8] sm:$0xff] }
  0x11   : > { %356 = vrot.lane.b32.xlu0 %v353_v9, %s4905_s11  ;;  %368 = vrot.lane.b32.xlu1 %v332_v10, %s4906_s12  ;;  %v3501_v13 = vpack.i.bf16 %v4990_v12, %v4988_v11 }
  0x15   : > { %379 = vrot.lane.b32.xlu0 %v349_v7, %s4907_s13  ;;  %381 = vrot.lane.b32.xlu1 %v353_v9, %s4907_s13  ;;  %s305_s13 = scalar_lea.vmem %s6488_s8, %s3282_s9 }
  0x19   : > { %391 = vrot.lane.b32.xlu0 %v328_v8, %s4908_s15  ;;  %393 = vrot.lane.b32.xlu1 %v332_v10, %s4908_s15 }
  0x1d   : > { %403 = vrot.lane.b32.xlu0 %v349_v7, %s4909_s19  ;;  %405 = vrot.lane.b32.xlu1 %v353_v9, %s4909_s19 }
  0x21   : > { %333 = vrot.lane.b32.xlu0 %v328_v8, %s4910_s20  ;;  %335 = vrot.lane.b32.xlu1 %v332_v10, %s4910_s20 }
  0x25   : > { %3502 = vrot.lane.b32.xlu0 %v3501_v13, %s4906_s12  ;;  %418 = vrot.lane.b32.xlu1 %v4904_v1, %s4906_s12 }
  0x29   : > { %3507 = vrot.lane.b32.xlu0 %v3501_v13, %s4910_s20 }
  0x7f   : > { %v355_v14 = vpop.permute.xlu0 %354  ;;  %v367_v15 = vpop.permute.xlu1 %366 }
  0x80   : > { %v5000_v16 = vmul.f32 0.0, %v355_v14  ;;  %v5002_v17 = vmul.f32 0.0, %v367_v15 }
  0x82   : > { %441 = vrot.lane.b32.xlu1 %v5002_v17, %s4911_s21  ;;  %429 = vrot.lane.b32.xlu0 %v5000_v16, %s4912_s22 }
  0x83   : > { %v5008_v18 = vpop.permute.xlu0 %356  ;;  %v5010_v19 = vpop.permute.xlu1 %368 }
  0x84   : > { %v5014_v20 = vsel %vm370_vm0, %v367_v15, %v5010_v19  ;;  %v377_v21 = vmul.f32 %v5010_v19, %v4990_v12  ;;  %v5021_v23 = vsel %vm358_vm1, %v355_v14, %v5008_v18  ;;  %v365_v27 = vmul.f32 %v5008_v18, %v4990_v12 }
  0x85   : > { %v376_v22 = vmul.f32 %v5014_v20, %v4988_v11  ;;  %v364_v31 = vmul.f32 %v5021_v23, %v4988_v11 }
  0x86   : > { %3517 = vrot.lane.b32.xlu1 %v3501_v13, %s4913_s23 }
  0x87   : > { %v5024_v24 = vpop.permute.xlu0 %379  ;;  %v382_v25 = vpop.permute.xlu1 %381  ;;  %v3521_v26 = vpack.i.bf16 %v377_v21, %v376_v22  ;;  %v3511_v37 = vpack.i.bf16 %v365_v27, %v364_v31 }
  0x88   : > { %v5029_v28 = vsel %vm383_vm2, %v5024_v24, %v382_v25  ;;  %v5031_v29 = vmul.f32 0.0, %v382_v25  ;;  %v388_v30 = vmul.f32 %v5024_v24, %v4988_v11 }
  0x89   : > { %v389_v32 = vmul.f32 %v5029_v28, %v4990_v12 }
  0x8a   : > { %462 = vrot.lane.b32.xlu0 %v5031_v29, %s4914_s24  ;;  %3522 = vrot.lane.b32.xlu1 %v3521_v26, %s4911_s21 }
  0x8b   : > { %v5042_v33 = vpop.permute.xlu0 %391  ;;  %v394_v34 = vpop.permute.xlu1 %393  ;;  %v3526_v35 = vpack.i.bf16 %v389_v32, %v388_v30 }
  0x8c   : > { %v5045_v36 = vsel %vm395_vm3, %v5042_v33, %v394_v34  ;;  %v400_v38 = vmul.f32 %v5042_v33, %v4988_v11  ;;  %v5051_v40 = vmul.f32 0.0, %v394_v34 }
  0x8d   : > { %v401_v39 = vmul.f32 %v5045_v36, %v4990_v12 }
  0x8e   : > { %3527 = vrot.lane.b32.xlu1 %v3526_v35, %s4914_s24  ;;  %3512 = vrot.lane.b32.xlu0 %v3511_v37, %s4912_s22 }
  0x8f   : > { %v3531_v41 = vpack.i.bf16 %v401_v39, %v400_v38  ;;  %v5055_v42 = vpop.permute.xlu0 %403  ;;  %v406_v43 = vpop.permute.xlu1 %405 }
  0x90   : > { %v412_v44 = vmul.f32 %v5055_v42, %v4988_v11  ;;  %v5064_v45 = vsel %vm407_vm4, %v5055_v42, %v406_v43  ;;  %v5070_v48 = vmul.f32 0.0, %v406_v43 }
  0x91   : > { %v413_v49 = vmul.f32 %v5064_v45, %v4990_v12 }
  0x92   : > { %3532 = vrot.lane.b32.xlu1 %v3531_v41, %s4915_s25  ;;  %474 = vrot.lane.b32.xlu0 %v5051_v40, %s4915_s25 }
  0x93   : > { %v334_v46 = vpop.permute.xlu0 %333  ;;  %v5066_v47 = vpop.permute.xlu1 %335 }
  0x94   : > { %v5075_v50 = vmul.f32 0.0, %v334_v46  ;;  %v5085_v61 = vsel %vm337_vm5, %v334_v46, %v5066_v47  ;;  %v344_v3 = vmul.f32 %v5066_v47, %v4990_v12 }
  0x95   : > { %v343_v2 = vmul.f32 %v5085_v61, %v4988_v11 }
  0x96   : > { %484 = vrot.lane.b32.xlu0 %v4904_v1, %s4913_s23  ;;  %492 = vrot.lane.b32.xlu1 %v412_v44, %s4916_s26 }
  0x97   : > { %v3503_v51 = vpop.permute.xlu0 %3502  ;;  %v419_v52 = vpop.permute.xlu1 %418  ;;  %v3551_v5 = vpack.i.bf16 %v344_v3, %v343_v2 }
  0x98   : > { %v3505_v54 = vunpack.i.h.bf16 %v3503_v51  ;;  %v3504_v55 = vunpack.i.l.bf16 %v3503_v51 }
  0x9a   : > { %494 = vrot.lane.b32.xlu0 %v413_v49, %s4916_s26  ;;  %496 = vrot.lane.b32.xlu1 %v5070_v48, %s4916_s26  ;;  %v424_v56 = vsel %vm370_vm0, %v419_v52, %v3504_v55  ;;  %v425_v57 = vsel %vm370_vm0, %v3504_v55, %v3505_v54 }
  0x9b   : > { %v3541_v58 = vpack.i.bf16 %v424_v56, %v5075_v50  ;;  %v3508_v59 = vpop.permute.xlu0 %3507  ;;  %v3536_v60 = vpack.i.bf16 %v3505_v54, %v425_v57 }
  0x9c   : > { %v3510_v62 = vunpack.i.h.bf16 %v3508_v59  ;;  %v3509_v63 = vunpack.i.l.bf16 %v3508_v59 }
  0x9e   : > { %3542 = vrot.lane.b32.xlu0 %v3541_v58, %s4909_s19  ;;  %v454_v0 = vsel %vm337_vm5, %v3509_v63, %v3510_v62  ;;  %3537 = vrot.lane.b32.xlu1 %v3536_v60, %s4909_s19 }
  0x9f   : > { %v3546_v4 = vpack.i.bf16 %v3510_v62, %v454_v0 }
  0xa2   : > { %3547 = vrot.lane.b32.xlu0 %v3546_v4, %s4909_s19 }
  0xa6   : > { %3552 = vrot.lane.b32.xlu0 %v3551_v5, %s4909_s19 }
  0xf4   : > { %v442_v6 = vpop.permute.xlu1 %441  ;;  %v430_v7 = vpop.permute.xlu0 %429 }
  0xf8   : > { %v3518_v8 = vpop.permute.xlu1 %3517 }
  0xf9   : > { %v3520_v31 = vunpack.i.h.bf16 %v3518_v8  ;;  %v3519_v32 = vunpack.i.l.bf16 %v3518_v8 }
  0xfb   : > { %v487_v43 = vsel %vm486_vm8, %v3519_v32, %v3520_v31 }
  0xfc   : > { %v463_v9 = vpop.permute.xlu0 %462  ;;  %v3523_v10 = vpop.permute.xlu1 %3522 }
  0xfd   : > { %v3525_v13 = vunpack.i.h.bf16 %v3523_v10  ;;  %v3524_v14 = vunpack.i.l.bf16 %v3523_v10 }
  0xff   : > { %v449_v15 = vsel %vm447_vm6, %v3524_v14, %v3525_v13  ;;  %v448_v41 = vsel %vm447_vm6, %v442_v6, %v3524_v14  ;;  %v504_v6 = vld [vmem:[%s6484_s4 + $0x8] sm:$0xff] }
 0x100   : > { %v3528_v11 = vpop.permute.xlu1 %3527  ;;  %v3513_v21 = vpop.permute.xlu0 %3512  ;;  %v3561_v22 = vpack.i.bf16 %v3525_v13, %v449_v15 }
 0x101   : > { %v3529_v12 = vunpack.i.l.bf16 %v3528_v11  ;;  %v3515_v25 = vunpack.i.h.bf16 %v3513_v21  ;;  %v3514_v26 = vunpack.i.l.bf16 %v3513_v21  ;;  %v3530_v37 = vunpack.i.h.bf16 %v3528_v11 }
 0x102   : > { %3562 = vrot.lane.b32.xlu0 %v3561_v22, %s4909_s19 }
 0x103   : > { %v437_v27 = vsel %vm435_vm7, %v3514_v26, %v3515_v25  ;;  %v3566_v30 = vpack.i.bf16 %v3529_v12, %v3509_v63  ;;  %v436_v38 = vsel %vm435_vm7, %v430_v7, %v3514_v26  ;;  %v465_v52 = vsel %vm464_vm9, %v3529_v12, %v3530_v37  ;;  %v503_v12 = vld [vmem:[%s6484_s4] sm:$0xff] }
 0x104   : > { %v475_v34 = vpop.permute.xlu0 %474  ;;  %v3556_v35 = vpack.i.bf16 %v3515_v25, %v437_v27  ;;  %v3533_v39 = vpop.permute.xlu1 %3532  ;;  %v3576_v46 = vpack.i.bf16 %v448_v41, %v436_v38  ;;  %v466_v53 = vsel %vm464_vm9, %v3530_v37, %v463_v9 }
 0x105   : > { %v3535_v49 = vunpack.i.h.bf16 %v3533_v39  ;;  %v3534_v56 = vunpack.i.l.bf16 %v3533_v39  ;;  %v3581_v58 = vpack.i.bf16 %v466_v53, %v465_v52 }
 0x106   : > { %3557 = vrot.lane.b32.xlu1 %v3556_v35, %s4909_s19  ;;  %3567 = vrot.lane.b32.xlu0 %v3566_v30, %s4909_s19 }
 0x107   : > { %v477_v59 = vsel %vm476_vm10, %v3534_v56, %v3535_v49  ;;  %v478_v60 = vsel %vm476_vm10, %v3535_v49, %v475_v34  ;;  %v3591_v4 = vpack.i.bf16 %v3519_v32, %v3534_v56  ;;  %v5139_v32 = vpack.i.bf16 %v5000_v16, %v5000_v16 }
 0x108   : > { %v485_v44 = vpop.permute.xlu0 %484  ;;  %v493_v55 = vpop.permute.xlu1 %492  ;;  %v3586_v0 = vpack.i.bf16 %v478_v60, %v477_v59 }
 0x109   : > { %v488_v51 = vsel %vm486_vm8, %v3520_v31, %v485_v44  ;;  %v5133_v31 = vpack.i.bf16 %v5002_v17, %v5002_v17 }
 0x10a   : > { %v3571_v54 = vpack.i.bf16 %v488_v51, %v487_v43  ;;  %3577 = vrot.lane.b32.xlu1 %v3576_v46, %s4909_s19 }
 0x10c   : > { %3572 = vrot.lane.b32.xlu0 %v3571_v54, %s4909_s19  ;;  %v495_v57 = vpop.permute.xlu0 %494  ;;  %v497_v63 = vpop.permute.xlu1 %496 }
 0x10d   : > { %v499_v62 = vsel %vm498_vm11, %v493_v55, %v495_v57  ;;  %v500_v10 = vsel %vm498_vm11, %v495_v57, %v497_v63 }
 0x10e   : > { %3582 = vrot.lane.b32.xlu1 %v3581_v58, %s4909_s19 }
 0x110   : > { %568 = vrot.lane.b32.xlu0 %v499_v62, %s4909_s19  ;;  %v3543_v2 = vpop.permute.xlu0 %3542  ;;  %v3538_v3 = vpop.permute.xlu1 %3537 }
 0x111   : > { %v3545_v7 = vunpack.i.h.bf16 %v3543_v2  ;;  %v3540_v8 = vunpack.i.h.bf16 %v3538_v3  ;;  %v3539_v9 = vunpack.i.l.bf16 %v3538_v3  ;;  %v3544_v13 = vunpack.i.l.bf16 %v3543_v2 }
 0x112   : > { %3587 = vrot.lane.b32.xlu1 %v3586_v0, %s4909_s19 }
 0x113   : > { %v575_v21 = vsel %vm407_vm4, %v3539_v9, %v3540_v8  ;;  %v574_v22 = vsel %vm407_vm4, %v3545_v7, %v3539_v9 }
 0x114   : > { %566 = vrot.lane.b32.xlu0 %v493_v55, %s4909_s19  ;;  %v3548_v5 = vpop.permute.xlu0 %3547 }
 0x115   : > { %v3550_v54 = vunpack.i.h.bf16 %v3548_v5  ;;  %v3549_v55 = vunpack.i.l.bf16 %v3548_v5 }
 0x116   : > { %3592 = vrot.lane.b32.xlu1 %v3591_v4, %s4909_s19 }
 0x117   : > { %v581_v3 = vsel %vm407_vm4, %v3549_v55, %v3550_v54 }
 0x118   : > { %512 = vperm.xlu0 %3597, %v504_v6   ;;  %v3553_v14 = vpop.permute.xlu0 %3552 }
 0x119   : > { %v3555_v15 = vunpack.i.h.bf16 %v3553_v14  ;;  %v3554_v11 = vunpack.i.l.bf16 %v3553_v14 }
 0x11a   : > { %570 = vrot.lane.b32.xlu1 %v500_v10, %s4909_s19 }
 0x11b   : > { %v573_v25 = vsel %vm407_vm4, %v3554_v11, %v3555_v15  ;;  %v572_v26 = vsel %vm407_vm4, %v3544_v13, %v3554_v11 }
 0x11c   : > { %3599 = vrot.lane.b32.xlu0 %v4904_v1, %s4906_s12  ;;  %v3283_v27 = vpack.c.bf16 %v575_v21, %v573_v25  ;;  %v3285_v30 = vpack.c.bf16 %v574_v22, %v572_v26 }
 0x11e   : > { %507 = vperm.xlu1 %3596, %v503_v12   ;;  %3284 = vmatprep.subr.bf16.mxu0 %v3283_v27 }
 0x11f   : > { %3286 = vmatpush1.bf16.msra.mxu0 %v3285_v30 }
 0x120   : > { %3609 = vrot.lane.b32.xlu0 %v5133_v31, %s4911_s21 }
 0x122   : > { %3604 = vrot.lane.b32.xlu1 %v5139_v32, %s4912_s22 }
 0x124   : > { %3619 = vrot.lane.b32.xlu0 %v5139_v32, %s4912_s22 }
 0x126   : > { %3614 = vrot.lane.b32.xlu1 %v4904_v1, %s4906_s12 }
 0x12a   : > { %3624 = vrot.lane.b32.xlu1 %v5133_v31, %s4911_s21 }
 0x174   : > { %v3563_v34 = vpop.permute.xlu0 %3562 }
 0x175   : > { %v3565_v35 = vunpack.i.h.bf16 %v3563_v34  ;;  %v3564_v37 = vunpack.i.l.bf16 %v3563_v34 }
 0x177   : > { %v579_v46 = vsel %vm407_vm4, %v3564_v37, %v3565_v35 }
 0x178   : > { %v3558_v38 = vpop.permute.xlu1 %3557  ;;  %v3568_v43 = vpop.permute.xlu0 %3567 }
 0x179   : > { %v3560_v39 = vunpack.i.h.bf16 %v3558_v38  ;;  %v3559_v41 = vunpack.i.l.bf16 %v3558_v38  ;;  %v3569_v56 = vunpack.i.l.bf16 %v3568_v43  ;;  %v3570_v63 = vunpack.i.h.bf16 %v3568_v43 }
 0x17b   : > { %v577_v44 = vsel %vm407_vm4, %v3559_v41, %v3560_v39  ;;  %v580_v4 = vsel %vm407_vm4, %v3569_v56, %v3549_v55 }
 0x17c   : > { %v3578_v49 = vpop.permute.xlu1 %3577  ;;  %v3287_v51 = vpack.c.bf16 %v579_v46, %v577_v44  ;;  %v502_v44 = vld [vmem:[%s6482_s2 + $0x8] sm:$0xff] }
 0x17d   : > { %v3580_v52 = vunpack.i.h.bf16 %v3578_v49  ;;  %v3579_v53 = vunpack.i.l.bf16 %v3578_v49 }
 0x17e   : > { %3288 = vmatprep.subr.bf16.mxu0 %v3287_v51  ;;  %v3573_v59 = vpop.permute.xlu0 %3572 }
 0x17f   : > { %v576_v57 = vsel %vm407_vm4, %v3579_v53, %v3559_v41  ;;  %v578_v58 = vsel %vm407_vm4, %v3580_v52, %v3564_v37  ;;  %v3575_v6 = vunpack.i.h.bf16 %v3573_v59  ;;  %v3574_v7 = vunpack.i.l.bf16 %v3573_v59  ;;  %v501_v41 = vld [vmem:[%s6482_s2] sm:$0xff] }
 0x180   : > { %v3583_v60 = vpop.permute.xlu1 %3582  ;;  %v3289_v62 = vpack.c.bf16 %v578_v58, %v576_v57 }
 0x181   : > { %v3585_v0 = vunpack.i.h.bf16 %v3583_v60  ;;  %v3584_v2 = vunpack.i.l.bf16 %v3583_v60  ;;  %v587_v21 = vsel %vm407_vm4, %v3574_v7, %v3575_v6 }
 0x182   : > { %3290 = vmatpush1.bf16.msra.mxu0 %v3289_v62  ;;  %v569_v22 = vpop.permute.xlu0 %568 }
 0x183   : > { %v583_v5 = vsel %vm407_vm4, %v3584_v2, %v3585_v0  ;;  %v582_v8 = vsel %vm407_vm4, %v3570_v63, %v3584_v2 }
 0x184   : > { %v3588_v9 = vpop.permute.xlu1 %3587  ;;  %v3291_v10 = vpack.c.bf16 %v583_v5, %v581_v3  ;;  %v3293_v13 = vpack.c.bf16 %v582_v8, %v580_v4 }
 0x185   : > { %v3590_v14 = vunpack.i.h.bf16 %v3588_v9  ;;  %v3589_v15 = vunpack.i.l.bf16 %v3588_v9 }
 0x186   : > { %3292 = vmatprep.subr.bf16.mxu0 %v3291_v10  ;;  %v567_v39 = vpop.permute.xlu0 %566 }
 0x187   : > { %3294 = vmatpush1.bf16.msra.mxu0 %v3293_v13  ;;  %v585_v11 = vsel %vm407_vm4, %v3589_v15, %v3590_v14  ;;  %v588_v43 = vsel %vm407_vm4, %v567_v39, %v569_v22 }
 0x188   : > { %v3593_v12 = vpop.permute.xlu1 %3592  ;;  %v3295_v25 = vpack.c.bf16 %v587_v21, %v585_v11 }
 0x189   : > { %v3595_v26 = vunpack.i.h.bf16 %v3593_v12  ;;  %v3594_v27 = vunpack.i.l.bf16 %v3593_v12 }
 0x18a   : > { %3296 = vmatprep.subr.bf16.mxu0 %v3295_v25 }
 0x18b   : > { %v584_v30 = vsel %vm407_vm4, %v3594_v27, %v3589_v15  ;;  %v586_v34 = vsel %vm407_vm4, %v3595_v26, %v3574_v7 }
 0x18c   : > { %v571_v35 = vpop.permute.xlu1 %570  ;;  %v3297_v37 = vpack.c.bf16 %v586_v34, %v584_v30 }
 0x18d   : > { %v589_v38 = vsel %vm407_vm4, %v569_v22, %v571_v35 }
 0x18e   : > { %3298 = vmatpush1.bf16.msra.mxu0 %v3297_v37 }
 0x18f   : > { %631 = vmatprep.subr.mxu0 %v589_v38 }
 0x192   : > { %632 = vmatpush1.msra.mxu0 %v588_v43 }
 0x193   : > { %3250 = vmatmul.mubr.msk.f32.vlgmr.msra.gmra.mrb[0].mxu0 %vm608_vm12, %v501_v41 }
 0x194   : > { %685 = vmatprep.mubr.f32.mxu0 %v4904_v1 }
 0x197   : > { %3251 = vmatmul.mubr.msk.f32.gmra.mrb[2].mxu0 %vm608_vm12, %v502_v44  ;;  %v513_v58 = vpop.permute.xlu0 %512 }
 0x19d   : > { %v508_v46 = vpop.permute.xlu1 %507 }
 0x266   : > { %v681_v49 = vpop.f32.mrb[0].mxu0 }
 0x267   : > { %v5170_v51 = vadd.f32 %v681_v49, %v508_v46  ;;  %v683_v52 = vpop.f32.mrb[1].mxu0 }
 0x268   : > { %v5172_v53 = vadd.f32 %v683_v52, %v508_v46 }
 0x269   : > { %v705_v54 = vmul.f32 %v5170_v51, %v5014_v20  ;;  %v708_v55 = vmul.f32 %v5170_v51, %v5024_v24  ;;  %v702_v56 = vmul.f32 %v5170_v51, %v5021_v23  ;;  %v711_v57 = vmul.f32 %v5170_v51, %v5042_v33 }
 0x26a   : > { %v687_v59 = vpop.f32.mrb[2].mxu0  ;;  %v3638_v60 = vpack.i.bf16 %v5172_v53, %v5170_v51  ;;  %v706_v62 = vmul.f32 %v5172_v53, %v5010_v19  ;;  %v709_v2 = vmul.f32 %v5172_v53, %v5029_v28  ;;  %v703_v3 = vmul.f32 %v5172_v53, %v5008_v18 }
 0x26b   : > { %v5186_v63 = vadd.f32 %v687_v59, %v513_v58  ;;  %v689_v0 = vpop.f32.mrb[3].mxu0  ;;  %v712_v4 = vmul.f32 %v5172_v53, %v5045_v36  ;;  %v714_v5 = vmul.f32 %v5170_v51, %v5055_v42  ;;  %v3252_v8 = vmul.f32 -1.442695, %v5170_v51 }
 0x26c   : > { %v5194_v6 = vadd.f32 %v689_v0, %v513_v58  ;;  %3639 = vrot.lane.b32.xlu0 %v3638_v60, %s4913_s23  ;;  %3629 = vrot.lane.b32.xlu1 %v3638_v60, %s4906_s12  ;;  %v3648_v7 = vpack.i.bf16 %v706_v62, %v705_v54  ;;  %v3653_v9 = vpack.i.bf16 %v709_v2, %v708_v55  ;;  %v3253_v41 = vmul.f32 -1.442695, %v5172_v53 }
 0x26d   : > { %v3643_v10 = vpack.i.bf16 %v703_v3, %v702_v56  ;;  %v3658_v13 = vpack.i.bf16 %v712_v4, %v711_v57  ;;  %v715_v14 = vmul.f32 %v5172_v53, %v5064_v45  ;;  %v699_v11 = vmul.f32 %v5170_v51, %v5085_v61 }
 0x26e   : > { %v3678_v15 = vpack.i.bf16 %v5194_v6, %v5186_v63  ;;  %v700_v21 = vmul.f32 %v5172_v53, %v5066_v47  ;;  %v1196_v12 = vmul.f32 %v5186_v63, %v5014_v20  ;;  %v1197_v25 = vmul.f32 %v5194_v6, %v5010_v19 }
 0x26f   : > { %v3663_v22 = vpack.i.bf16 %v715_v14, %v714_v5  ;;  %4848 = vpow2.f32 %v3252_v8  ;;  %v5217_v30 = vmul.f32 %v5186_v63, %v5021_v23  ;;  %v5221_v34 = vmul.f32 %v5194_v6, %v5008_v18 }
 0x270   : > { %3634 = vrot.lane.b32.xlu1 %v3638_v60, %s4910_s20  ;;  %3649 = vrot.lane.b32.xlu0 %v3648_v7, %s4911_s21  ;;  %v3668_v26 = vpack.i.bf16 %v700_v21, %v699_v11  ;;  %v3713_v27 = vpack.i.bf16 %v1197_v25, %v1196_v12  ;;  %v5225_v35 = vmul.f32 %v5186_v63, %v5085_v61  ;;  %v3255_v43 = vmul.f32 -1.442695, %v5186_v63 }
 0x271   : > { %v3673_v37 = vpack.i.bf16 %v5186_v63, %v4904_v1  ;;  %v3708_v38 = vpack.i.bf16 %v5221_v34, %v5217_v30  ;;  %v5235_v39 = vmul.f32 %v5194_v6, %v5066_v47  ;;  %v3256_v44 = vmul.f32 -1.442695, %v5194_v6 }
 0x272   : > { %4850 = vpow2.f32 %v3253_v41  ;;  %v3688_v54 = vpack.i.bf16 %v4904_v1, %v5194_v6  ;;  %v1199_v55 = vmul.f32 %v5186_v63, %v5024_v24  ;;  %v1202_v62 = vmul.f32 %v5186_v63, %v5042_v33 }
 0x273   : > { %v3733_v46 = vpack.i.bf16 %v5235_v39, %v5225_v35  ;;  %4852 = vpow2.f32 %v3255_v43  ;;  %v1205_v4 = vmul.f32 %v5186_v63, %v5055_v42  ;;  %v1203_v7 = vmul.f32 %v5194_v6, %v5045_v36 }
 0x274   : > { %3654 = vrot.lane.b32.xlu0 %v3653_v9, %s4914_s24  ;;  %3644 = vrot.lane.b32.xlu1 %v3643_v10, %s4912_s22  ;;  %4854 = vpow2.f32 %v3256_v44  ;;  %v3693_v60 = vpack.i.bf16 %v1199_v55, %v5031_v29  ;;  %v3698_v3 = vpack.i.bf16 %v1202_v62, %v5051_v40  ;;  %v1206_v8 = vmul.f32 %v5194_v6, %v5064_v45 }
 0x275   : > { %v3703_v9 = vpack.i.bf16 %v1205_v4, %v5070_v48  ;;  %v3723_v10 = vpack.i.bf16 %v5051_v40, %v1203_v7 }
 0x276   : > { %v3728_v11 = vpack.i.bf16 %v5070_v48, %v1206_v8 }
 0x278   : > { %3659 = vrot.lane.b32.xlu0 %v3658_v13, %s4915_s25  ;;  %3674 = vrot.lane.b32.xlu1 %v3673_v37, %s4913_s23  ;;  %v1200_v13 = vmul.f32 %v5194_v6, %v5029_v28 }
 0x279   : > { %v4849_v49 = vpop.eup %4848 }
 0x27a   : > { %v803_v52 = vadd.f32 1.0, %v4849_v49 }
 0x27c   : > { %3664 = vrot.lane.b32.xlu0 %v3663_v22, %s4916_s26  ;;  %3679 = vrot.lane.b32.xlu1 %v3678_v15, %s4906_s12  ;;  %4856 = vrcp.f32 %v803_v52  ;;  %v4851_v56 = vpop.eup %4850  ;;  %v3718_v22 = vpack.i.bf16 %v5031_v29, %v1200_v13 }
 0x27d   : > { %v4853_v57 = vpop.eup %4852  ;;  %v804_v58 = vadd.f32 1.0, %v4851_v56 }
 0x27e   : > { %v4855_v59 = vpop.eup %4854  ;;  %v1294_v0 = vadd.f32 1.0, %v4853_v57 }
 0x27f   : > { %4858 = vrcp.f32 %v804_v58  ;;  %v1295_v2 = vadd.f32 1.0, %v4855_v59 }
 0x280   : > { %3689 = vrot.lane.b32.xlu1 %v3688_v54, %s4913_s23  ;;  %3669 = vrot.lane.b32.xlu0 %v3668_v26, %s4909_s19  ;;  %4860 = vrcp.f32 %v1294_v0 }
 0x281   : > { %4862 = vrcp.f32 %v1295_v2 }
 0x284   : > { %3694 = vrot.lane.b32.xlu1 %v3693_v60, %s4914_s24  ;;  %3684 = vrot.lane.b32.xlu0 %v3678_v15, %s4910_s20 }
 0x286   : > { %v4857_v5 = vpop.eup %4856 }
 0x287   : > { %v809_v14 = vmul.f32 %v4857_v5, %v5170_v51 }
 0x288   : > { %3699 = vrot.lane.b32.xlu1 %v3698_v3, %s4915_s25  ;;  %3714 = vrot.lane.b32.xlu0 %v3713_v27, %s4911_s21 }
 0x289   : > { %v4859_v15 = vpop.eup %4858  ;;  %v823_v25 = vmul.f32 %v809_v14, %v5014_v20  ;;  %v817_v26 = vmul.f32 %v809_v14, %v5085_v61  ;;  %v820_v30 = vmul.f32 %v809_v14, %v5021_v23  ;;  %v826_v34 = vmul.f32 %v809_v14, %v5024_v24 }
 0x28a   : > { %v4861_v21 = vpop.eup %4860  ;;  %v810_v12 = vmul.f32 %v4859_v15, %v5172_v53  ;;  %v829_v37 = vmul.f32 %v809_v14, %v5042_v33  ;;  %v832_v49 = vmul.f32 %v809_v14, %v5055_v42 }
 0x28b   : > { %v4863_v27 = vpop.eup %4862  ;;  %v1300_v51 = vmul.f32 %v4861_v21, %v5186_v63 }
 0x28c   : > { %3704 = vrot.lane.b32.xlu1 %v3703_v9, %s4916_s26  ;;  %3724 = vrot.lane.b32.xlu0 %v3723_v10, %s4915_s25  ;;  %v3738_v41 = vpack.i.bf16 %v810_v12, %v809_v14  ;;  %v824_v53 = vmul.f32 %v810_v12, %v5010_v19  ;;  %v818_v43 = vmul.f32 %v810_v12, %v5066_v47 }
 0x28d   : > { %v821_v44 = vmul.f32 %v810_v12, %v5008_v18  ;;  %v827_v63 = vmul.f32 %v810_v12, %v5029_v28  ;;  %v1301_v54 = vmul.f32 %v4863_v27, %v5194_v6  ;;  %v830_v55 = vmul.f32 %v810_v12, %v5045_v36 }
 0x28e   : > { %v3758_v52 = vpack.i.bf16 %v824_v53, %v823_v25  ;;  %v3778_v56 = vpack.i.bf16 %v818_v43, %v817_v26  ;;  %v833_v57 = vmul.f32 %v810_v12, %v5064_v45  ;;  %v1314_v0 = vmul.f32 %v1300_v51, %v5014_v20 }
 0x28f   : > { %v3763_v58 = vpack.i.bf16 %v827_v63, %v826_v34  ;;  %v3788_v59 = vpack.i.bf16 %v1301_v54, %v1300_v51  ;;  %v3768_v60 = vpack.i.bf16 %v830_v55, %v829_v37  ;;  %v1315_v6 = vmul.f32 %v1301_v54, %v5010_v19 }
 0x290   : > { %3709 = vrot.lane.b32.xlu1 %v3708_v38, %s4912_s22  ;;  %3729 = vrot.lane.b32.xlu0 %v3728_v11, %s4916_s26  ;;  %v3753_v38 = vpack.i.bf16 %v821_v44, %v820_v30  ;;  %v3773_v62 = vpack.i.bf16 %v833_v57, %v832_v49  ;;  %v1311_v2 = vmul.f32 %v1300_v51, %v5021_v23  ;;  %v5339_v30 = vpop.permute.xlu0 %3599 }
 0x291   : > { %v1312_v3 = vmul.f32 %v1301_v54, %v5008_v18  ;;  %v3823_v4 = vpack.i.bf16 %v1315_v6, %v1314_v0  ;;  %v1308_v35 = vmul.f32 %v1300_v51, %v5085_v61  ;;  %v1309_v39 = vmul.f32 %v1301_v54, %v5066_v47 }
 0x292   : > { %v3783_v5 = vpack.i.bf16 %v1300_v51, %v4904_v1  ;;  %v1317_v8 = vmul.f32 %v1300_v51, %v5024_v24  ;;  %v1320_v10 = vmul.f32 %v1300_v51, %v5042_v33  ;;  %v1323_v14 = vmul.f32 %v1300_v51, %v5055_v42  ;;  %v5341_v51 = vpop.permute.xlu1 %3604 }
 0x293   : > { %v3818_v7 = vpack.i.bf16 %v1312_v3, %v1311_v2  ;;  %v3798_v11 = vpack.i.bf16 %v4904_v1, %v1301_v54  ;;  %v1321_v21 = vmul.f32 %v1301_v54, %v5045_v36  ;;  %v1324_v26 = vmul.f32 %v1301_v54, %v5064_v45 }
 0x294   : > { %3719 = vrot.lane.b32.xlu1 %v3718_v22, %s4914_s24  ;;  %3734 = vrot.lane.b32.xlu0 %v3733_v46, %s4909_s19  ;;  %v3843_v46 = vpack.i.bf16 %v1309_v39, %v1308_v35  ;;  %v3803_v9 = vpack.i.bf16 %v1317_v8, %v5031_v29  ;;  %v3808_v13 = vpack.i.bf16 %v1320_v10, %v5051_v40  ;;  %v5343_v34 = vpop.permute.xlu0 %3609  ;;  %v3601_v49 = vunpack.i.l.bf16 %v5339_v30 }
 0x295   : > { %v3813_v15 = vpack.i.bf16 %v1323_v14, %v5070_v48  ;;  %v1318_v22 = vmul.f32 %v1301_v54, %v5029_v28  ;;  %v3833_v12 = vpack.i.bf16 %v5051_v40, %v1321_v21  ;;  %v3838_v27 = vpack.i.bf16 %v5070_v48, %v1324_v26 }
 0x296   : > { %v5345_v37 = vpop.permute.xlu1 %3614 }
 0x297   : > { %v3828_v25 = vpack.i.bf16 %v5031_v29, %v1318_v22 }
 0x298   : > { %3739 = vrot.lane.b32.xlu1 %v3738_v41, %s4906_s12  ;;  %3744 = vrot.lane.b32.xlu0 %v3738_v41, %s4910_s20 }
 0x29a   : > { %v5349_v53 = vpop.permute.xlu1 %3624 }
 0x29c   : > { %3759 = vrot.lane.b32.xlu1 %v3758_v52, %s4911_s21  ;;  %3749 = vrot.lane.b32.xlu0 %v3738_v41, %s4913_s23  ;;  %v5347_v41 = vpop.permute.xlu0 %3619 }
 0x2a0   : > { %3779 = vrot.lane.b32.xlu1 %v3778_v56, %s4909_s19  ;;  %3754 = vrot.lane.b32.xlu0 %v3753_v38, %s4912_s22 }
 0x2a4   : > { %3784 = vrot.lane.b32.xlu1 %v3783_v5, %s4913_s23  ;;  %3764 = vrot.lane.b32.xlu0 %v3763_v58, %s4914_s24 }
 0x2a8   : > { %3789 = vrot.lane.b32.xlu1 %v3788_v59, %s4906_s12  ;;  %3769 = vrot.lane.b32.xlu0 %v3768_v60, %s4915_s25 }
 0x2ac   : > { %3804 = vrot.lane.b32.xlu1 %v3803_v9, %s4914_s24  ;;  %3774 = vrot.lane.b32.xlu0 %v3773_v62, %s4916_s26 }
 0x2b0   : > { %3809 = vrot.lane.b32.xlu1 %v3808_v13, %s4915_s25  ;;  %3794 = vrot.lane.b32.xlu0 %v3788_v59, %s4910_s20 }
 0x2b4   : > { %3814 = vrot.lane.b32.xlu1 %v3813_v15, %s4916_s26  ;;  %3799 = vrot.lane.b32.xlu0 %v3798_v11, %s4913_s23 }
 0x2b8   : > { %3824 = vrot.lane.b32.xlu1 %v3823_v4, %s4911_s21  ;;  %3819 = vrot.lane.b32.xlu0 %v3818_v7, %s4912_s22 }
 0x2bc   : > { %3834 = vrot.lane.b32.xlu1 %v3833_v12, %s4915_s25  ;;  %3829 = vrot.lane.b32.xlu0 %v3828_v25, %s4914_s24 }
 0x2c0   : > { %3839 = vrot.lane.b32.xlu1 %v3838_v27, %s4916_s26  ;;  %v3606_v27 = vunpack.i.l.bf16 %v5341_v51 }
 0x2c4   : > { %3844 = vrot.lane.b32.xlu1 %v3843_v46, %s4909_s19 }
 0x2de   : > { %v3640_v43 = vpop.permute.xlu0 %3639  ;;  %v3630_v44 = vpop.permute.xlu1 %3629 }
 0x2df   : > { %v3632_v52 = vunpack.i.h.bf16 %v3630_v44  ;;  %v3631_v63 = vunpack.i.l.bf16 %v3630_v44  ;;  %v3642_v4 = vunpack.i.h.bf16 %v3640_v43  ;;  %v3641_v7 = vunpack.i.l.bf16 %v3640_v43 }
 0x2e1   : > { %v727_v54 = vsel %vm370_vm0, %v3631_v63, %v3632_v52  ;;  %v726_v55 = vsel %vm370_vm0, %v3601_v49, %v3631_v63  ;;  %v784_v13 = vsel %vm486_vm8, %v3641_v7, %v3642_v4  ;;  %v3611_v63 = vunpack.i.l.bf16 %v5343_v34 }
 0x2e2   : > { %v3635_v56 = vpop.permute.xlu1 %3634  ;;  %v3650_v38 = vpop.permute.xlu0 %3649  ;;  %v3853_v57 = vpack.i.bf16 %v3632_v52, %v727_v54  ;;  %v3848_v58 = vpack.i.bf16 %v726_v55, %v5075_v50 }
 0x2e3   : > { %v3637_v59 = vunpack.i.h.bf16 %v3635_v56  ;;  %v3636_v60 = vunpack.i.l.bf16 %v3635_v56  ;;  %v3652_v5 = vunpack.i.h.bf16 %v3650_v38  ;;  %v3651_v8 = vunpack.i.l.bf16 %v3650_v38 }
 0x2e4   : > { %3854 = vrot.lane.b32.xlu1 %v3853_v57, %s4909_s19  ;;  %3849 = vrot.lane.b32.xlu0 %v3848_v58, %s4909_s19 }
 0x2e5   : > { %v754_v62 = vsel %vm337_vm5, %v3636_v60, %v3637_v59  ;;  %v749_v12 = vsel %vm447_vm6, %v3651_v8, %v3652_v5  ;;  %v748_v56 = vsel %vm447_vm6, %v3611_v63, %v3651_v8 }
 0x2e6   : > { %v3655_v0 = vpop.permute.xlu0 %3654  ;;  %v3645_v6 = vpop.permute.xlu1 %3644  ;;  %v3858_v2 = vpack.i.bf16 %v3637_v59, %v754_v62  ;;  %v3893_v44 = vpack.i.bf16 %v3652_v5, %v749_v12 }
 0x2e7   : > { %v3656_v3 = vunpack.i.l.bf16 %v3655_v0  ;;  %v3646_v25 = vunpack.i.l.bf16 %v3645_v6  ;;  %v3647_v54 = vunpack.i.h.bf16 %v3645_v6  ;;  %v3657_v38 = vunpack.i.h.bf16 %v3655_v0 }
 0x2e8   : > { %3859 = vrot.lane.b32.xlu0 %v3858_v2, %s4909_s19  ;;  %v3602_v6 = vunpack.i.h.bf16 %v5339_v30 }
 0x2e9   : > { %v3863_v35 = vpack.i.bf16 %v3656_v3, %v3636_v60  ;;  %v737_v55 = vsel %vm435_vm7, %v3606_v27, %v3646_v25  ;;  %v738_v60 = vsel %vm435_vm7, %v3646_v25, %v3647_v54 }
 0x2ea   : > { %v3660_v39 = vpop.permute.xlu0 %3659  ;;  %v5359_v46 = vpop.permute.xlu1 %3674  ;;  %v3883_v59 = vpack.i.bf16 %v748_v56, %v737_v55  ;;  %v3888_v5 = vpack.i.bf16 %v3647_v54, %v738_v60 }
 0x2eb   : > { %v3661_v9 = vunpack.i.l.bf16 %v3660_v39  ;;  %v3676_v10 = vunpack.i.l.bf16 %v5359_v46 }
 0x2ec   : > { %3864 = vrot.lane.b32.xlu0 %v3863_v35, %s4909_s19 }
 0x2ed   : > { %v3873_v14 = vpack.i.bf16 %v3641_v7, %v3661_v9  ;;  %v785_v15 = vsel %vm486_vm8, %v3642_v4, %v3676_v10  ;;  %v764_v4 = vsel %vm464_vm9, %v3656_v3, %v3657_v38  ;;  %v3662_v7 = vunpack.i.h.bf16 %v3660_v39 }
 0x2ee   : > { %v3665_v11 = vpop.permute.xlu0 %3664  ;;  %v3680_v21 = vpop.permute.xlu1 %3679  ;;  %v3868_v22 = vpack.i.bf16 %v785_v15, %v784_v13 }
 0x2ef   : > { %v3666_v26 = vunpack.i.l.bf16 %v3665_v11  ;;  %v3681_v62 = vunpack.i.l.bf16 %v3680_v21  ;;  %v3682_v13 = vunpack.i.h.bf16 %v3680_v21  ;;  %v775_v30 = vsel %vm476_vm10, %v3661_v9, %v3662_v7 }
 0x2f0   : > { %3869 = vrot.lane.b32.xlu1 %v3868_v22, %s4909_s19  ;;  %3874 = vrot.lane.b32.xlu0 %v3873_v14, %s4909_s19  ;;  %v3667_v22 = vunpack.i.h.bf16 %v3665_v11 }
 0x2f1   : > { %v3878_v43 = vpack.i.bf16 %v5075_v50, %v3666_v26  ;;  %v1217_v14 = vsel %vm370_vm0, %v3602_v6, %v3681_v62 }
 0x2f2   : > { %v5370_v49 = vpop.permute.xlu1 %3689  ;;  %v5372_v52 = vpop.permute.xlu0 %3669  ;;  %v3913_v25 = vpack.i.bf16 %v1217_v14, %v5075_v50  ;;  %v795_v54 = vsel %vm498_vm11, %v3666_v26, %v3667_v22 }
 0x2f3   : > { %v3691_v55 = vunpack.i.l.bf16 %v5370_v49 }
 0x2f4   : > { %3894 = vrot.lane.b32.xlu1 %v3893_v44, %s4909_s19  ;;  %3879 = vrot.lane.b32.xlu0 %v3878_v43, %s4909_s19  ;;  %v1218_v43 = vsel %vm370_vm0, %v3681_v62, %v3682_v13  ;;  %v3692_v62 = vunpack.i.h.bf16 %v5370_v49 }
 0x2f5   : > { %v3918_v11 = vpack.i.bf16 %v3682_v13, %v1218_v43 }
 0x2f6   : > { %v5379_v57 = vpop.permute.xlu1 %3694  ;;  %v3685_v58 = vpop.permute.xlu0 %3684  ;;  %v1276_v49 = vsel %vm486_vm8, %v3691_v55, %v3692_v62 }
 0x2f7   : > { %v3696_v2 = vunpack.i.l.bf16 %v5379_v57  ;;  %v3687_v21 = vunpack.i.h.bf16 %v3685_v58  ;;  %v3686_v44 = vunpack.i.l.bf16 %v3685_v58  ;;  %v3697_v56 = vunpack.i.h.bf16 %v5379_v57 }
 0x2f8   : > { %3884 = vrot.lane.b32.xlu0 %v3883_v59, %s4909_s19 }
 0x2f9   : > { %v765_v35 = vsel %vm464_vm9, %v3657_v38, %v3696_v2  ;;  %v1245_v58 = vsel %vm337_vm5, %v3686_v44, %v3687_v21 }
 0x2fa   : > { %v3700_v0 = vpop.permute.xlu1 %3699  ;;  %v5387_v8 = vpop.permute.xlu0 %3714  ;;  %v3898_v10 = vpack.i.bf16 %v765_v35, %v764_v4  ;;  %v3677_v4 = vunpack.i.h.bf16 %v5359_v46  ;;  %v3928_v35 = vpack.i.bf16 %v3697_v56, %v3686_v44 }
 0x2fb   : > { %v3701_v15 = vunpack.i.l.bf16 %v3700_v0  ;;  %v3702_v46 = vunpack.i.h.bf16 %v3700_v0 }
 0x2fc   : > { %3899 = vrot.lane.b32.xlu1 %v3898_v10, %s4909_s19  ;;  %3889 = vrot.lane.b32.xlu0 %v3888_v5, %s4909_s19  ;;  %v1275_v26 = vsel %vm486_vm8, %v3677_v4, %v3691_v55 }
 0x2fd   : > { %v776_v3 = vsel %vm476_vm10, %v3662_v7, %v3701_v15  ;;  %v3923_v7 = vpack.i.bf16 %v3687_v21, %v1245_v58 }
 0x2fe   : > { %v3705_v39 = vpop.permute.xlu1 %3704  ;;  %v3725_v12 = vpop.permute.xlu0 %3724  ;;  %v3903_v27 = vpack.i.bf16 %v776_v3, %v775_v30 }
 0x2ff   : > { %v3706_v63 = vunpack.i.l.bf16 %v3705_v39  ;;  %v3727_v13 = vunpack.i.h.bf16 %v3725_v12  ;;  %v3726_v14 = vunpack.i.l.bf16 %v3725_v12  ;;  %v3707_v12 = vunpack.i.h.bf16 %v3705_v39 }
 0x300   : > { %3914 = vrot.lane.b32.xlu1 %v3913_v25, %s4909_s19  ;;  %3904 = vrot.lane.b32.xlu0 %v3903_v27, %s4909_s19  ;;  %v3933_v25 = vpack.i.bf16 %v1276_v49, %v1275_v26  ;;  %v3607_v39 = vunpack.i.h.bf16 %v5341_v51  ;;  %v3612_v26 = vunpack.i.h.bf16 %v5343_v34 }
 0x301   : > { %v796_v9 = vsel %vm498_vm11, %v3667_v22, %v3706_v63  ;;  %v1266_v27 = vsel %vm476_vm10, %v3702_v46, %v3726_v14  ;;  %v1267_v43 = vsel %vm476_vm10, %v3726_v14, %v3727_v13  ;;  %v3938_v63 = vpack.i.bf16 %v3677_v4, %v3702_v46 }
 0x302   : > { %v3710_v38 = vpop.permute.xlu1 %3709  ;;  %v3730_v59 = vpop.permute.xlu0 %3729  ;;  %v3908_v60 = vpack.i.bf16 %v796_v9, %v795_v54  ;;  %v3968_v9 = vpack.i.bf16 %v1267_v43, %v1266_v27  ;;  %v3943_v62 = vpack.i.bf16 %v5075_v50, %v3707_v12 }
 0x303   : > { %v3712_v2 = vunpack.i.h.bf16 %v3710_v38  ;;  %v3711_v6 = vunpack.i.l.bf16 %v3710_v38  ;;  %v3732_v21 = vunpack.i.h.bf16 %v3730_v59  ;;  %v3731_v44 = vunpack.i.l.bf16 %v3730_v59 }
 0x304   : > { %3919 = vrot.lane.b32.xlu1 %v3918_v11, %s4909_s19  ;;  %3909 = vrot.lane.b32.xlu0 %v3908_v60, %s4909_s19  ;;  %v3716_v59 = vunpack.i.l.bf16 %v5387_v8 }
 0x305   : > { %v1229_v15 = vsel %vm435_vm7, %v3711_v6, %v3712_v2  ;;  %v1286_v11 = vsel %vm498_vm11, %v3707_v12, %v3731_v44  ;;  %v1287_v55 = vsel %vm498_vm11, %v3731_v44, %v3732_v21 }
 0x306   : > { %v3720_v5 = vpop.permute.xlu1 %3719  ;;  %v5410_v10 = vpop.permute.xlu0 %3734  ;;  %v3953_v30 = vpack.i.bf16 %v3712_v2, %v1229_v15  ;;  %v3973_v4 = vpack.i.bf16 %v1287_v55, %v1286_v11  ;;  %v1239_v51 = vsel %vm447_vm6, %v3612_v26, %v3716_v59 }
 0x307   : > { %v3722_v13 = vunpack.i.h.bf16 %v3720_v5  ;;  %v3721_v14 = vunpack.i.l.bf16 %v3720_v5 }
 0x308   : > { %3924 = vrot.lane.b32.xlu0 %v3923_v7, %s4909_s19  ;;  %3929 = vrot.lane.b32.xlu1 %v3928_v35, %s4909_s19  ;;  %v3717_v7 = vunpack.i.h.bf16 %v5387_v8  ;;  %v1228_v35 = vsel %vm435_vm7, %v3607_v39, %v3711_v6 }
 0x309   : > { %v3948_v34 = vpack.i.bf16 %v1239_v51, %v1228_v35  ;;  %v3616_v35 = vunpack.i.l.bf16 %v5345_v37 }
 0x30a   : > { %v5416_v22 = vpop.permute.xlu1 %3739  ;;  %v5418_v3 = vpop.permute.xlu0 %3744  ;;  %v1240_v8 = vsel %vm447_vm6, %v3716_v59, %v3717_v7 }
 0x30b   : > { %v3742_v38 = vunpack.i.h.bf16 %v5416_v22  ;;  %v3741_v60 = vunpack.i.l.bf16 %v5416_v22  ;;  %v3958_v6 = vpack.i.bf16 %v3717_v7, %v1240_v8  ;;  %v1255_v22 = vsel %vm464_vm9, %v3697_v56, %v3721_v14 }
 0x30c   : > { %3954 = vrot.lane.b32.xlu0 %v3953_v30, %s4909_s19  ;;  %3934 = vrot.lane.b32.xlu1 %v3933_v25, %s4909_s19  ;;  %v1256_v25 = vsel %vm464_vm9, %v3721_v14, %v3722_v13  ;;  %v3747_v21 = vunpack.i.h.bf16 %v5418_v3  ;;  %v3746_v44 = vunpack.i.l.bf16 %v5418_v3  ;;  %v3626_v8 = vunpack.i.l.bf16 %v5349_v53 }
 0x30d   : > { %v845_v49 = vsel %vm370_vm0, %v3741_v60, %v3742_v38  ;;  %v3963_v59 = vpack.i.bf16 %v1256_v25, %v1255_v22 }
 0x30e   : > { %v5424_v54 = vpop.permute.xlu1 %3759  ;;  %v5426_v0 = vpop.permute.xlu0 %3749  ;;  %v3978_v15 = vpack.i.bf16 %v3742_v38, %v845_v49  ;;  %v872_v3 = vsel %vm337_vm5, %v3746_v44, %v3747_v21 }
 0x30f   : > { %v3751_v57 = vunpack.i.l.bf16 %v5426_v0  ;;  %v3983_v49 = vpack.i.bf16 %v3747_v21, %v872_v3  ;;  %v3761_v51 = vunpack.i.l.bf16 %v5424_v54 }
 0x310   : > { %3969 = vrot.lane.b32.xlu0 %v3968_v9, %s4909_s19  ;;  %3939 = vrot.lane.b32.xlu1 %v3938_v63, %s4909_s19  ;;  %v3752_v9 = vunpack.i.h.bf16 %v5426_v0  ;;  %v3258_v0 = vld [vmem:[%s6486_s6 + $0x28] sm:$0xff] }
 0x311   : > { %v866_v21 = vsel %vm447_vm6, %v3626_v8, %v3761_v51  ;;  %3260 = vmatprep.mubr.msk.f32.mxu0 %vm1109_vm13, %v3258_v0 }
 0x312   : > { %v5437_v58 = vpop.permute.xlu1 %3779  ;;  %v3755_v2 = vpop.permute.xlu0 %3754  ;;  %v902_v26 = vsel %vm486_vm8, %v3751_v57, %v3752_v9 }
 0x313   : > { %v3756_v11 = vunpack.i.l.bf16 %v3755_v2 }
 0x314   : > { %3974 = vrot.lane.b32.xlu0 %v3973_v4, %s4909_s19  ;;  %3944 = vrot.lane.b32.xlu1 %v3943_v62, %s4909_s19  ;;  %v3757_v62 = vunpack.i.h.bf16 %v3755_v2  ;;  %v3621_v4 = vunpack.i.l.bf16 %v5347_v41 }
 0x316   : > { %v5446_v46 = vpop.permute.xlu1 %3784  ;;  %v5448_v30 = vpop.permute.xlu0 %3764  ;;  %v855_v13 = vsel %vm435_vm7, %v3621_v4, %v3756_v11 }
 0x317   : > { %v3786_v5 = vunpack.i.l.bf16 %v5446_v46  ;;  %v3766_v12 = vunpack.i.l.bf16 %v5448_v30 }
 0x318   : > { %3979 = vrot.lane.b32.xlu0 %v3978_v15, %s4909_s19  ;;  %3949 = vrot.lane.b32.xlu1 %v3948_v34, %s4909_s19  ;;  %v856_v15 = vsel %vm435_vm7, %v3756_v11, %v3757_v62 }
 0x319   : > { %v903_v55 = vsel %vm486_vm8, %v3752_v9, %v3786_v5  ;;  %v3762_v5 = vunpack.i.h.bf16 %v5424_v54  ;;  %v4008_v9 = vpack.i.bf16 %v3757_v62, %v856_v15  ;;  %v4003_v54 = vpack.i.bf16 %v3746_v44, %v866_v21 }
 0x31a   : > { %v5458_v27 = vpop.permute.xlu1 %3789  ;;  %v3770_v43 = vpop.permute.xlu0 %3769  ;;  %v3993_v7 = vpack.i.bf16 %v903_v55, %v902_v26 }
 0x31b   : > { %v3771_v63 = vunpack.i.l.bf16 %v3770_v43  ;;  %v3772_v22 = vunpack.i.h.bf16 %v3770_v43  ;;  %v867_v3 = vsel %vm447_vm6, %v3761_v51, %v3762_v5 }
 0x31c   : > { %3959 = vrot.lane.b32.xlu1 %v3958_v6, %s4909_s19  ;;  %v844_v6 = vsel %vm370_vm0, %v3616_v35, %v3741_v60 }
 0x31d   : > { %v3988_v56 = vpack.i.bf16 %v3771_v63, %v3766_v12  ;;  %v3998_v25 = vpack.i.bf16 %v855_v13, %v844_v6  ;;  %v893_v60 = vsel %vm476_vm10, %v3771_v63, %v3772_v22  ;;  %v3792_v63 = vunpack.i.h.bf16 %v5458_v27 }
 0x31e   : > { %v5467_v38 = vpop.permute.xlu1 %3804  ;;  %v5469_v39 = vpop.permute.xlu0 %3774  ;;  %v3791_v13 = vunpack.i.l.bf16 %v5458_v27  ;;  %v3622_v6 = vunpack.i.h.bf16 %v5347_v41 }
 0x31f   : > { %3989 = vrot.lane.b32.xlu0 %v3988_v56, %s4909_s19  ;;  %v3806_v62 = vunpack.i.l.bf16 %v5467_v38 }
 0x320   : > { %3964 = vrot.lane.b32.xlu1 %v3963_v59, %s4909_s19  ;;  %v1336_v27 = vsel %vm370_vm0, %v3791_v13, %v3792_v63 }
 0x322   : > { %v5481_v14 = vpop.permute.xlu1 %3809  ;;  %v5483_v2 = vpop.permute.xlu0 %3794 }
 0x323   : > { %v3811_v34 = vunpack.i.l.bf16 %v5481_v14  ;;  %3994 = vrot.lane.b32.xlu0 %v3993_v7, %s4909_s19  ;;  %v3797_v55 = vunpack.i.h.bf16 %v5483_v2  ;;  %v3796_v59 = vunpack.i.l.bf16 %v5483_v2  ;;  %v3767_v7 = vunpack.i.h.bf16 %v5448_v30 }
 0x324   : > { %3984 = vrot.lane.b32.xlu1 %v3983_v49, %s4909_s19  ;;  %v4013_v49 = vpack.i.bf16 %v3762_v5, %v867_v3  ;;  %v3812_v51 = vunpack.i.h.bf16 %v5481_v14  ;;  %v3807_v30 = vunpack.i.h.bf16 %v5467_v38  ;;  %v3617_v14 = vunpack.i.h.bf16 %v5345_v37 }
 0x325   : > { %v894_v11 = vsel %vm476_vm10, %v3772_v22, %v3811_v34  ;;  %v1363_v26 = vsel %vm337_vm5, %v3796_v59, %v3797_v55  ;;  %v883_v44 = vsel %vm464_vm9, %v3767_v7, %v3806_v62  ;;  %v882_v8 = vsel %vm464_vm9, %v3766_v12, %v3767_v7 }
 0x326   : > { %v5493_v56 = vpop.permute.xlu0 %3799  ;;  %v5501_v43 = vpop.permute.xlu1 %3814  ;;  %v4023_v4 = vpack.i.bf16 %v894_v11, %v893_v60  ;;  %v4033_v2 = vpack.i.bf16 %v3797_v55, %v1363_v26  ;;  %v4018_v22 = vpack.i.bf16 %v883_v44, %v882_v8  ;;  %v3627_v12 = vunpack.i.h.bf16 %v5349_v53 }
 0x327   : > { %3999 = vrot.lane.b32.xlu0 %v3998_v25, %s4909_s19  ;;  %v4038_v25 = vpack.i.bf16 %v3812_v51, %v3807_v30  ;;  %v4028_v38 = vpack.i.bf16 %v3792_v63, %v1336_v27  ;;  %v1335_v41 = vsel %vm370_vm0, %v3617_v14, %v3791_v13  ;;  %v3801_v53 = vunpack.i.l.bf16 %v5493_v56 }
 0x328   : > { %4009 = vrot.lane.b32.xlu1 %v4008_v9, %s4909_s19  ;;  %v3816_v44 = vunpack.i.l.bf16 %v5501_v43 }
 0x32a   : > { %v3820_v35 = vpop.permute.xlu0 %3819  ;;  %v3825_v15 = vpop.permute.xlu1 %3824 }
 0x32b   : > { %4004 = vrot.lane.b32.xlu0 %v4003_v54, %s4909_s19  ;;  %v3821_v34 = vunpack.i.l.bf16 %v3820_v35  ;;  %v3827_v5 = vunpack.i.h.bf16 %v3825_v15  ;;  %v3826_v21 = vunpack.i.l.bf16 %v3825_v15  ;;  %v3822_v37 = vunpack.i.h.bf16 %v3820_v35 }
 0x32c   : > { %4024 = vrot.lane.b32.xlu1 %v4023_v4, %s4909_s19  ;;  %v3802_v4 = vunpack.i.h.bf16 %v5493_v56  ;;  %v3787_v35 = vunpack.i.h.bf16 %v5446_v46  ;;  %v3777_v15 = vunpack.i.h.bf16 %v5469_v39  ;;  %v3776_v56 = vunpack.i.l.bf16 %v5469_v39  ;;  %v916_v46 = vld [vmem:[%s6486_s6 + $0x8] sm:$0xff] }
 0x32d   : > { %v1346_v9 = vsel %vm435_vm7, %v3622_v6, %v3821_v34  ;;  %v1358_v55 = vsel %vm447_vm6, %v3826_v21, %v3827_v5  ;;  %v1357_v62 = vsel %vm447_vm6, %v3627_v12, %v3826_v21  ;;  %3254 = vmatprep.mubr.msk.f32.mxu1 %vm1109_vm13, %v916_v46 }
 0x32e   : > { %v3830_v11 = vpop.permute.xlu0 %3829  ;;  %v4043_v3 = vpack.i.bf16 %v1346_v9, %v1335_v41  ;;  %v4063_v26 = vpack.i.bf16 %v3827_v5, %v1358_v55  ;;  %v3835_v7 = vpop.permute.xlu1 %3834  ;;  %v4048_v13 = vpack.i.bf16 %v3796_v59, %v1357_v62  ;;  %v1394_v6 = vsel %vm486_vm8, %v3801_v53, %v3802_v4 }
 0x32f   : > { %4014 = vrot.lane.b32.xlu0 %v4013_v49, %s4909_s19  ;;  %v3832_v60 = vunpack.i.h.bf16 %v3830_v11  ;;  %v3831_v54 = vunpack.i.l.bf16 %v3830_v11  ;;  %v3837_v27 = vunpack.i.h.bf16 %v3835_v7  ;;  %v913_v39 = vsel %vm498_vm11, %v3776_v56, %v3777_v15 }
 0x330   : > { %4034 = vrot.lane.b32.xlu1 %v4033_v2, %s4909_s19  ;;  %v1347_v2 = vsel %vm435_vm7, %v3821_v34, %v3822_v37  ;;  %v3836_v34 = vunpack.i.l.bf16 %v3835_v7  ;;  %v3817_v41 = vunpack.i.h.bf16 %v5501_v43  ;;  %v3671_v4 = vunpack.i.l.bf16 %v5372_v52 }
 0x331   : > { %v1373_v49 = vsel %vm464_vm9, %v3807_v30, %v3831_v54  ;;  %v1374_v63 = vsel %vm464_vm9, %v3831_v54, %v3832_v60  ;;  %v1393_v30 = vsel %vm486_vm8, %v3787_v35, %v3801_v53  ;;  %v4053_v59 = vpack.i.bf16 %v3822_v37, %v1347_v2 }
 0x332   : > { %v4068_v8 = vpack.i.bf16 %v1374_v63, %v1373_v49  ;;  %v4073_v5 = vpack.i.bf16 %v1394_v6, %v1393_v30  ;;  %v1384_v14 = vsel %vm476_vm10, %v3812_v51, %v3836_v34  ;;  %v1385_v9 = vsel %vm476_vm10, %v3836_v34, %v3837_v27  ;;  %v917_v51 = vld [vmem:[%s6487_s7] sm:$0xff] }
 0x333   : > { %4019 = vrot.lane.b32.xlu0 %v4018_v22, %s4909_s19  ;;  %v914_v22 = vsel %vm498_vm11, %v3777_v15, %v3816_v44  ;;  %v4083_v55 = vpack.i.bf16 %v1385_v9, %v1384_v14  ;;  %v4093_v43 = vpack.i.bf16 %v3817_v41, %v3787_v35  ;;  %v3672_v37 = vunpack.i.h.bf16 %v5372_v52 }
 0x334   : > { %4039 = vrot.lane.b32.xlu1 %v4038_v25, %s4909_s19  ;;  %v3840_v25 = vpop.permute.xlu1 %3839  ;;  %v4058_v21 = vpack.i.bf16 %v914_v22, %v913_v39 }
 0x335   : > { %v3842_v11 = vunpack.i.h.bf16 %v3840_v25  ;;  %v3841_v12 = vunpack.i.l.bf16 %v3840_v25  ;;  %v1038_v44 = vsel %vm407_vm4, %v3671_v4, %v3672_v37 }
 0x337   : > { %4029 = vrot.lane.b32.xlu0 %v4028_v38, %s4909_s19  ;;  %v4078_v38 = vpack.i.bf16 %v3776_v56, %v3751_v57  ;;  %v1404_v60 = vsel %vm498_vm11, %v3817_v41, %v3841_v12  ;;  %v1405_v54 = vsel %vm498_vm11, %v3841_v12, %v3842_v11 }
 0x338   : > { %4044 = vrot.lane.b32.xlu1 %v4043_v3, %s4909_s19  ;;  %v4088_v57 = vpack.i.bf16 %v1405_v54, %v1404_v60  ;;  %v3259_v3 = vld [vmem:[%s6487_s7 + $0x10] sm:$0xff]  ;;  %v5575_v62 = vpop.permute.xlu1 %3844  ;;  %v3737_v60 = vunpack.i.h.bf16 %v5410_v10 }
 0x33b   : > { %4064 = vrot.lane.b32.xlu0 %v4063_v26, %s4909_s19 }
 0x33c   : > { %4049 = vrot.lane.b32.xlu1 %v4048_v13, %s4909_s19 }
 0x33f   : > { %4069 = vrot.lane.b32.xlu0 %v4068_v8, %s4909_s19 }
 0x340   : > { %4054 = vrot.lane.b32.xlu1 %v4053_v59, %s4909_s19 }
 0x343   : > { %4074 = vrot.lane.b32.xlu0 %v4073_v5, %s4909_s19 }
 0x344   : > { %4059 = vrot.lane.b32.xlu1 %v4058_v21, %s4909_s19 }
 0x347   : > { %4079 = vrot.lane.b32.xlu0 %v4078_v38, %s4909_s19 }
 0x348   : > { %4084 = vrot.lane.b32.xlu1 %v4083_v55, %s4909_s19 }
 0x34b   : > { %920 = vperm.xlu0 %3597, %v917_v51  }
 0x34c   : > { %4089 = vrot.lane.b32.xlu1 %v4088_v57, %s4909_s19 }
 0x34f   : > { %4099 = vrot.lane.b32.xlu0 %v4904_v1, %s4906_s12 }
 0x350   : > { %4094 = vrot.lane.b32.xlu1 %v4093_v43, %s4909_s19 }
 0x353   : > { %4109 = vrot.lane.b32.xlu0 %v5133_v31, %s4911_s21 }
 0x354   : > { %1413 = vperm.xlu1 %3596, %v3259_v3  }
 0x356   : > { %v3855_v26 = vpop.permute.xlu1 %3854  ;;  %v3850_v53 = vpop.permute.xlu0 %3849 }
 0x357   : > { %v3857_v7 = vunpack.i.h.bf16 %v3855_v26  ;;  %v3856_v49 = vunpack.i.l.bf16 %v3855_v26  ;;  %v3852_v63 = vunpack.i.h.bf16 %v3850_v53  ;;  %v3851_v13 = vunpack.i.l.bf16 %v3850_v53 }
 0x358   : > { %4104 = vrot.lane.b32.xlu1 %v5139_v32, %s4912_s22 }
 0x359   : > { %v1040_v2 = vsel %vm407_vm4, %v3856_v49, %v3857_v7  ;;  %v1037_v35 = vsel %vm407_vm4, %v3851_v13, %v3671_v4  ;;  %v1039_v15 = vsel %vm407_vm4, %v3852_v63, %v3856_v49 }
 0x35a   : > { %v3860_v56 = vpop.permute.xlu0 %3859  ;;  %v3299_v8 = vpack.c.bf16 %v1040_v2, %v1038_v44  ;;  %v3301_v52 = vpack.c.bf16 %v1039_v15, %v1037_v35  ;;  %v3736_v15 = vunpack.i.l.bf16 %v5410_v10 }
 0x35b   : > { %v3862_v5 = vunpack.i.h.bf16 %v3860_v56  ;;  %v3861_v21 = vunpack.i.l.bf16 %v3860_v56  ;;  %v3782_v56 = vunpack.i.h.bf16 %v5437_v58 }
 0x35c   : > { %3300 = vmatprep.subr.bf16.mxu1 %v3299_v8 }
 0x35d   : > { %3302 = vmatpush1.bf16.msra.mxu1 %v3301_v52  ;;  %v1046_v2 = vsel %vm407_vm4, %v3861_v21, %v3862_v5 }
 0x35e   : > { %v3865_v30 = vpop.permute.xlu0 %3864 }
 0x35f   : > { %v3867_v54 = vunpack.i.h.bf16 %v3865_v30  ;;  %v3866_v51 = vunpack.i.l.bf16 %v3865_v30  ;;  %v3781_v30 = vunpack.i.l.bf16 %v5437_v58  ;;  %v1531_v58 = vsel %vm407_vm4, %v3736_v15, %v3737_v60 }
 0x362   : > { %v3875_v6 = vpop.permute.xlu0 %3874  ;;  %v3870_v59 = vpop.permute.xlu1 %3869 }
 0x363   : > { %v3872_v4 = vunpack.i.h.bf16 %v3870_v59  ;;  %v3871_v26 = vunpack.i.l.bf16 %v3870_v59  ;;  %v3877_v8 = vunpack.i.h.bf16 %v3875_v6 }
 0x365   : > { %v1052_v10 = vsel %vm407_vm4, %v3871_v26, %v3872_v4 }
 0x366   : > { %v5587_v22 = vpop.permute.xlu0 %3879  ;;  %v3895_v27 = vpop.permute.xlu1 %3894 }
 0x367   : > { %v3897_v25 = vunpack.i.h.bf16 %v3895_v27  ;;  %v3896_v46 = vunpack.i.l.bf16 %v3895_v27  ;;  %v1045_v27 = vsel %vm407_vm4, %v3866_v51, %v3861_v21  ;;  %v1051_v21 = vsel %vm407_vm4, %v3877_v8, %v3871_v26 }
 0x368   : > { %v1056_v26 = vsel %vm407_vm4, %v3781_v30, %v3782_v56 }
 0x369   : > { %v1044_v0 = vsel %vm407_vm4, %v3896_v46, %v3897_v25  ;;  %v3876_v25 = vunpack.i.l.bf16 %v3875_v6 }
 0x36a   : > { %v3885_v34 = vpop.permute.xlu0 %3884 }
 0x36b   : > { %v3887_v39 = vunpack.i.h.bf16 %v3885_v34  ;;  %v3886_v14 = vunpack.i.l.bf16 %v3885_v34 }
 0x36d   : > { %v1043_v3 = vsel %vm407_vm4, %v3887_v39, %v3896_v46 }
 0x36e   : > { %v3900_v9 = vpop.permute.xlu1 %3899  ;;  %v3890_v11 = vpop.permute.xlu0 %3889 }
 0x36f   : > { %v3902_v12 = vunpack.i.h.bf16 %v3900_v9  ;;  %v3901_v38 = vunpack.i.l.bf16 %v3900_v9  ;;  %v3892_v41 = vunpack.i.h.bf16 %v3890_v11  ;;  %v3891_v55 = vunpack.i.l.bf16 %v3890_v11 }
 0x371   : > { %v1042_v57 = vsel %vm407_vm4, %v3891_v55, %v3892_v41  ;;  %v1041_v43 = vsel %vm407_vm4, %v3886_v14, %v3891_v55  ;;  %v1048_v37 = vsel %vm407_vm4, %v3901_v38, %v3902_v12  ;;  %v1047_v35 = vsel %vm407_vm4, %v3867_v54, %v3901_v38 }
 0x372   : > { %v3915_v53 = vpop.permute.xlu1 %3914  ;;  %v3905_v7 = vpop.permute.xlu0 %3904  ;;  %v3303_v49 = vpack.c.bf16 %v1044_v0, %v1042_v57  ;;  %v3305_v63 = vpack.c.bf16 %v1043_v3, %v1041_v43  ;;  %v3307_v52 = vpack.c.bf16 %v1048_v37, %v1046_v2  ;;  %v3309_v14 = vpack.c.bf16 %v1047_v35, %v1045_v27 }
 0x373   : > { %v3907_v13 = vunpack.i.h.bf16 %v3905_v7  ;;  %v3906_v44 = vunpack.i.l.bf16 %v3905_v7  ;;  %v3916_v59 = vunpack.i.l.bf16 %v3915_v53  ;;  %v3917_v46 = vunpack.i.h.bf16 %v3915_v53 }
 0x374   : > { %3304 = vmatprep.subr.bf16.mxu1 %v3303_v49  ;;  %v3882_v57 = vunpack.i.h.bf16 %v5587_v22  ;;  %v3881_v43 = vunpack.i.l.bf16 %v5587_v22 }
 0x375   : > { %3306 = vmatpush1.bf16.msra.mxu1 %v3305_v63  ;;  %v1050_v34 = vsel %vm407_vm4, %v3906_v44, %v3907_v13  ;;  %v1049_v55 = vsel %vm407_vm4, %v3876_v25, %v3906_v44  ;;  %v1530_v6 = vsel %vm407_vm4, %v3916_v59, %v3736_v15 }
 0x376   : > { %v3920_v39 = vpop.permute.xlu1 %3919  ;;  %v3910_v5 = vpop.permute.xlu0 %3909  ;;  %3308 = vmatprep.subr.bf16.mxu1 %v3307_v52  ;;  %v3311_v41 = vpack.c.bf16 %v1052_v10, %v1050_v34  ;;  %v3313_v53 = vpack.c.bf16 %v1051_v21, %v1049_v55  ;;  %v1055_v44 = vsel %vm407_vm4, %v3882_v57, %v3781_v30 }
 0x377   : > { %v3922_v9 = vunpack.i.h.bf16 %v3920_v39  ;;  %v3921_v11 = vunpack.i.l.bf16 %v3920_v39  ;;  %v3912_v12 = vunpack.i.h.bf16 %v3910_v5  ;;  %v3911_v38 = vunpack.i.l.bf16 %v3910_v5 }
 0x379   : > { %v1532_v54 = vsel %vm407_vm4, %v3917_v46, %v3921_v11  ;;  %3310 = vmatpush1.bf16.msra.mxu1 %v3309_v14  ;;  %v1533_v51 = vsel %vm407_vm4, %v3921_v11, %v3922_v9  ;;  %v1054_v0 = vsel %vm407_vm4, %v3911_v38, %v3912_v12  ;;  %v1053_v49 = vsel %vm407_vm4, %v3881_v43, %v3911_v38 }
 0x37a   : > { %v3925_v3 = vpop.permute.xlu0 %3924  ;;  %v3930_v37 = vpop.permute.xlu1 %3929  ;;  %3312 = vmatprep.subr.bf16.mxu1 %v3311_v41  ;;  %v3335_v60 = vpack.c.bf16 %v1533_v51, %v1531_v58  ;;  %v3337_v4 = vpack.c.bf16 %v1532_v54, %v1530_v6  ;;  %v3315_v7 = vpack.c.bf16 %v1056_v26, %v1054_v0  ;;  %v3317_v22 = vpack.c.bf16 %v1055_v44, %v1053_v49 }
 0x37b   : > { %v3927_v46 = vunpack.i.h.bf16 %v3925_v3  ;;  %v3926_v30 = vunpack.i.l.bf16 %v3925_v3  ;;  %v3931_v10 = vunpack.i.l.bf16 %v3930_v37  ;;  %v3932_v21 = vunpack.i.h.bf16 %v3930_v37 }
 0x37c   : > { %3336 = vmatprep.subr.bf16.mxu0 %v3335_v60 }
 0x37d   : > { %3314 = vmatpush1.bf16.msra.mxu1 %v3313_v53  ;;  %3338 = vmatpush1.bf16.msra.mxu0 %v3337_v4  ;;  %v1538_v4 = vsel %vm407_vm4, %v3931_v10, %v3926_v30  ;;  %v1539_v26 = vsel %vm407_vm4, %v3926_v30, %v3927_v46 }
 0x37e   : > { %v3955_v63 = vpop.permute.xlu0 %3954  ;;  %v3935_v13 = vpop.permute.xlu1 %3934  ;;  %3316 = vmatprep.subr.bf16.mxu1 %v3315_v7 }
 0x37f   : > { %v3957_v52 = vunpack.i.h.bf16 %v3955_v63  ;;  %v3956_v59 = vunpack.i.l.bf16 %v3955_v63  ;;  %v3937_v6 = vunpack.i.h.bf16 %v3935_v13  ;;  %v3936_v57 = vunpack.i.l.bf16 %v3935_v13 }
 0x381   : > { %3318 = vmatpush1.bf16.msra.mxu1 %v3317_v22  ;;  %v1535_v58 = vsel %vm407_vm4, %v3956_v59, %v3957_v52  ;;  %v3846_v52 = vunpack.i.l.bf16 %v5575_v62 }
 0x382   : > { %v3970_v2 = vpop.permute.xlu0 %3969  ;;  %v3940_v35 = vpop.permute.xlu1 %3939 }
 0x383   : > { %v3972_v9 = vunpack.i.h.bf16 %v3970_v2  ;;  %v3971_v11 = vunpack.i.l.bf16 %v3970_v2  ;;  %v3941_v43 = vunpack.i.l.bf16 %v3940_v35  ;;  %v3942_v53 = vunpack.i.h.bf16 %v3940_v35 }
 0x384   : > { %v3847_v35 = vunpack.i.h.bf16 %v5575_v62 }
 0x385   : > { %v1543_v7 = vsel %vm407_vm4, %v3971_v11, %v3972_v9 }
 0x386   : > { %v5615_v15 = vpop.permute.xlu1 %3944  ;;  %v5617_v8 = vpop.permute.xlu0 %3974 }
 0x387   : > { %v3977_v49 = vunpack.i.h.bf16 %v5617_v8  ;;  %v3976_v37 = vunpack.i.l.bf16 %v5617_v8  ;;  %v1544_v8 = vsel %vm407_vm4, %v3942_v53, %v3936_v57  ;;  %v3946_v46 = vunpack.i.l.bf16 %v5615_v15 }
 0x389   : > { %v1547_v62 = vsel %vm407_vm4, %v3976_v37, %v3977_v49 }
 0x38a   : > { %v3950_v56 = vpop.permute.xlu1 %3949  ;;  %v5619_v27 = vpop.permute.xlu0 %3979 }
 0x38b   : > { %v3951_v34 = vunpack.i.l.bf16 %v3950_v56  ;;  %v3952_v39 = vunpack.i.h.bf16 %v3950_v56 }
 0x38d   : > { %v1534_v12 = vsel %vm407_vm4, %v3951_v34, %v3956_v59  ;;  %v1542_v59 = vsel %vm407_vm4, %v3941_v43, %v3971_v11  ;;  %v1545_v34 = vsel %vm407_vm4, %v3936_v57, %v3937_v6 }
 0x38e   : > { %v3960_v25 = vpop.permute.xlu1 %3959 }
 0x38f   : > { %v3962_v5 = vunpack.i.h.bf16 %v3960_v25  ;;  %v3961_v14 = vunpack.i.l.bf16 %v3960_v25  ;;  %v3947_v25 = vunpack.i.h.bf16 %v5615_v15 }
 0x391   : > { %v1536_v38 = vsel %vm407_vm4, %v3952_v39, %v3961_v14  ;;  %v5623_v41 = vpop.permute.xlu0 %3989  ;;  %v1537_v55 = vsel %vm407_vm4, %v3961_v14, %v3962_v5  ;;  %v3347_v39 = vpack.c.bf16 %v1545_v34, %v1543_v7  ;;  %v3982_v5 = vunpack.i.h.bf16 %v5619_v27 }
 0x392   : > { %v3965_v54 = vpop.permute.xlu1 %3964  ;;  %v3339_v51 = vpack.c.bf16 %v1537_v55, %v1535_v58  ;;  %v3341_v0 = vpack.c.bf16 %v1536_v38, %v1534_v12  ;;  %v3981_v14 = vunpack.i.l.bf16 %v5619_v27  ;;  %v3349_v58 = vpack.c.bf16 %v1544_v8, %v1542_v59 }
 0x393   : > { %v3967_v3 = vunpack.i.h.bf16 %v3965_v54  ;;  %v3966_v60 = vunpack.i.l.bf16 %v3965_v54  ;;  %v1549_v55 = vsel %vm407_vm4, %v3846_v52, %v3847_v35  ;;  %v1548_v15 = vsel %vm407_vm4, %v3947_v25, %v3846_v52 }
 0x394   : > { %3340 = vmatprep.subr.bf16.mxu0 %v3339_v51  ;;  %v3351_v6 = vpack.c.bf16 %v1549_v55, %v1547_v62  ;;  %v1058_v51 = vsel %vm407_vm4, %v3981_v14, %v3982_v5  ;;  %v3991_v5 = vunpack.i.l.bf16 %v5623_v41 }
 0x395   : > { %v1540_v63 = vsel %vm407_vm4, %v3932_v21, %v3966_v60  ;;  %v5633_v44 = vpop.permute.xlu0 %3994  ;;  %3342 = vmatpush1.bf16.msra.mxu0 %v3341_v0  ;;  %v1541_v13 = vsel %vm407_vm4, %v3966_v60, %v3967_v3  ;;  %v1546_v21 = vsel %vm407_vm4, %v3946_v46, %v3976_v37 }
 0x396   : > { %v3985_v22 = vpop.permute.xlu1 %3984  ;;  %v3343_v2 = vpack.c.bf16 %v1541_v13, %v1539_v26  ;;  %v3345_v56 = vpack.c.bf16 %v1540_v63, %v1538_v4  ;;  %v3353_v26 = vpack.c.bf16 %v1548_v15, %v1546_v21 }
 0x397   : > { %v3987_v4 = vunpack.i.h.bf16 %v3985_v22  ;;  %v3986_v53 = vunpack.i.l.bf16 %v3985_v22 }
 0x398   : > { %3344 = vmatprep.subr.bf16.mxu0 %v3343_v2 }
 0x399   : > { %v4000_v30 = vpop.permute.xlu0 %3999  ;;  %3346 = vmatpush1.bf16.msra.mxu0 %v3345_v56  ;;  %v1064_v35 = vsel %vm407_vm4, %v3986_v53, %v3987_v4 }
 0x39a   : > { %v4002_v10 = vunpack.i.h.bf16 %v4000_v30  ;;  %v4001_v9 = vunpack.i.l.bf16 %v4000_v30  ;;  %v4010_v11 = vpop.permute.xlu1 %4009  ;;  %3348 = vmatprep.subr.bf16.mxu0 %v3347_v39  ;;  %v3992_v39 = vunpack.i.h.bf16 %v5623_v41 }
 0x39b   : > { %v4012_v12 = vunpack.i.h.bf16 %v4010_v11  ;;  %v4011_v38 = vunpack.i.l.bf16 %v4010_v11 }
 0x39c   : > { %v1057_v27 = vsel %vm407_vm4, %v4001_v9, %v3981_v14 }
 0x39d   : > { %v4005_v54 = vpop.permute.xlu0 %4004  ;;  %3350 = vmatpush1.bf16.msra.mxu0 %v3349_v58  ;;  %v1060_v0 = vsel %vm407_vm4, %v4011_v38, %v4012_v12  ;;  %v1059_v57 = vsel %vm407_vm4, %v4002_v10, %v4011_v38 }
 0x39e   : > { %v4025_v43 = vpop.permute.xlu1 %4024  ;;  %3352 = vmatprep.subr.bf16.mxu0 %v3351_v6  ;;  %v3319_v3 = vpack.c.bf16 %v1060_v0, %v1058_v51  ;;  %v3321_v60 = vpack.c.bf16 %v1059_v57, %v1057_v27  ;;  %v4007_v7 = vunpack.i.h.bf16 %v4005_v54  ;;  %v4006_v37 = vunpack.i.l.bf16 %v4005_v54 }
 0x39f   : > { %v4027_v56 = vunpack.i.h.bf16 %v4025_v43  ;;  %v4026_v52 = vunpack.i.l.bf16 %v4025_v43  ;;  %v3997_v43 = vunpack.i.h.bf16 %v5633_v44 }
 0x3a0   : > { %3320 = vmatprep.subr.bf16.mxu1 %v3319_v3  ;;  %v1063_v22 = vsel %vm407_vm4, %v4007_v7, %v3986_v53 }
 0x3a1   : > { %v4015_v49 = vpop.permute.xlu0 %4014  ;;  %3322 = vmatpush1.bf16.msra.mxu1 %v3321_v60  ;;  %3354 = vmatpush1.bf16.msra.mxu0 %v3353_v26  ;;  %v1068_v9 = vsel %vm407_vm4, %v4026_v52, %v4027_v56  ;;  %v1067_v12 = vsel %vm407_vm4, %v3992_v39, %v4026_v52 }
 0x3a2   : > { %v4017_v63 = vunpack.i.h.bf16 %v4015_v49  ;;  %v4016_v13 = vunpack.i.l.bf16 %v4015_v49  ;;  %v4035_v2 = vpop.permute.xlu1 %4034  ;;  %v3996_v49 = vunpack.i.l.bf16 %v5633_v44 }
 0x3a3   : > { %v4037_v3 = vunpack.i.h.bf16 %v4035_v2  ;;  %v4036_v4 = vunpack.i.l.bf16 %v4035_v2 }
 0x3a4   : > { %v1062_v59 = vsel %vm407_vm4, %v4016_v13, %v4017_v63  ;;  %v1061_v34 = vsel %vm407_vm4, %v4006_v37, %v4016_v13 }
 0x3a5   : > { %v4020_v8 = vpop.permute.xlu0 %4019  ;;  %v3323_v25 = vpack.c.bf16 %v1064_v35, %v1062_v59  ;;  %v3325_v46 = vpack.c.bf16 %v1063_v22, %v1061_v34  ;;  %v1557_v44 = vsel %vm407_vm4, %v4036_v4, %v4037_v3 }
 0x3a6   : > { %v4022_v14 = vunpack.i.h.bf16 %v4020_v8  ;;  %v4021_v30 = vunpack.i.l.bf16 %v4020_v8  ;;  %v5659_v62 = vpop.permute.xlu1 %4039 }
 0x3a7   : > { %3324 = vmatprep.subr.bf16.mxu1 %v3323_v25 }
 0x3a8   : > { %3326 = vmatpush1.bf16.msra.mxu1 %v3325_v46  ;;  %v1066_v10 = vsel %vm407_vm4, %v4021_v30, %v4022_v14  ;;  %v1065_v11 = vsel %vm407_vm4, %v3991_v5, %v4021_v30 }
 0x3a9   : > { %v4030_v38 = vpop.permute.xlu0 %4029  ;;  %v3327_v58 = vpack.c.bf16 %v1068_v9, %v1066_v10  ;;  %v3329_v55 = vpack.c.bf16 %v1067_v12, %v1065_v11  ;;  %v4041_v9 = vunpack.i.l.bf16 %v5659_v62  ;;  %v1070_v12 = vsel %vm407_vm4, %v3996_v49, %v3997_v43 }
 0x3aa   : > { %v4045_v15 = vpop.permute.xlu1 %4044  ;;  %v4032_v6 = vunpack.i.h.bf16 %v4030_v38  ;;  %v4031_v27 = vunpack.i.l.bf16 %v4030_v38 }
 0x3ab   : > { %3328 = vmatprep.subr.bf16.mxu1 %v3327_v58  ;;  %v4046_v54 = vunpack.i.l.bf16 %v4045_v15  ;;  %v4047_v53 = vunpack.i.h.bf16 %v4045_v15  ;;  %v4042_v58 = vunpack.i.h.bf16 %v5659_v62 }
 0x3ac   : > { %3330 = vmatpush1.bf16.msra.mxu1 %v3329_v55  ;;  %v1551_v13 = vsel %vm407_vm4, %v4031_v27, %v4032_v6 }
 0x3ad   : > { %v4065_v41 = vpop.permute.xlu0 %4064  ;;  %v1550_v56 = vsel %vm407_vm4, %v4046_v54, %v4031_v27 }
 0x3ae   : > { %v4050_v21 = vpop.permute.xlu1 %4049  ;;  %v4067_v51 = vunpack.i.h.bf16 %v4065_v41  ;;  %v4066_v0 = vunpack.i.l.bf16 %v4065_v41 }
 0x3af   : > { %v4052_v37 = vunpack.i.h.bf16 %v4050_v21  ;;  %v4051_v63 = vunpack.i.l.bf16 %v4050_v21 }
 0x3b0   : > { %v1555_v34 = vsel %vm407_vm4, %v4066_v0, %v4067_v51 }
 0x3b1   : > { %v4070_v57 = vpop.permute.xlu0 %4069  ;;  %v1554_v5 = vsel %vm407_vm4, %v4051_v63, %v4066_v0  ;;  %v1556_v14 = vsel %vm407_vm4, %v4052_v37, %v4036_v4  ;;  %v3359_v10 = vpack.c.bf16 %v1557_v44, %v1555_v34 }
 0x3b2   : > { %v4055_v60 = vpop.permute.xlu1 %4054  ;;  %v4071_v25 = vunpack.i.l.bf16 %v4070_v57  ;;  %v4072_v30 = vunpack.i.h.bf16 %v4070_v57  ;;  %v3361_v51 = vpack.c.bf16 %v1556_v14, %v1554_v5 }
 0x3b3   : > { %v4057_v26 = vunpack.i.h.bf16 %v4055_v60  ;;  %v4056_v7 = vunpack.i.l.bf16 %v4055_v60 }
 0x3b4   : > { %v1558_v6 = vsel %vm407_vm4, %v4041_v9, %v4071_v25  ;;  %v1559_v3 = vsel %vm407_vm4, %v4071_v25, %v4072_v30 }
 0x3b5   : > { %v1552_v35 = vsel %vm407_vm4, %v4047_v53, %v4056_v7  ;;  %v4075_v52 = vpop.permute.xlu0 %4074  ;;  %v1553_v59 = vsel %vm407_vm4, %v4056_v7, %v4057_v26 }
 0x3b6   : > { %v4060_v22 = vpop.permute.xlu1 %4059  ;;  %v3355_v2 = vpack.c.bf16 %v1553_v59, %v1551_v13  ;;  %v3357_v8 = vpack.c.bf16 %v1552_v35, %v1550_v56  ;;  %v4077_v0 = vunpack.i.h.bf16 %v4075_v52  ;;  %v4076_v60 = vunpack.i.l.bf16 %v4075_v52 }
 0x3b7   : > { %v4062_v46 = vunpack.i.h.bf16 %v4060_v22  ;;  %v4061_v39 = vunpack.i.l.bf16 %v4060_v22 }
 0x3b8   : > { %3356 = vmatprep.subr.bf16.mxu0 %v3355_v2  ;;  %v1563_v56 = vsel %vm407_vm4, %v4076_v60, %v4077_v0 }
 0x3b9   : > { %v4080_v11 = vpop.permute.xlu0 %4079  ;;  %3358 = vmatpush1.bf16.msra.mxu0 %v3357_v8  ;;  %v1072_v38 = vsel %vm407_vm4, %v4061_v39, %v4062_v46  ;;  %v3257_v46 = vld [vmem:[%s6486_s6 + $0x20] sm:$0xff] }
 0x3ba   : > { %v4082_v55 = vunpack.i.h.bf16 %v4080_v11  ;;  %v4081_v15 = vunpack.i.l.bf16 %v4080_v11  ;;  %v4085_v41 = vpop.permute.xlu1 %4084  ;;  %3360 = vmatprep.subr.bf16.mxu0 %v3359_v10  ;;  %v3331_v21 = vpack.c.bf16 %v1072_v38, %v1070_v12 }
 0x3bb   : > { %v4087_v27 = vunpack.i.h.bf16 %v4085_v41  ;;  %v4086_v54 = vunpack.i.l.bf16 %v4085_v41 }
 0x3bc   : > { %3332 = vmatprep.subr.bf16.mxu1 %v3331_v21  ;;  %v1069_v57 = vsel %vm407_vm4, %v4081_v15, %v3996_v49  ;;  %v1071_v43 = vsel %vm407_vm4, %v4082_v55, %v4061_v39  ;;  %v915_v49 = vld [vmem:[%s6486_s6] sm:$0xff] }
 0x3bd   : > { %v1560_v62 = vsel %vm407_vm4, %v4042_v58, %v4086_v54  ;;  %3362 = vmatpush1.bf16.msra.mxu0 %v3361_v51  ;;  %v3333_v4 = vpack.c.bf16 %v1071_v43, %v1069_v57  ;;  %v1561_v53 = vsel %vm407_vm4, %v4086_v54, %v4087_v27 }
 0x3be   : > { %v4090_v26 = vpop.permute.xlu1 %4089  ;;  %v3363_v7 = vpack.c.bf16 %v1561_v53, %v1559_v3  ;;  %v3365_v37 = vpack.c.bf16 %v1560_v62, %v1558_v6 }
 0x3bf   : > { %v4092_v63 = vunpack.i.h.bf16 %v4090_v26  ;;  %v4091_v13 = vunpack.i.l.bf16 %v4090_v26  ;;  %3334 = vmatpush1.bf16.msra.mxu1 %v3333_v4 }
 0x3c0   : > { %3364 = vmatprep.subr.bf16.mxu0 %v3363_v7 }
 0x3c1   : > { %3366 = vmatpush1.bf16.msra.mxu0 %v3365_v37  ;;  %v1565_v35 = vsel %vm407_vm4, %v4091_v13, %v4092_v63 }
 0x3c2   : > { %v4095_v52 = vpop.permute.xlu1 %4094  ;;  %1178 = vmatmul.mubr.f32.vlgmr.msra.gmra.mrb[0].mxu1 %v915_v49  ;;  %v3367_v59 = vpack.c.bf16 %v1565_v35, %v1563_v56 }
 0x3c3   : > { %v4097_v34 = vunpack.i.h.bf16 %v4095_v52  ;;  %v4096_v22 = vunpack.i.l.bf16 %v4095_v52 }
 0x3c4   : > { %3368 = vmatprep.subr.bf16.mxu0 %v3367_v59 }
 0x3c5   : > { %v1562_v2 = vsel %vm407_vm4, %v4096_v22, %v4076_v60  ;;  %v1564_v8 = vsel %vm407_vm4, %v4097_v34, %v4091_v13 }
 0x3c6   : > { %v3369_v25 = vpack.c.bf16 %v1564_v8, %v1562_v2 }
 0x3c8   : > { %3370 = vmatpush1.bf16.msra.mxu0 %v3369_v25 }
 0x3ca   : > { %v921_v39 = vpop.permute.xlu0 %920 }
 0x3cb   : > { %1670 = vmatmul.mubr.f32.vlgmr.msra.gmra.mrb[4].mxu0 %v3257_v46 }
 0x3d3   : > { %v1414_v11 = vpop.permute.xlu1 %1413 }
 0x495   : > { %v1179_v44 = vpop.f32.mrb[0].mxu1 }
 0x496   : > { %v1180_v5 = vadd.f32 %v1179_v44, %v921_v39  ;;  %v1181_v14 = vpop.f32.mrb[1].mxu1 }
 0x497   : > { %v1182_v30 = vadd.f32 %v1181_v14, %v921_v39 }
 0x498   : > { %v3261_v10 = vmul.f32 -1.442695, %v1180_v5 }
 0x499   : > { %v3262_v9 = vmul.f32 -1.442695, %v1182_v30 }
 0x49a   : > { %4864 = vpow2.f32 %v3261_v10 }
 0x49b   : > { %4866 = vpow2.f32 %v3262_v9 }
 0x49e   : > { %v1671_v12 = vpop.f32.mrb[4].mxu0 }
 0x49f   : > { %v1672_v38 = vadd.f32 %v1671_v12, %v1414_v11  ;;  %v1673_v58 = vpop.f32.mrb[5].mxu0 }
 0x4a0   : > { %v1674_v55 = vadd.f32 %v1673_v58, %v1414_v11 }
 0x4a1   : > { %v3263_v15 = vmul.f32 -1.442695, %v1672_v38 }
 0x4a2   : > { %v3264_v41 = vmul.f32 -1.442695, %v1674_v55 }
 0x4a3   : > { %4868 = vpow2.f32 %v3263_v15 }
 0x4a4   : > { %v4865_v21 = vpop.eup %4864  ;;  %4870 = vpow2.f32 %v3264_v41 }
 0x4a5   : > { %v4867_v6 = vpop.eup %4866  ;;  %v1682_v27 = vadd.f32 1.0, %v4865_v21 }
 0x4a6   : > { %v1683_v54 = vadd.f32 1.0, %v4867_v6 }
 0x4a7   : > { %4872 = vrcp.f32 %v1682_v27 }
 0x4a8   : > { %4874 = vrcp.f32 %v1683_v54 }
 0x4ad   : > { %v4869_v51 = vpop.eup %4868 }
 0x4ae   : > { %v4871_v0 = vpop.eup %4870  ;;  %v1696_v57 = vadd.f32 1.0, %v4869_v51 }
 0x4af   : > { %v1697_v43 = vadd.f32 1.0, %v4871_v0 }
 0x4b0   : > { %4876 = vrcp.f32 %v1696_v57 }
 0x4b1   : > { %v4873_v3 = vpop.eup %4872  ;;  %4878 = vrcp.f32 %v1697_v43 }
 0x4b2   : > { %v4875_v60 = vpop.eup %4874  ;;  %v1688_v62 = vmul.f32 %v4873_v3, %v1180_v5 }
 0x4b3   : > { %v1689_v4 = vmul.f32 %v4875_v60, %v1182_v30 }
 0x4b4   : > { %v1727_v53 = vmul.f32 %v1688_v62, %v5014_v20  ;;  %v1721_v26 = vmul.f32 %v1688_v62, %v5021_v23  ;;  %v1734_v7 = vmul.f32 %v1688_v62, %v5024_v24  ;;  %v1740_v37 = vmul.f32 %v1688_v62, %v5042_v33 }
 0x4b5   : > { %v4118_v63 = vpack.i.bf16 %v1689_v4, %v1688_v62  ;;  %v1728_v13 = vmul.f32 %v1689_v4, %v5010_v19  ;;  %v1722_v49 = vmul.f32 %v1689_v4, %v5008_v18  ;;  %v1735_v56 = vmul.f32 %v1689_v4, %v5029_v28 }
 0x4b6   : > { %v1741_v35 = vmul.f32 %v1689_v4, %v5045_v36  ;;  %v1746_v52 = vmul.f32 %v1688_v62, %v5055_v42  ;;  %v1747_v22 = vmul.f32 %v1689_v4, %v5064_v45  ;;  %v1715_v25 = vmul.f32 %v1688_v62, %v5085_v61 }
 0x4b7   : > { %4119 = vrot.lane.b32.xlu1 %v4118_v63, %s4910_s20  ;;  %4114 = vrot.lane.b32.xlu0 %v4118_v63, %s4906_s12  ;;  %v4128_v59 = vpack.i.bf16 %v1728_v13, %v1727_v53  ;;  %v4123_v34 = vpack.i.bf16 %v1722_v49, %v1721_v26  ;;  %v4138_v2 = vpack.i.bf16 %v1735_v56, %v1734_v7  ;;  %v4100_v13 = vpop.permute.xlu0 %4099  ;;  %v4105_v56 = vpop.permute.xlu1 %4104 }
 0x4b8   : > { %v4158_v8 = vpack.i.bf16 %v1741_v35, %v1740_v37  ;;  %v1716_v46 = vmul.f32 %v1689_v4, %v5066_v47  ;;  %v4198_v39 = vpack.i.bf16 %v1747_v22, %v1746_v52 }
 0x4ba   : > { %v4877_v44 = vpop.eup %4876  ;;  %v4213_v5 = vpack.i.bf16 %v1716_v46, %v1715_v25 }
 0x4bb   : > { %v4879_v14 = vpop.eup %4878  ;;  %v1702_v30 = vmul.f32 %v4877_v44, %v1672_v38  ;;  %4129 = vrot.lane.b32.xlu0 %v4128_v59, %s4911_s21  ;;  %4124 = vrot.lane.b32.xlu1 %v4123_v34, %s4912_s22  ;;  %v5752_v49 = vpop.permute.xlu0 %4109 }
 0x4bc   : > { %v1703_v10 = vmul.f32 %v4879_v14, %v1674_v55 }
 0x4bd   : > { %v1724_v9 = vmul.f32 %v1702_v30, %v5021_v23  ;;  %v1730_v11 = vmul.f32 %v1702_v30, %v5014_v20  ;;  %v1737_v21 = vmul.f32 %v1702_v30, %v5024_v24  ;;  %v1718_v6 = vmul.f32 %v1702_v30, %v5085_v61 }
 0x4be   : > { %v4143_v12 = vpack.i.bf16 %v1703_v10, %v1702_v30  ;;  %v1725_v58 = vmul.f32 %v1703_v10, %v5008_v18  ;;  %v1731_v15 = vmul.f32 %v1703_v10, %v5010_v19  ;;  %v1719_v55 = vmul.f32 %v1703_v10, %v5066_v47 }
 0x4bf   : > { %v4153_v54 = vpack.i.bf16 %v1737_v21, %v5031_v29  ;;  %v1743_v51 = vmul.f32 %v1702_v30, %v5042_v33  ;;  %v1738_v57 = vmul.f32 %v1703_v10, %v5029_v28  ;;  %v4183_v43 = vpack.i.bf16 %v1702_v30, %v4904_v1 }
 0x4c0   : > { %4144 = vrot.lane.b32.xlu0 %v4143_v12, %s4910_s20  ;;  %4134 = vrot.lane.b32.xlu1 %v4143_v12, %s4906_s12  ;;  %v4148_v41 = vpack.i.bf16 %v1725_v58, %v1724_v9  ;;  %v4163_v38 = vpack.i.bf16 %v1731_v15, %v1730_v11  ;;  %v4223_v27 = vpack.i.bf16 %v1719_v55, %v1718_v6 }
 0x4c1   : > { %v4168_v0 = vpack.i.bf16 %v1743_v51, %v5051_v40  ;;  %v4173_v3 = vpack.i.bf16 %v5031_v29, %v1738_v57  ;;  %v1744_v60 = vmul.f32 %v1703_v10, %v5045_v36  ;;  %v4188_v4 = vpack.i.bf16 %v4904_v1, %v1703_v10 }
 0x4c2   : > { %v1750_v53 = vmul.f32 %v1703_v10, %v5064_v45  ;;  %v1749_v26 = vmul.f32 %v1702_v30, %v5055_v42 }
 0x4c3   : > { %v4193_v62 = vpack.i.bf16 %v5051_v40, %v1744_v60 }
 0x4c4   : > { %4149 = vrot.lane.b32.xlu0 %v4148_v41, %s4912_s22  ;;  %4139 = vrot.lane.b32.xlu1 %v4138_v2, %s4914_s24  ;;  %v4208_v7 = vpack.i.bf16 %v5070_v48, %v1750_v53  ;;  %v4203_v37 = vpack.i.bf16 %v1749_v26, %v5070_v48  ;;  %v4102_v41 = vunpack.i.h.bf16 %v4100_v13 }
 0x4c8   : > { %4154 = vrot.lane.b32.xlu0 %v4153_v54, %s4914_s24  ;;  %4164 = vrot.lane.b32.xlu1 %v4163_v38, %s4911_s21  ;;  %v4101_v38 = vunpack.i.l.bf16 %v4100_v13 }
 0x4cc   : > { %4159 = vrot.lane.b32.xlu0 %v4158_v8, %s4915_s25  ;;  %4169 = vrot.lane.b32.xlu1 %v4168_v0, %s4915_s25 }
 0x4d0   : > { %4184 = vrot.lane.b32.xlu0 %v4183_v43, %s4913_s23  ;;  %4174 = vrot.lane.b32.xlu1 %v4173_v3, %s4914_s24 }
 0x4d4   : > { %4194 = vrot.lane.b32.xlu0 %v4193_v62, %s4915_s25  ;;  %4179 = vrot.lane.b32.xlu1 %v4118_v63, %s4913_s23  ;;  %v4218_v63 = vpack.i.bf16 %v5075_v50, %v5075_v50 }
 0x4d8   : > { %4199 = vrot.lane.b32.xlu0 %v4198_v39, %s4916_s26  ;;  %4189 = vrot.lane.b32.xlu1 %v4188_v4, %s4913_s23 }
 0x4dc   : > { %4209 = vrot.lane.b32.xlu0 %v4208_v7, %s4916_s26  ;;  %4204 = vrot.lane.b32.xlu1 %v4203_v37, %s4916_s26  ;;  %v4107_v7 = vunpack.i.h.bf16 %v4105_v56 }
 0x4e0   : > { %4224 = vrot.lane.b32.xlu0 %v4223_v27, %s4909_s19  ;;  %4214 = vrot.lane.b32.xlu1 %v4213_v5, %s4909_s19 }
 0x4e4   : > { %4219 = vrot.lane.b32.xlu1 %v4218_v63, %s4909_s19  ;;  %v4106_v63 = vunpack.i.l.bf16 %v4105_v56 }
 0x529   : > { %v4120_v35 = vpop.permute.xlu1 %4119  ;;  %v4115_v52 = vpop.permute.xlu0 %4114 }
 0x52a   : > { %v4122_v59 = vunpack.i.h.bf16 %v4120_v35  ;;  %v4121_v34 = vunpack.i.l.bf16 %v4120_v35  ;;  %v4117_v22 = vunpack.i.h.bf16 %v4115_v52  ;;  %v4116_v2 = vunpack.i.l.bf16 %v4115_v52 }
 0x52c   : > { %v1826_v8 = vsel %vm337_vm5, %v4121_v34, %v4122_v59  ;;  %v1771_v25 = vsel %vm370_vm0, %v4116_v2, %v4117_v22  ;;  %v1770_v0 = vsel %vm370_vm0, %v4101_v38, %v4116_v2  ;;  %v4111_v2 = vunpack.i.l.bf16 %v5752_v49 }
 0x52d   : > { %v4233_v46 = vpack.i.bf16 %v4122_v59, %v1826_v8  ;;  %v4228_v39 = vpack.i.bf16 %v4117_v22, %v1771_v25  ;;  %v4130_v44 = vpop.permute.xlu0 %4129  ;;  %v4125_v5 = vpop.permute.xlu1 %4124  ;;  %v4112_v22 = vunpack.i.h.bf16 %v5752_v49 }
 0x52e   : > { %v4132_v14 = vunpack.i.h.bf16 %v4130_v44  ;;  %v4131_v30 = vunpack.i.l.bf16 %v4130_v44  ;;  %v4127_v10 = vunpack.i.h.bf16 %v4125_v5  ;;  %v4126_v9 = vunpack.i.l.bf16 %v4125_v5 }
 0x52f   : > { %4229 = vrot.lane.b32.xlu0 %v4228_v39, %s4909_s19  ;;  %4234 = vrot.lane.b32.xlu1 %v4233_v46, %s4909_s19 }
 0x530   : > { %v1815_v11 = vsel %vm447_vm6, %v4131_v30, %v4132_v14  ;;  %v1793_v12 = vsel %vm435_vm7, %v4126_v9, %v4127_v10  ;;  %v1792_v46 = vsel %vm435_vm7, %v4106_v63, %v4126_v9  ;;  %v1814_v56 = vsel %vm447_vm6, %v4111_v2, %v4131_v30 }
 0x531   : > { %v4243_v58 = vpack.i.bf16 %v4132_v14, %v1815_v11  ;;  %v4238_v15 = vpack.i.bf16 %v4127_v10, %v1793_v12 }
 0x532   : > { %v4145_v21 = vpop.permute.xlu0 %4144  ;;  %v4135_v6 = vpop.permute.xlu1 %4134 }
 0x533   : > { %v4147_v55 = vunpack.i.h.bf16 %v4145_v21  ;;  %v4146_v27 = vunpack.i.l.bf16 %v4145_v21  ;;  %v4137_v54 = vunpack.i.h.bf16 %v4135_v6  ;;  %v4136_v51 = vunpack.i.l.bf16 %v4135_v6  ;;  %4244 = vrot.lane.b32.xlu0 %v4243_v58, %s4909_s19  ;;  %4239 = vrot.lane.b32.xlu1 %v4238_v15, %s4909_s19 }
 0x535   : > { %v4248_v57 = vpack.i.bf16 %v4146_v27, %v4121_v34  ;;  %v1772_v43 = vsel %vm370_vm0, %v4102_v41, %v4136_v51  ;;  %v1773_v3 = vsel %vm370_vm0, %v4136_v51, %v4137_v54  ;;  %v1827_v53 = vsel %vm337_vm5, %v4146_v27, %v4147_v55 }
 0x536   : > { %v4150_v60 = vpop.permute.xlu0 %4149  ;;  %v5765_v62 = vpop.permute.xlu1 %4139  ;;  %v4253_v4 = vpack.i.bf16 %v1772_v43, %v1770_v0  ;;  %v4258_v37 = vpack.i.bf16 %v4137_v54, %v1773_v3  ;;  %v4263_v13 = vpack.i.bf16 %v4147_v55, %v1827_v53 }
 0x537   : > { %v4151_v26 = vunpack.i.l.bf16 %v4150_v60  ;;  %4249 = vrot.lane.b32.xlu1 %v4248_v57, %s4909_s19  ;;  %v4152_v35 = vunpack.i.h.bf16 %v4150_v60  ;;  %v4142_v30 = vunpack.i.h.bf16 %v5765_v62  ;;  %v4141_v9 = vunpack.i.l.bf16 %v5765_v62 }
 0x538   : > { %4254 = vrot.lane.b32.xlu0 %v4253_v4, %s4909_s19 }
 0x539   : > { %v1794_v52 = vsel %vm435_vm7, %v4107_v7, %v4151_v26  ;;  %v1795_v5 = vsel %vm435_vm7, %v4151_v26, %v4152_v35  ;;  %v1846_v3 = vsel %vm464_vm9, %v4141_v9, %v4142_v30 }
 0x53a   : > { %v4155_v59 = vpop.permute.xlu0 %4154  ;;  %v4165_v34 = vpop.permute.xlu1 %4164  ;;  %v4268_v44 = vpack.i.bf16 %v1794_v52, %v1792_v46  ;;  %v4278_v21 = vpack.i.bf16 %v4152_v35, %v1795_v5 }
 0x53b   : > { %v4167_v8 = vunpack.i.h.bf16 %v4165_v34  ;;  %v4166_v25 = vunpack.i.l.bf16 %v4165_v34  ;;  %4259 = vrot.lane.b32.xlu1 %v4258_v37, %s4909_s19  ;;  %v4156_v12 = vunpack.i.l.bf16 %v4155_v59  ;;  %v4157_v43 = vunpack.i.h.bf16 %v4155_v59 }
 0x53c   : > { %4264 = vrot.lane.b32.xlu0 %v4263_v13, %s4909_s19 }
 0x53d   : > { %v1816_v39 = vsel %vm447_vm6, %v4112_v22, %v4166_v25  ;;  %v1817_v14 = vsel %vm447_vm6, %v4166_v25, %v4167_v8  ;;  %v1847_v51 = vsel %vm464_vm9, %v4142_v30, %v4156_v12  ;;  %v4288_v34 = vpack.i.bf16 %v4157_v43, %v4141_v9 }
 0x53e   : > { %v4160_v10 = vpop.permute.xlu0 %4159  ;;  %v4170_v11 = vpop.permute.xlu1 %4169  ;;  %v4273_v49 = vpack.i.bf16 %v1816_v39, %v1814_v56  ;;  %v4293_v38 = vpack.i.bf16 %v4167_v8, %v1817_v14  ;;  %v4283_v7 = vpack.i.bf16 %v1847_v51, %v1846_v3 }
 0x53f   : > { %v4162_v58 = vunpack.i.h.bf16 %v4160_v10  ;;  %v4161_v15 = vunpack.i.l.bf16 %v4160_v10  ;;  %v4171_v41 = vunpack.i.l.bf16 %v4170_v11  ;;  %4269 = vrot.lane.b32.xlu1 %v4268_v44, %s4909_s19  ;;  %v4172_v13 = vunpack.i.h.bf16 %v4170_v11 }
 0x540   : > { %4274 = vrot.lane.b32.xlu0 %v4273_v49, %s4909_s19 }
 0x541   : > { %v1868_v6 = vsel %vm476_vm10, %v4161_v15, %v4162_v58  ;;  %v1869_v55 = vsel %vm476_vm10, %v4162_v58, %v4171_v41  ;;  %v4308_v5 = vpack.i.bf16 %v4172_v13, %v4161_v15 }
 0x542   : > { %v5786_v27 = vpop.permute.xlu0 %4184  ;;  %v4175_v54 = vpop.permute.xlu1 %4174  ;;  %v4298_v60 = vpack.i.bf16 %v1869_v55, %v1868_v6 }
 0x543   : > { %v4177_v0 = vunpack.i.h.bf16 %v4175_v54  ;;  %v4176_v57 = vunpack.i.l.bf16 %v4175_v54  ;;  %4294 = vrot.lane.b32.xlu1 %v4293_v38, %s4909_s19  ;;  %v4186_v35 = vunpack.i.l.bf16 %v5786_v27  ;;  %v4187_v44 = vunpack.i.h.bf16 %v5786_v27 }
 0x544   : > { %4279 = vrot.lane.b32.xlu0 %v4278_v21, %s4909_s19 }
 0x545   : > { %v1848_v62 = vsel %vm464_vm9, %v4157_v43, %v4176_v57  ;;  %v1849_v4 = vsel %vm464_vm9, %v4176_v57, %v4177_v0 }
 0x546   : > { %v4195_v53 = vpop.permute.xlu0 %4194  ;;  %v4180_v26 = vpop.permute.xlu1 %4179  ;;  %v4303_v59 = vpack.i.bf16 %v1849_v4, %v1848_v62 }
 0x547   : > { %v4182_v37 = vunpack.i.h.bf16 %v4180_v26  ;;  %v4181_v63 = vunpack.i.l.bf16 %v4180_v26  ;;  %4299 = vrot.lane.b32.xlu1 %v4298_v60, %s4909_s19  ;;  %v4196_v52 = vunpack.i.l.bf16 %v4195_v53  ;;  %v4197_v22 = vunpack.i.h.bf16 %v4195_v53 }
 0x548   : > { %4284 = vrot.lane.b32.xlu0 %v4283_v7, %s4909_s19  ;;  %v1913_v7 = vld [vmem:[%s6483_s3 + $0x8] sm:$0xff] }
 0x549   : > { %v1887_v25 = vsel %vm486_vm8, %v4182_v37, %v4186_v35  ;;  %v1886_v46 = vsel %vm486_vm8, %v4181_v63, %v4182_v37  ;;  %v1870_v14 = vsel %vm476_vm10, %v4172_v13, %v4196_v52  ;;  %v1871_v10 = vsel %vm476_vm10, %v4196_v52, %v4197_v22  ;;  %3265 = vmatprep.mubr.msk.f32.mxu1 %vm1109_vm13, %v1913_v7 }
 0x54a   : > { %v4200_v2 = vpop.permute.xlu0 %4199  ;;  %v4190_v8 = vpop.permute.xlu1 %4189  ;;  %v4313_v41 = vpack.i.bf16 %v1887_v25, %v1886_v46  ;;  %v4323_v15 = vpack.i.bf16 %v1871_v10, %v1870_v14  ;;  %v4328_v37 = vpack.i.bf16 %v4187_v44, %v4181_v63 }
 0x54b   : > { %v4192_v56 = vunpack.i.h.bf16 %v4190_v8  ;;  %v4191_v39 = vunpack.i.l.bf16 %v4190_v8  ;;  %4304 = vrot.lane.b32.xlu1 %v4303_v59, %s4909_s19  ;;  %v4202_v9 = vunpack.i.h.bf16 %v4200_v2  ;;  %v4201_v38 = vunpack.i.l.bf16 %v4200_v2 }
 0x54c   : > { %4289 = vrot.lane.b32.xlu0 %v4288_v34, %s4909_s19 }
 0x54d   : > { %v1888_v11 = vsel %vm486_vm8, %v4187_v44, %v4191_v39  ;;  %v1889_v49 = vsel %vm486_vm8, %v4191_v39, %v4192_v56  ;;  %v1908_v62 = vsel %vm498_vm11, %v4201_v38, %v4202_v9  ;;  %v1917_v56 = vld [vmem:[%s6485_s5 + $0x8] sm:$0xff]  ;;  %v1916_v39 = vld [vmem:[%s6485_s5] sm:$0xff] }
 0x54e   : > { %v4210_v12 = vpop.permute.xlu0 %4209  ;;  %v4205_v58 = vpop.permute.xlu1 %4204  ;;  %v4318_v21 = vpack.i.bf16 %v1889_v49, %v1888_v11 }
 0x54f   : > { %v4206_v30 = vunpack.i.l.bf16 %v4205_v58  ;;  %4309 = vrot.lane.b32.xlu1 %v4308_v5, %s4909_s19  ;;  %v4212_v6 = vunpack.i.h.bf16 %v4210_v12  ;;  %v4211_v55 = vunpack.i.l.bf16 %v4210_v12  ;;  %v4207_v27 = vunpack.i.h.bf16 %v4205_v58 }
 0x550   : > { %4314 = vrot.lane.b32.xlu0 %v4313_v41, %s4909_s19 }
 0x551   : > { %v1909_v54 = vsel %vm498_vm11, %v4202_v9, %v4206_v30  ;;  %v1911_v52 = vsel %vm498_vm11, %v4211_v55, %v4212_v6  ;;  %v1910_v59 = vsel %vm498_vm11, %v4207_v27, %v4211_v55  ;;  %v4343_v2 = vpack.i.bf16 %v4207_v27, %v4201_v38 }
 0x552   : > { %v4225_v51 = vpop.permute.xlu0 %4224  ;;  %v4215_v0 = vpop.permute.xlu1 %4214  ;;  %v4333_v4 = vpack.i.bf16 %v1909_v54, %v1908_v62  ;;  %v4338_v25 = vpack.i.bf16 %v1911_v52, %v1910_v59 }
 0x553   : > { %v4227_v57 = vunpack.i.h.bf16 %v4225_v51  ;;  %v4226_v43 = vunpack.i.l.bf16 %v4225_v51  ;;  %v4217_v3 = vunpack.i.h.bf16 %v4215_v0  ;;  %v4216_v60 = vunpack.i.l.bf16 %v4215_v0  ;;  %4319 = vrot.lane.b32.xlu1 %v4318_v21, %s4909_s19 }
 0x554   : > { %4324 = vrot.lane.b32.xlu0 %v4323_v15, %s4909_s19 }
 0x555   : > { %v2043_v53 = vsel %vm407_vm4, %v4216_v60, %v4217_v3  ;;  %v2045_v26 = vsel %vm407_vm4, %v4226_v43, %v4227_v57 }
 0x556   : > { %v4220_v13 = vpop.permute.xlu1 %4219  ;;  %v3371_v35 = vpack.c.bf16 %v2045_v26, %v2043_v53 }
 0x557   : > { %v4222_v34 = vunpack.i.h.bf16 %v4220_v13  ;;  %v4221_v22 = vunpack.i.l.bf16 %v4220_v13  ;;  %4334 = vrot.lane.b32.xlu1 %v4333_v4, %s4909_s19 }
 0x558   : > { %4329 = vrot.lane.b32.xlu0 %v4328_v37, %s4909_s19  ;;  %3372 = vmatprep.subr.bf16.mxu1 %v3371_v35 }
 0x559   : > { %v2044_v8 = vsel %vm407_vm4, %v4222_v34, %v4226_v43  ;;  %v2042_v63 = vsel %vm407_vm4, %v4221_v22, %v4216_v60 }
 0x55a   : > { %v3373_v46 = vpack.c.bf16 %v2044_v8, %v2042_v63 }
 0x55b   : > { %4344 = vrot.lane.b32.xlu1 %v4343_v2, %s4909_s19 }
 0x55c   : > { %4339 = vrot.lane.b32.xlu0 %v4338_v25, %s4909_s19  ;;  %3374 = vmatpush1.bf16.msra.mxu1 %v3373_v46 }
 0x55f   : > { %1925 = vperm.xlu1 %3596, %v1917_v56  }
 0x560   : > { %1920 = vperm.xlu0 %3597, %v1916_v39  }
 0x563   : > { %4349 = vrot.lane.b32.xlu1 %v4904_v1, %s4906_s12 }
 0x564   : > { %4354 = vrot.lane.b32.xlu0 %v5139_v32, %s4912_s22 }
 0x567   : > { %4359 = vrot.lane.b32.xlu1 %v5133_v31, %s4911_s21 }
 0x5a1   : > { %v4230_v44 = vpop.permute.xlu0 %4229  ;;  %v5838_v5 = vpop.permute.xlu1 %4234 }
 0x5a2   : > { %v4232_v12 = vunpack.i.h.bf16 %v4230_v44  ;;  %v4231_v58 = vunpack.i.l.bf16 %v4230_v44  ;;  %v4237_v3 = vunpack.i.h.bf16 %v5838_v5  ;;  %v4236_v60 = vunpack.i.l.bf16 %v5838_v5 }
 0x5a4   : > { %v2047_v6 = vsel %vm407_vm4, %v4231_v58, %v4232_v12 }
 0x5a5   : > { %v4245_v14 = vpop.permute.xlu0 %4244  ;;  %v4240_v10 = vpop.permute.xlu1 %4239 }
 0x5a6   : > { %v4242_v57 = vunpack.i.h.bf16 %v4240_v10  ;;  %v4241_v43 = vunpack.i.l.bf16 %v4240_v10  ;;  %v4247_v53 = vunpack.i.h.bf16 %v4245_v14  ;;  %v4246_v26 = vunpack.i.l.bf16 %v4245_v14 }
 0x5a8   : > { %v2051_v34 = vsel %vm407_vm4, %v4241_v43, %v4242_v57  ;;  %v2055_v12 = vsel %vm407_vm4, %v4246_v26, %v4247_v53 }
 0x5a9   : > { %v5840_v11 = vpop.permute.xlu1 %4249 }
 0x5aa   : > { %v4255_v49 = vpop.permute.xlu0 %4254 }
 0x5ab   : > { %v4256_v41 = vunpack.i.l.bf16 %v4255_v49  ;;  %v4257_v9 = vunpack.i.h.bf16 %v4255_v49 }
 0x5ad   : > { %v4260_v30 = vpop.permute.xlu1 %4259  ;;  %v2046_v32 = vsel %vm407_vm4, %v4256_v41, %v4231_v58  ;;  %v4252_v41 = vunpack.i.h.bf16 %v5840_v11 }
 0x5ae   : > { %v4262_v38 = vunpack.i.h.bf16 %v4260_v30  ;;  %v4261_v21 = vunpack.i.l.bf16 %v4260_v30  ;;  %v4265_v15 = vpop.permute.xlu0 %4264 }
 0x5af   : > { %v4267_v22 = vunpack.i.h.bf16 %v4265_v15  ;;  %v4266_v2 = vunpack.i.l.bf16 %v4265_v15  ;;  %v4251_v15 = vunpack.i.l.bf16 %v5840_v11 }
 0x5b0   : > { %v2048_v31 = vsel %vm407_vm4, %v4257_v9, %v4261_v21  ;;  %v2049_v55 = vsel %vm407_vm4, %v4261_v21, %v4262_v38  ;;  %v2059_v38 = vsel %vm407_vm4, %v4236_v60, %v4237_v3 }
 0x5b1   : > { %v4270_v27 = vpop.permute.xlu1 %4269  ;;  %v3375_v54 = vpack.c.bf16 %v2049_v55, %v2047_v6  ;;  %v3377_v51 = vpack.c.bf16 %v2048_v31, %v2046_v32  ;;  %v2061_v21 = vsel %vm407_vm4, %v4266_v2, %v4267_v22  ;;  %v2060_v57 = vsel %vm407_vm4, %v4252_v41, %v4266_v2 }
 0x5b2   : > { %v4275_v0 = vpop.permute.xlu0 %4274  ;;  %v4271_v62 = vunpack.i.l.bf16 %v4270_v27  ;;  %v4272_v35 = vunpack.i.h.bf16 %v4270_v27 }
 0x5b3   : > { %3376 = vmatprep.subr.bf16.mxu1 %v3375_v54  ;;  %v4277_v8 = vunpack.i.h.bf16 %v4275_v0  ;;  %v4276_v63 = vunpack.i.l.bf16 %v4275_v0 }
 0x5b4   : > { %3378 = vmatpush1.bf16.msra.mxu1 %v3377_v51  ;;  %v2050_v25 = vsel %vm407_vm4, %v4271_v62, %v4241_v43  ;;  %v3387_v43 = vpack.c.bf16 %v2061_v21, %v2059_v38 }
 0x5b5   : > { %v4295_v4 = vpop.permute.xlu1 %4294  ;;  %v2054_v30 = vsel %vm407_vm4, %v4276_v63, %v4246_v26 }
 0x5b6   : > { %v4297_v7 = vunpack.i.h.bf16 %v4295_v4  ;;  %v4296_v37 = vunpack.i.l.bf16 %v4295_v4  ;;  %v4280_v13 = vpop.permute.xlu0 %4279  ;;  %v2058_v4 = vsel %vm407_vm4, %v4251_v15, %v4236_v60 }
 0x5b7   : > { %v4282_v52 = vunpack.i.h.bf16 %v4280_v13  ;;  %v4281_v59 = vunpack.i.l.bf16 %v4280_v13 }
 0x5b8   : > { %v2057_v44 = vsel %vm407_vm4, %v4296_v37, %v4297_v7  ;;  %v2056_v49 = vsel %vm407_vm4, %v4277_v8, %v4296_v37  ;;  %v3389_v7 = vpack.c.bf16 %v2060_v57, %v2058_v4 }
 0x5b9   : > { %v2052_v46 = vsel %vm407_vm4, %v4272_v35, %v4281_v59  ;;  %v4300_v56 = vpop.permute.xlu1 %4299  ;;  %v2053_v39 = vsel %vm407_vm4, %v4281_v59, %v4282_v52  ;;  %v3383_v58 = vpack.c.bf16 %v2057_v44, %v2055_v12  ;;  %v3385_v55 = vpack.c.bf16 %v2056_v49, %v2054_v30 }
 0x5ba   : > { %v4285_v5 = vpop.permute.xlu0 %4284  ;;  %v3379_v14 = vpack.c.bf16 %v2053_v39, %v2051_v34  ;;  %v3381_v10 = vpack.c.bf16 %v2052_v46, %v2050_v25  ;;  %v4302_v13 = vunpack.i.h.bf16 %v4300_v56  ;;  %v4301_v35 = vunpack.i.l.bf16 %v4300_v56 }
 0x5bb   : > { %v4287_v27 = vunpack.i.h.bf16 %v4285_v5  ;;  %v4286_v54 = vunpack.i.l.bf16 %v4285_v5 }
 0x5bc   : > { %3380 = vmatprep.subr.bf16.mxu1 %v3379_v14  ;;  %v2067_v5 = vsel %vm407_vm4, %v4301_v35, %v4302_v13  ;;  %v1915_v13 = vld [vmem:[%s6483_s3 + $0x18] sm:$0xff] }
 0x5bd   : > { %v4305_v9 = vpop.permute.xlu1 %4304  ;;  %3382 = vmatpush1.bf16.msra.mxu1 %v3381_v10  ;;  %v2063_v37 = vsel %vm407_vm4, %v4286_v54, %v4287_v27 }
 0x5be   : > { %v4307_v32 = vunpack.i.h.bf16 %v4305_v9  ;;  %v4306_v31 = vunpack.i.l.bf16 %v4305_v9  ;;  %v4290_v6 = vpop.permute.xlu0 %4289  ;;  %3384 = vmatprep.subr.bf16.mxu1 %v3383_v58 }
 0x5bf   : > { %v4292_v51 = vunpack.i.h.bf16 %v4290_v6  ;;  %v4291_v0 = vunpack.i.l.bf16 %v4290_v6 }
 0x5c0   : > { %v2065_v3 = vsel %vm407_vm4, %v4306_v31, %v4307_v32 }
 0x5c1   : > { %v4310_v62 = vpop.permute.xlu1 %4309  ;;  %3386 = vmatpush1.bf16.msra.mxu1 %v3385_v55  ;;  %v2062_v11 = vsel %vm407_vm4, %v4291_v0, %v4286_v54  ;;  %v2064_v26 = vsel %vm407_vm4, %v4292_v51, %v4306_v31  ;;  %v3391_v52 = vpack.c.bf16 %v2065_v3, %v2063_v37  ;;  %v1912_v37 = vld [vmem:[%s6483_s3] sm:$0xff] }
 0x5c2   : > { %v4315_v53 = vpop.permute.xlu0 %4314  ;;  %3388 = vmatprep.subr.bf16.mxu1 %v3387_v43  ;;  %v4311_v59 = vunpack.i.l.bf16 %v4310_v62  ;;  %v4312_v22 = vunpack.i.h.bf16 %v4310_v62  ;;  %v3393_v60 = vpack.c.bf16 %v2064_v26, %v2062_v11 }
 0x5c3   : > { %v4317_v25 = vunpack.i.h.bf16 %v4315_v53  ;;  %v4316_v46 = vunpack.i.l.bf16 %v4315_v53 }
 0x5c4   : > { %v2066_v14 = vsel %vm407_vm4, %v4311_v59, %v4301_v35  ;;  %v1914_v35 = vld [vmem:[%s6483_s3 + $0x10] sm:$0xff] }
 0x5c5   : > { %v4320_v34 = vpop.permute.xlu1 %4319  ;;  %3390 = vmatpush1.bf16.msra.mxu1 %v3389_v7  ;;  %v2071_v21 = vsel %vm407_vm4, %v4316_v46, %v4317_v25 }
 0x5c6   : > { %v4322_v2 = vunpack.i.h.bf16 %v4320_v34  ;;  %v4321_v8 = vunpack.i.l.bf16 %v4320_v34  ;;  %v4325_v63 = vpop.permute.xlu0 %4324  ;;  %3392 = vmatprep.subr.bf16.mxu1 %v3391_v52 }
 0x5c7   : > { %v4327_v39 = vunpack.i.h.bf16 %v4325_v63  ;;  %v4326_v44 = vunpack.i.l.bf16 %v4325_v63 }
 0x5c8   : > { %v2073_v12 = vsel %vm407_vm4, %v4321_v8, %v4322_v2 }
 0x5c9   : > { %v2068_v56 = vsel %vm407_vm4, %v4312_v22, %v4326_v44  ;;  %v4335_v10 = vpop.permute.xlu1 %4334  ;;  %3394 = vmatpush1.bf16.msra.mxu1 %v3393_v60  ;;  %v2069_v49 = vsel %vm407_vm4, %v4326_v44, %v4327_v39  ;;  %v3399_v15 = vpack.c.bf16 %v2073_v12, %v2071_v21 }
 0x5ca   : > { %v4330_v58 = vpop.permute.xlu0 %4329  ;;  %v3395_v41 = vpack.c.bf16 %v2069_v49, %v2067_v5  ;;  %v3397_v30 = vpack.c.bf16 %v2068_v56, %v2066_v14  ;;  %v4337_v32 = vunpack.i.h.bf16 %v4335_v10  ;;  %v4336_v31 = vunpack.i.l.bf16 %v4335_v10 }
 0x5cb   : > { %v4332_v9 = vunpack.i.h.bf16 %v4330_v58  ;;  %v4331_v38 = vunpack.i.l.bf16 %v4330_v58 }
 0x5cc   : > { %3396 = vmatprep.subr.bf16.mxu1 %v3395_v41  ;;  %v2075_v53 = vsel %vm407_vm4, %v4336_v31, %v4337_v32 }
 0x5cd   : > { %v2070_v6 = vsel %vm407_vm4, %v4331_v38, %v4316_v46  ;;  %v2072_v55 = vsel %vm407_vm4, %v4332_v9, %v4321_v8  ;;  %v4345_v27 = vpop.permute.xlu1 %4344  ;;  %3398 = vmatpush1.bf16.msra.mxu1 %v3397_v30 }
 0x5ce   : > { %v4347_v54 = vunpack.i.h.bf16 %v4345_v27  ;;  %v4346_v51 = vunpack.i.l.bf16 %v4345_v27  ;;  %v4340_v0 = vpop.permute.xlu0 %4339  ;;  %3400 = vmatprep.subr.bf16.mxu1 %v3399_v15  ;;  %v3401_v57 = vpack.c.bf16 %v2072_v55, %v2070_v6 }
 0x5cf   : > { %v4342_v43 = vunpack.i.h.bf16 %v4340_v0  ;;  %v4341_v62 = vunpack.i.l.bf16 %v4340_v0 }
 0x5d0   : > { %v2074_v3 = vsel %vm407_vm4, %v4346_v51, %v4336_v31 }
 0x5d1   : > { %v2076_v4 = vsel %vm407_vm4, %v4347_v54, %v4341_v62  ;;  %3402 = vmatpush1.bf16.msra.mxu1 %v3401_v57  ;;  %v2077_v11 = vsel %vm407_vm4, %v4341_v62, %v4342_v43 }
 0x5d2   : > { %v3403_v26 = vpack.c.bf16 %v2077_v11, %v2075_v53  ;;  %v3405_v7 = vpack.c.bf16 %v2076_v4, %v2074_v3 }
 0x5d4   : > { %3404 = vmatprep.subr.bf16.mxu1 %v3403_v26 }
 0x5d5   : > { %3406 = vmatpush1.bf16.msra.mxu1 %v3405_v7 }
 0x5d8   : > { %2185 = vmatmul.mubr.f32.vlgmr.msra.gmra.mrb[2].mxu1 %v1912_v37 }
 0x5d9   : > { %3266 = vmatprep.mubr.msk.f32.mxu1 %vm1109_vm13, %v1915_v13 }
 0x5dc   : > { %2191 = vmatmul.mubr.f32.gmra.mrb[4].mxu1 %v1914_v35 }
 0x5de   : > { %v1926_v25 = vpop.permute.xlu1 %1925 }
 0x5df   : > { %v1921_v52 = vpop.permute.xlu0 %1920 }
 0x6ab   : > { %v2186_v59 = vpop.f32.mrb[2].mxu1 }
 0x6ac   : > { %v5888_v34 = vadd.f32 %v2186_v59, %v1921_v52  ;;  %v2188_v22 = vpop.f32.mrb[3].mxu1 }
 0x6ad   : > { %v5890_v2 = vadd.f32 %v2188_v22, %v1921_v52 }
 0x6ae   : > { %v3267_v8 = vmul.f32 -1.442695, %v5888_v34  ;;  %v4363_v63 = vpack.i.bf16 %v5888_v34, %v4904_v1  ;;  %v2212_v60 = vmul.f32 %v5888_v34, %v5024_v24  ;;  %v2215_v10 = vmul.f32 %v5888_v34, %v5042_v33 }
 0x6af   : > { %v3268_v46 = vmul.f32 -1.442695, %v5890_v2  ;;  %v2192_v39 = vpop.f32.mrb[4].mxu1  ;;  %v4373_v44 = vpack.i.bf16 %v5890_v2, %v5888_v34  ;;  %v2213_v5 = vmul.f32 %v5890_v2, %v5029_v28  ;;  %v2216_v58 = vmul.f32 %v5890_v2, %v5045_v36 }
 0x6b0   : > { %4880 = vpow2.f32 %v3267_v8  ;;  %v5902_v14 = vadd.f32 %v2192_v39, %v1926_v25  ;;  %v2194_v56 = vpop.f32.mrb[5].mxu1  ;;  %4364 = vrot.lane.b32.xlu0 %v4363_v63, %s4906_s12  ;;  %v2206_v30 = vmul.f32 %v5888_v34, %v5021_v23  ;;  %v2218_v38 = vmul.f32 %v5888_v34, %v5055_v42 }
 0x6b1   : > { %4882 = vpow2.f32 %v3268_v46  ;;  %v5907_v49 = vadd.f32 %v2194_v56, %v1926_v25  ;;  %4374 = vrot.lane.b32.xlu1 %v4373_v44, %s4913_s23  ;;  %v4388_v12 = vpack.i.bf16 %v2213_v5, %v2212_v60  ;;  %v4393_v15 = vpack.i.bf16 %v2216_v58, %v2215_v10 }
 0x6b2   : > { %v3273_v41 = vmul.f32 -1.442695, %v5902_v14  ;;  %v4408_v9 = vpack.i.bf16 %v5902_v14, %v5890_v2  ;;  %v2219_v32 = vmul.f32 %v5890_v2, %v5064_v45  ;;  %v2203_v31 = vmul.f32 %v5888_v34, %v5085_v61 }
 0x6b3   : > { %v3274_v21 = vmul.f32 -1.442695, %v5907_v49  ;;  %v2204_v6 = vmul.f32 %v5890_v2, %v5066_v47  ;;  %v4423_v27 = vpack.i.bf16 %v5907_v49, %v5902_v14  ;;  %v4378_v54 = vpack.i.bf16 %v2206_v30, %v5000_v16 }
 0x6b4   : > { %4884 = vpow2.f32 %v3273_v41  ;;  %4369 = vrot.lane.b32.xlu0 %v4373_v44, %s4910_s20  ;;  %v4398_v55 = vpack.i.bf16 %v2219_v32, %v2218_v38  ;;  %v2209_v51 = vmul.f32 %v5888_v34, %v5014_v20  ;;  %v2207_v57 = vmul.f32 %v5890_v2, %v5008_v18 }
 0x6b5   : > { %4886 = vpow2.f32 %v3274_v21  ;;  %4389 = vrot.lane.b32.xlu1 %v4388_v12, %s4914_s24  ;;  %v4403_v0 = vpack.i.bf16 %v2204_v6, %v2203_v31  ;;  %v2698_v43 = vmul.f32 %v5902_v14, %v5021_v23  ;;  %v5939_v62 = vmul.f32 %v5890_v2, %v5010_v19 }
 0x6b6   : > { %v5943_v3 = vmul.f32 %v5902_v14, %v5014_v20  ;;  %v4383_v26 = vpack.i.bf16 %v2209_v51, %v5002_v17  ;;  %v5952_v13 = vmul.f32 %v5902_v14, %v5085_v61  ;;  %v5957_v52 = vmul.f32 %v5907_v49, %v5066_v47 }
 0x6b7   : > { %v4433_v4 = vpack.i.bf16 %v2698_v43, %v2207_v57  ;;  %v4413_v63 = vpack.i.bf16 %v5902_v14, %v4904_v1  ;;  %v2704_v46 = vmul.f32 %v5902_v14, %v5024_v24  ;;  %v4418_v39 = vpack.i.bf16 %v4904_v1, %v5907_v49 }
 0x6b8   : > { %4379 = vrot.lane.b32.xlu0 %v4378_v54, %s4912_s22  ;;  %v4438_v53 = vpack.i.bf16 %v5943_v3, %v5939_v62  ;;  %v4483_v22 = vpack.i.bf16 %v5957_v52, %v5952_v13  ;;  %v2707_v12 = vmul.f32 %v5902_v14, %v5042_v33  ;;  %v2702_v43 = vmul.f32 %v5907_v49, %v5010_v19 }
 0x6b9   : > { %4394 = vrot.lane.b32.xlu1 %v4393_v15, %s4915_s25  ;;  %v4443_v10 = vpack.i.bf16 %v2704_v46, %v5031_v29  ;;  %v2699_v46 = vmul.f32 %v5907_v49, %v5008_v18 }
 0x6ba   : > { %v4881_v11 = vpop.eup %4880  ;;  %v4448_v57 = vpack.i.bf16 %v2707_v12, %v5051_v40 }
 0x6bb   : > { %v4883_v7 = vpop.eup %4882  ;;  %v2307_v37 = vadd.f32 1.0, %v4881_v11 }
 0x6bc   : > { %4384 = vrot.lane.b32.xlu0 %v4383_v26, %s4911_s21  ;;  %v2308_v35 = vadd.f32 1.0, %v4883_v7  ;;  %v2710_v7 = vmul.f32 %v5902_v14, %v5055_v42 }
 0x6bd   : > { %4409 = vrot.lane.b32.xlu1 %v4408_v9, %s4906_s12  ;;  %4888 = vrcp.f32 %v2307_v37 }
 0x6be   : > { %v4885_v59 = vpop.eup %4884  ;;  %4890 = vrcp.f32 %v2308_v35 }
 0x6bf   : > { %v4887_v8 = vpop.eup %4886  ;;  %v2799_v60 = vadd.f32 1.0, %v4885_v59 }
 0x6c0   : > { %4399 = vrot.lane.b32.xlu0 %v4398_v55, %s4916_s26  ;;  %v2800_v25 = vadd.f32 1.0, %v4887_v8 }
 0x6c1   : > { %4414 = vrot.lane.b32.xlu1 %v4413_v63, %s4913_s23  ;;  %4892 = vrcp.f32 %v2799_v60 }
 0x6c2   : > { %4894 = vrcp.f32 %v2800_v25  ;;  %v4463_v25 = vpack.i.bf16 %v5002_v17, %v2702_v43 }
 0x6c4   : > { %4404 = vrot.lane.b32.xlu0 %v4403_v0, %s4909_s19 }
 0x6c5   : > { %4424 = vrot.lane.b32.xlu1 %v4423_v27, %s4910_s20 }
 0x6c7   : > { %v4889_v44 = vpop.eup %4888 }
 0x6c8   : > { %v4891_v5 = vpop.eup %4890  ;;  %4419 = vrot.lane.b32.xlu0 %v4418_v39, %s4906_s12  ;;  %v2313_v56 = vmul.f32 %v4889_v44, %v5888_v34 }
 0x6c9   : > { %4429 = vrot.lane.b32.xlu1 %v4418_v39, %s4913_s23  ;;  %v2314_v58 = vmul.f32 %v4891_v5, %v5890_v2 }
 0x6ca   : > { %v2327_v41 = vmul.f32 %v2313_v56, %v5014_v20  ;;  %v2321_v30 = vmul.f32 %v2313_v56, %v5085_v61  ;;  %v5982_v9 = vmul.f32 %v2313_v56, %v5021_v23  ;;  %v5985_v38 = vmul.f32 %v2313_v56, %v5024_v24 }
 0x6cb   : > { %v4893_v34 = vpop.eup %4892  ;;  %v4488_v21 = vpack.i.bf16 %v2314_v58, %v2313_v56  ;;  %v2328_v15 = vmul.f32 %v2314_v58, %v5010_v19  ;;  %v2322_v32 = vmul.f32 %v2314_v58, %v5066_v47  ;;  %v2325_v6 = vmul.f32 %v2314_v58, %v5008_v18 }
 0x6cc   : > { %v4895_v31 = vpop.eup %4894  ;;  %4444 = vrot.lane.b32.xlu0 %v4443_v10, %s4914_s24  ;;  %v2805_v2 = vmul.f32 %v4893_v34, %v5902_v14  ;;  %v2331_v55 = vmul.f32 %v2314_v58, %v5029_v28  ;;  %v2333_v0 = vmul.f32 %v2313_v56, %v5042_v33  ;;  %v2334_v37 = vmul.f32 %v2314_v58, %v5045_v36 }
 0x6cd   : > { %4434 = vrot.lane.b32.xlu1 %v4433_v4, %s4912_s22  ;;  %v4508_v27 = vpack.i.bf16 %v2328_v15, %v2327_v41  ;;  %v4528_v54 = vpack.i.bf16 %v2322_v32, %v2321_v30  ;;  %v5995_v51 = vmul.f32 %v4895_v31, %v5907_v49  ;;  %v4503_v11 = vpack.i.bf16 %v2325_v6, %v5982_v9 }
 0x6ce   : > { %v4513_v26 = vpack.i.bf16 %v2331_v55, %v5985_v38  ;;  %v2336_v35 = vmul.f32 %v2313_v56, %v5055_v42  ;;  %v2337_v59 = vmul.f32 %v2314_v58, %v5064_v45  ;;  %v2819_v8 = vmul.f32 %v2805_v2, %v5014_v20 }
 0x6cf   : > { %v4538_v4 = vpack.i.bf16 %v5995_v51, %v2805_v2  ;;  %v2705_v14 = vmul.f32 %v5907_v49, %v5029_v28  ;;  %v4518_v63 = vpack.i.bf16 %v2334_v37, %v2333_v0  ;;  %v2820_v60 = vmul.f32 %v5995_v51, %v5010_v19 }
 0x6d0   : > { %4449 = vrot.lane.b32.xlu0 %v4448_v57, %s4915_s25  ;;  %v4523_v39 = vpack.i.bf16 %v2337_v59, %v2336_v35  ;;  %v4453_v20 = vpack.i.bf16 %v2710_v7, %v5070_v48  ;;  %v2816_v5 = vmul.f32 %v2805_v2, %v5021_v23  ;;  %v2817_v62 = vmul.f32 %v5995_v51, %v5008_v18 }
 0x6d1   : > { %4439 = vrot.lane.b32.xlu1 %v4438_v53, %s4911_s21  ;;  %v4573_v44 = vpack.i.bf16 %v2820_v60, %v2819_v8  ;;  %v2813_v3 = vmul.f32 %v2805_v2, %v5085_v61  ;;  %v2814_v19 = vmul.f32 %v5995_v51, %v5066_v47  ;;  %v4468_v53 = vpack.i.bf16 %v5031_v29, %v2705_v14 }
 0x6d2   : > { %v4568_v17 = vpack.i.bf16 %v2817_v62, %v2816_v5  ;;  %v2708_v56 = vmul.f32 %v5907_v49, %v5045_v36  ;;  %v4458_v23 = vpack.i.bf16 %v5000_v16, %v2699_v46  ;;  %v2711_v47 = vmul.f32 %v5907_v49, %v5064_v45 }
 0x6d3   : > { %v4593_v10 = vpack.i.bf16 %v2814_v19, %v2813_v3  ;;  %v4533_v16 = vpack.i.bf16 %v2805_v2, %v4904_v1  ;;  %v2822_v49 = vmul.f32 %v2805_v2, %v5024_v24  ;;  %v2825_v58 = vmul.f32 %v2805_v2, %v5042_v33 }
 0x6d4   : > { %4464 = vrot.lane.b32.xlu0 %v4463_v25, %s4911_s21  ;;  %v4473_v18 = vpack.i.bf16 %v5051_v40, %v2708_v56  ;;  %v4478_v61 = vpack.i.bf16 %v5070_v48, %v2711_v47  ;;  %v2828_v52 = vmul.f32 %v2805_v2, %v5055_v42  ;;  %v2826_v33 = vmul.f32 %v5995_v51, %v5045_v36 }
 0x6d5   : > { %4454 = vrot.lane.b32.xlu1 %v4453_v20, %s4916_s26  ;;  %v4553_v12 = vpack.i.bf16 %v2822_v49, %v5031_v29  ;;  %v4558_v13 = vpack.i.bf16 %v2825_v58, %v5051_v40  ;;  %v2829_v42 = vmul.f32 %v5995_v51, %v5064_v45  ;;  %v4548_v41 = vpack.i.bf16 %v4904_v1, %v5995_v51  ;;  %v6087_v45 = vpop.permute.xlu1 %4349  ;;  %v6089_v1 = vpop.permute.xlu0 %4354 }
 0x6d6   : > { %v4563_v24 = vpack.i.bf16 %v2828_v52, %v5070_v48  ;;  %v2823_v36 = vmul.f32 %v5995_v51, %v5029_v28 }
 0x6d7   : > { %v4588_v30 = vpack.i.bf16 %v5070_v48, %v2829_v42 }
 0x6d8   : > { %4469 = vrot.lane.b32.xlu0 %v4468_v53, %s4914_s24 }
 0x6d9   : > { %4459 = vrot.lane.b32.xlu1 %v4458_v23, %s4912_s22  ;;  %v6091_v48 = vpop.permute.xlu1 %4359 }
 0x6dc   : > { %4474 = vrot.lane.b32.xlu0 %v4473_v18, %s4915_s25 }
 0x6dd   : > { %4489 = vrot.lane.b32.xlu1 %v4488_v21, %s4906_s12 }
 0x6e0   : > { %4479 = vrot.lane.b32.xlu0 %v4478_v61, %s4916_s26 }
 0x6e1   : > { %4509 = vrot.lane.b32.xlu1 %v4508_v27, %s4911_s21 }
 0x6e4   : > { %4484 = vrot.lane.b32.xlu0 %v4483_v22, %s4909_s19  ;;  %v4583_v22 = vpack.i.bf16 %v5051_v40, %v2826_v33  ;;  %v4578_v40 = vpack.i.bf16 %v5031_v29, %v2823_v36 }
 0x6e5   : > { %4529 = vrot.lane.b32.xlu1 %v4528_v54, %s4909_s19 }
 0x6e8   : > { %4494 = vrot.lane.b32.xlu0 %v4488_v21, %s4910_s20 }
 0x6e9   : > { %4534 = vrot.lane.b32.xlu1 %v4533_v16, %s4913_s23 }
 0x6ec   : > { %4499 = vrot.lane.b32.xlu0 %v4488_v21, %s4913_s23 }
 0x6ed   : > { %4539 = vrot.lane.b32.xlu1 %v4538_v4, %s4906_s12 }
 0x6f0   : > { %4504 = vrot.lane.b32.xlu0 %v4503_v11, %s4912_s22 }
 0x6f1   : > { %4554 = vrot.lane.b32.xlu1 %v4553_v12, %s4914_s24 }
 0x6f4   : > { %4514 = vrot.lane.b32.xlu0 %v4513_v26, %s4914_s24 }
 0x6f5   : > { %4559 = vrot.lane.b32.xlu1 %v4558_v13, %s4915_s25 }
 0x6f8   : > { %4519 = vrot.lane.b32.xlu0 %v4518_v63, %s4915_s25 }
 0x6f9   : > { %4564 = vrot.lane.b32.xlu1 %v4563_v24, %s4916_s26 }
 0x6fc   : > { %4524 = vrot.lane.b32.xlu0 %v4523_v39, %s4916_s26 }
 0x6fd   : > { %4574 = vrot.lane.b32.xlu1 %v4573_v44, %s4911_s21 }
 0x700   : > { %4544 = vrot.lane.b32.xlu0 %v4538_v4, %s4910_s20 }
 0x701   : > { %4584 = vrot.lane.b32.xlu1 %v4583_v22, %s4915_s25 }
 0x704   : > { %4549 = vrot.lane.b32.xlu0 %v4548_v41, %s4913_s23 }
 0x705   : > { %4589 = vrot.lane.b32.xlu1 %v4588_v30, %s4916_s26 }
 0x708   : > { %4569 = vrot.lane.b32.xlu0 %v4568_v17, %s4912_s22 }
 0x709   : > { %4594 = vrot.lane.b32.xlu1 %v4593_v10, %s4909_s19 }
 0x70c   : > { %4579 = vrot.lane.b32.xlu0 %v4578_v40, %s4914_s24 }
 0x722   : > { %v4365_v9 = vpop.permute.xlu0 %4364 }
 0x723   : > { %v4367_v38 = vunpack.i.h.bf16 %v4365_v9  ;;  %v4366_v34 = vunpack.i.l.bf16 %v4365_v9  ;;  %v4375_v21 = vpop.permute.xlu1 %4374 }
 0x724   : > { %v4376_v26 = vunpack.i.l.bf16 %v4375_v21  ;;  %v4377_v4 = vunpack.i.h.bf16 %v4375_v21 }
 0x725   : > { %v2230_v28 = vsel %vm370_vm0, %v4366_v34, %v4367_v38 }
 0x726   : > { %v4370_v15 = vpop.permute.xlu0 %4369  ;;  %v4598_v32 = vpack.i.bf16 %v2230_v28, %v5075_v50  ;;  %v2288_v5 = vsel %vm486_vm8, %v4376_v26, %v4377_v4 }
 0x727   : > { %v4372_v31 = vunpack.i.h.bf16 %v4370_v15  ;;  %v4371_v2 = vunpack.i.l.bf16 %v4370_v15  ;;  %v6095_v29 = vpop.permute.xlu1 %4389 }
 0x728   : > { %4599 = vrot.lane.b32.xlu0 %v4598_v32, %s4909_s19  ;;  %v4391_v27 = vunpack.i.l.bf16 %v6095_v29  ;;  %v4392_v30 = vunpack.i.h.bf16 %v6095_v29 }
 0x729   : > { %v2258_v6 = vsel %vm337_vm5, %v4371_v2, %v4372_v31 }
 0x72a   : > { %v4608_v55 = vpack.i.bf16 %v4372_v31, %v2258_v6  ;;  %v4380_v54 = vpop.permute.xlu0 %4379  ;;  %v4613_v0 = vpack.i.bf16 %v4391_v27, %v4371_v2  ;;  %v2268_v6 = vsel %vm464_vm9, %v4391_v27, %v4392_v30 }
 0x72b   : > { %v4395_v51 = vpop.permute.xlu1 %4394  ;;  %v4382_v39 = vunpack.i.h.bf16 %v4380_v54  ;;  %v4381_v20 = vunpack.i.l.bf16 %v4380_v54 }
 0x72c   : > { %4609 = vrot.lane.b32.xlu0 %v4608_v55, %s4909_s19  ;;  %v4396_v57 = vunpack.i.l.bf16 %v4395_v51  ;;  %v4397_v49 = vunpack.i.h.bf16 %v4395_v51 }
 0x72d   : > { %v2241_v56 = vsel %vm435_vm7, %v4381_v20, %v4382_v39 }
 0x72e   : > { %v4385_v43 = vpop.permute.xlu0 %4384  ;;  %v4623_v37 = vpack.i.bf16 %v4376_v26, %v4396_v57  ;;  %v2279_v42 = vsel %vm476_vm10, %v4396_v57, %v4397_v49 }
 0x72f   : > { %v6103_v11 = vpop.permute.xlu1 %4409  ;;  %v4387_v8 = vunpack.i.h.bf16 %v4385_v43  ;;  %v4386_v14 = vunpack.i.l.bf16 %v4385_v43 }
 0x730   : > { %v4411_v7 = vunpack.i.l.bf16 %v6103_v11  ;;  %4614 = vrot.lane.b32.xlu0 %v4613_v0, %s4909_s19  ;;  %v4412_v55 = vunpack.i.h.bf16 %v6103_v11 }
 0x731   : > { %v2252_v19 = vsel %vm447_vm6, %v4386_v14, %v4387_v8 }
 0x732   : > { %v2231_v35 = vsel %vm370_vm0, %v4367_v38, %v4411_v7  ;;  %v4400_v59 = vpop.permute.xlu0 %4399  ;;  %v4633_v10 = vpack.i.bf16 %v2252_v19, %v2241_v56 }
 0x733   : > { %v4603_v63 = vpack.i.bf16 %v4411_v7, %v2231_v35  ;;  %v4401_v60 = vunpack.i.l.bf16 %v4400_v59  ;;  %v6108_v25 = vpop.permute.xlu1 %4414  ;;  %v4402_v36 = vunpack.i.h.bf16 %v4400_v59 }
 0x734   : > { %v4416_v46 = vunpack.i.l.bf16 %v6108_v25  ;;  %4624 = vrot.lane.b32.xlu0 %v4623_v37, %s4909_s19 }
 0x735   : > { %v4628_v44 = vpack.i.bf16 %v5075_v50, %v4401_v60  ;;  %4604 = vrot.lane.b32.xlu1 %v4603_v63, %s4909_s19  ;;  %v2299_v54 = vsel %vm498_vm11, %v4401_v60, %v4402_v36 }
 0x736   : > { %v2289_v62 = vsel %vm486_vm8, %v4377_v4, %v4416_v46  ;;  %v6116_v3 = vpop.permute.xlu0 %4404 }
 0x737   : > { %v4618_v17 = vpack.i.bf16 %v2289_v62, %v2288_v5  ;;  %v6119_v53 = vpop.permute.xlu1 %4424 }
 0x738   : > { %4629 = vrot.lane.b32.xlu0 %v4628_v44, %s4909_s19  ;;  %v4427_v34 = vunpack.i.h.bf16 %v6119_v53  ;;  %v4426_v15 = vunpack.i.l.bf16 %v6119_v53 }
 0x739   : > { %4619 = vrot.lane.b32.xlu1 %v4618_v17, %s4909_s19 }
 0x73a   : > { %v4420_v23 = vpop.permute.xlu0 %4419  ;;  %v2750_v7 = vsel %vm337_vm5, %v4426_v15, %v4427_v34 }
 0x73b   : > { %v6124_v18 = vpop.permute.xlu1 %4429  ;;  %v4422_v32 = vunpack.i.h.bf16 %v4420_v23  ;;  %v4421_v37 = vunpack.i.l.bf16 %v4420_v23  ;;  %v4673_v35 = vpack.i.bf16 %v4427_v34, %v2750_v7 }
 0x73c   : > { %4634 = vrot.lane.b32.xlu0 %v4633_v10, %s4909_s19  ;;  %v4431_v62 = vunpack.i.l.bf16 %v6124_v18 }
 0x73d   : > { %v2722_v4 = vsel %vm370_vm0, %v4422_v32, %v4412_v55  ;;  %v2723_v14 = vsel %vm370_vm0, %v4412_v55, %v4421_v37 }
 0x73e   : > { %v6127_v47 = vpop.permute.xlu0 %4444  ;;  %v4663_v59 = vpack.i.bf16 %v2722_v4, %v5075_v50  ;;  %v4668_v5 = vpack.i.bf16 %v4421_v37, %v2723_v14 }
 0x73f   : > { %v6129_v61 = vpop.permute.xlu1 %4434  ;;  %v4446_v33 = vunpack.i.l.bf16 %v6127_v47  ;;  %v4447_v19 = vunpack.i.h.bf16 %v6127_v47 }
 0x740   : > { %v4436_v16 = vunpack.i.l.bf16 %v6129_v61  ;;  %v4437_v27 = vunpack.i.h.bf16 %v6129_v61  ;;  %v4417_v61 = vunpack.i.h.bf16 %v6108_v25 }
 0x741   : > { %v2269_v31 = vsel %vm464_vm9, %v4392_v30, %v4446_v33 }
 0x742   : > { %v2242_v12 = vsel %vm435_vm7, %v4382_v39, %v4436_v16  ;;  %v6133_v58 = vpop.permute.xlu0 %4449  ;;  %v4648_v57 = vpack.i.bf16 %v2269_v31, %v2268_v6  ;;  %v4432_v39 = vunpack.i.h.bf16 %v6124_v18  ;;  %v2780_v47 = vsel %vm486_vm8, %v4417_v61, %v4431_v62 }
 0x743   : > { %v4638_v13 = vpack.i.bf16 %v4436_v16, %v2242_v12  ;;  %v4451_v52 = vunpack.i.l.bf16 %v6133_v58  ;;  %v6136_v24 = vpop.permute.xlu1 %4439  ;;  %v4452_v20 = vunpack.i.h.bf16 %v6133_v58  ;;  %v4678_v58 = vpack.i.bf16 %v4447_v19, %v4426_v15 }
 0x744   : > { %v4441_v22 = vunpack.i.l.bf16 %v6136_v24  ;;  %v2781_v12 = vsel %vm486_vm8, %v4431_v62, %v4432_v39  ;;  %v4442_v6 = vunpack.i.h.bf16 %v6136_v24 }
 0x745   : > { %v2280_v41 = vsel %vm476_vm10, %v4397_v49, %v4451_v52  ;;  %4639 = vrot.lane.b32.xlu0 %v4638_v13, %s4909_s19  ;;  %v4688_v34 = vpack.i.bf16 %v4417_v61, %v4452_v20 }
 0x746   : > { %v4653_v40 = vpack.i.bf16 %v2280_v41, %v2279_v42  ;;  %v2253_v9 = vsel %vm447_vm6, %v4387_v8, %v4441_v22  ;;  %v6145_v38 = vpop.permute.xlu0 %4464  ;;  %v4683_v41 = vpack.i.bf16 %v2781_v12, %v2780_v47 }
 0x747   : > { %v4643_v21 = vpack.i.bf16 %v4441_v22, %v2253_v9  ;;  %v6148_v28 = vpop.permute.xlu1 %4454  ;;  %v4467_v32 = vunpack.i.h.bf16 %v6145_v38  ;;  %v4466_v55 = vunpack.i.l.bf16 %v6145_v38 }
 0x748   : > { %v4456_v2 = vunpack.i.l.bf16 %v6148_v28  ;;  %v4457_v49 = vunpack.i.h.bf16 %v6148_v28 }
 0x749   : > { %4644 = vrot.lane.b32.xlu1 %v4643_v21, %s4909_s19  ;;  %4654 = vrot.lane.b32.xlu0 %v4653_v40, %s4909_s19  ;;  %v2745_v4 = vsel %vm447_vm6, %v4442_v6, %v4466_v55 }
 0x74a   : > { %v2300_v51 = vsel %vm498_vm11, %v4402_v36, %v4456_v2  ;;  %v6161_v0 = vpop.permute.xlu0 %4469  ;;  %v4693_v2 = vpack.i.bf16 %v5075_v50, %v4457_v49 }
 0x74b   : > { %v4658_v43 = vpack.i.bf16 %v2300_v51, %v2299_v54  ;;  %v6163_v26 = vpop.permute.xlu1 %4459  ;;  %v2744_v51 = vsel %vm447_vm6, %v4467_v32, %v4442_v6  ;;  %v4472_v50 = vunpack.i.h.bf16 %v6161_v0 }
 0x74c   : > { %v4461_v29 = vunpack.i.l.bf16 %v6163_v26  ;;  %v4462_v28 = vunpack.i.h.bf16 %v6163_v26 }
 0x74d   : > { %4659 = vrot.lane.b32.xlu0 %v4658_v43, %s4909_s19  ;;  %4649 = vrot.lane.b32.xlu1 %v4648_v57, %s4909_s19  ;;  %v4471_v43 = vunpack.i.l.bf16 %v6161_v0 }
 0x74e   : > { %v4475_v11 = vpop.permute.xlu0 %4474  ;;  %v2734_v63 = vsel %vm435_vm7, %v4437_v27, %v4461_v29  ;;  %v2733_v54 = vsel %vm435_vm7, %v4462_v28, %v4437_v27 }
 0x74f   : > { %v6172_v8 = vpop.permute.xlu1 %4489  ;;  %v4477_v60 = vunpack.i.h.bf16 %v4475_v11  ;;  %v4476_v46 = vunpack.i.l.bf16 %v4475_v11  ;;  %v4703_v17 = vpack.i.bf16 %v4461_v29, %v2734_v63  ;;  %v4698_v26 = vpack.i.bf16 %v2744_v51, %v2733_v54 }
 0x750   : > { %v4492_v52 = vunpack.i.h.bf16 %v6172_v8  ;;  %v4491_v25 = vunpack.i.l.bf16 %v6172_v8  ;;  %v4708_v29 = vpack.i.bf16 %v4466_v55, %v2745_v4  ;;  %v2760_v27 = vsel %vm464_vm9, %v4447_v19, %v4471_v43 }
 0x751   : > { %4674 = vrot.lane.b32.xlu0 %v4673_v35, %s4909_s19  ;;  %4664 = vrot.lane.b32.xlu1 %v4663_v59, %s4909_s19  ;;  %v2771_v53 = vsel %vm476_vm10, %v4452_v20, %v4476_v46  ;;  %v2772_v56 = vsel %vm476_vm10, %v4476_v46, %v4477_v60  ;;  %v2761_v59 = vsel %vm464_vm9, %v4471_v43, %v4472_v50  ;;  %v4356_v19 = vunpack.i.l.bf16 %v6089_v1 }
 0x752   : > { %v4480_v44 = vpop.permute.xlu0 %4479  ;;  %v4718_v13 = vpack.i.bf16 %v2772_v56, %v2771_v53  ;;  %v2349_v40 = vsel %vm370_vm0, %v4491_v25, %v4492_v52  ;;  %v4713_v62 = vpack.i.bf16 %v2761_v59, %v2760_v27 }
 0x753   : > { %v4482_v10 = vunpack.i.h.bf16 %v4480_v44  ;;  %v4481_v23 = vunpack.i.l.bf16 %v4480_v44  ;;  %v6185_v16 = vpop.permute.xlu1 %4509  ;;  %v4728_v21 = vpack.i.bf16 %v4492_v52, %v2349_v40 }
 0x755   : > { %4704 = vrot.lane.b32.xlu0 %v4703_v17, %s4909_s19  ;;  %4669 = vrot.lane.b32.xlu1 %v4668_v5, %s4909_s19  ;;  %v2791_v33 = vsel %vm498_vm11, %v4457_v49, %v4481_v23  ;;  %v2792_v22 = vsel %vm498_vm11, %v4481_v23, %v4482_v10  ;;  %v4351_v10 = vunpack.i.l.bf16 %v6087_v45  ;;  %v4511_v49 = vunpack.i.l.bf16 %v6185_v16 }
 0x756   : > { %v6190_v18 = vpop.permute.xlu0 %4484  ;;  %v4723_v30 = vpack.i.bf16 %v2792_v22, %v2791_v33  ;;  %v4361_v33 = vunpack.i.l.bf16 %v6091_v48 }
 0x757   : > { %v6202_v36 = vpop.permute.xlu1 %4529 }
 0x759   : > { %4719 = vrot.lane.b32.xlu0 %v4718_v13, %s4909_s19  ;;  %4679 = vrot.lane.b32.xlu1 %v4678_v58, %s4909_s19  ;;  %v2348_v58 = vsel %vm370_vm0, %v4351_v10, %v4491_v25 }
 0x75a   : > { %v6200_v42 = vpop.permute.xlu0 %4494 }
 0x75b   : > { %v6212_v15 = vpop.permute.xlu1 %4534  ;;  %v4497_v14 = vunpack.i.h.bf16 %v6200_v42  ;;  %v4496_v63 = vunpack.i.l.bf16 %v6200_v42  ;;  %v4512_v42 = vunpack.i.h.bf16 %v6185_v16 }
 0x75c   : > { %v4536_v0 = vunpack.i.l.bf16 %v6212_v15 }
 0x75d   : > { %4724 = vrot.lane.b32.xlu0 %v4723_v30, %s4909_s19  ;;  %4684 = vrot.lane.b32.xlu1 %v4683_v41, %s4909_s19  ;;  %v2376_v17 = vsel %vm337_vm5, %v4496_v63, %v4497_v14  ;;  %v2370_v30 = vsel %vm447_vm6, %v4361_v33, %v4511_v49  ;;  %v2371_v16 = vsel %vm447_vm6, %v4511_v49, %v4512_v42 }
 0x75e   : > { %v6209_v9 = vpop.permute.xlu0 %4499  ;;  %v4733_v47 = vpack.i.bf16 %v4497_v14, %v2376_v17  ;;  %v4753_v32 = vpack.i.bf16 %v4496_v63, %v2370_v30  ;;  %v4763_v51 = vpack.i.bf16 %v4512_v42, %v2371_v16  ;;  %v4357_v14 = vunpack.i.h.bf16 %v6089_v1 }
 0x75f   : > { %v6226_v7 = vpop.permute.xlu1 %4539  ;;  %v4502_v24 = vunpack.i.h.bf16 %v6209_v9  ;;  %v4501_v38 = vunpack.i.l.bf16 %v6209_v9  ;;  %v4362_v17 = vunpack.i.h.bf16 %v6091_v48  ;;  %v4537_v48 = vunpack.i.h.bf16 %v6212_v15  ;;  %v3276_v9 = vld [vmem:[%s6486_s6 + $0x38] sm:$0xff] }
 0x760   : > { %v4541_v4 = vunpack.i.l.bf16 %v6226_v7  ;;  %3278 = vmatprep.mubr.msk.f32.mxu1 %vm1109_vm13, %v3276_v9 }
 0x761   : > { %4729 = vrot.lane.b32.xlu0 %v4728_v21, %s4909_s19  ;;  %4689 = vrot.lane.b32.xlu1 %v4688_v34, %s4909_s19  ;;  %v2407_v39 = vsel %vm486_vm8, %v4502_v24, %v4536_v0  ;;  %v2406_v20 = vsel %vm486_vm8, %v4501_v38, %v4502_v24 }
 0x762   : > { %v4505_v31 = vpop.permute.xlu0 %4504  ;;  %v4743_v56 = vpack.i.bf16 %v2407_v39, %v2406_v20  ;;  %v4352_v39 = vunpack.i.h.bf16 %v6087_v45 }
 0x763   : > { %v6239_v60 = vpop.permute.xlu1 %4554  ;;  %v4506_v44 = vunpack.i.l.bf16 %v4505_v31  ;;  %v4507_v53 = vunpack.i.h.bf16 %v4505_v31 }
 0x764   : > { %v4556_v55 = vunpack.i.l.bf16 %v6239_v60 }
 0x765   : > { %4694 = vrot.lane.b32.xlu1 %v4693_v2, %s4909_s19  ;;  %v2359_v23 = vsel %vm435_vm7, %v4356_v19, %v4506_v44  ;;  %v2360_v13 = vsel %vm435_vm7, %v4506_v44, %v4507_v53 }
 0x766   : > { %v6223_v57 = vpop.permute.xlu0 %4514  ;;  %v4748_v22 = vpack.i.bf16 %v2359_v23, %v2348_v58  ;;  %v4758_v40 = vpack.i.bf16 %v4507_v53, %v2360_v13 }
 0x767   : > { %v4516_v11 = vunpack.i.l.bf16 %v6223_v57  ;;  %v6257_v12 = vpop.permute.xlu1 %4559  ;;  %v4517_v2 = vunpack.i.h.bf16 %v6223_v57 }
 0x768   : > { %v4561_v41 = vunpack.i.l.bf16 %v6257_v12  ;;  %v4562_v57 = vunpack.i.h.bf16 %v6257_v12 }
 0x769   : > { %4699 = vrot.lane.b32.xlu1 %v4698_v26, %s4909_s19  ;;  %v4542_v26 = vunpack.i.h.bf16 %v6226_v7  ;;  %v2387_v50 = vsel %vm464_vm9, %v4517_v2, %v4556_v55  ;;  %v2386_v24 = vsel %vm464_vm9, %v4516_v11, %v4517_v2 }
 0x76a   : > { %v4520_v37 = vpop.permute.xlu0 %4519  ;;  %v4768_v59 = vpack.i.bf16 %v2387_v50, %v2386_v24  ;;  %v3271_v50 = vld [vmem:[%s6487_s7 + $0x8] sm:$0xff] }
 0x76b   : > { %v4521_v35 = vunpack.i.l.bf16 %v4520_v37  ;;  %v4522_v52 = vunpack.i.h.bf16 %v4520_v37  ;;  %v6276_v31 = vpop.permute.xlu1 %4564  ;;  %v2841_v7 = vsel %vm370_vm0, %v4541_v4, %v4542_v26 }
 0x76c   : > { %v4778_v44 = vpack.i.bf16 %v4542_v26, %v2841_v7  ;;  %v4566_v42 = vunpack.i.l.bf16 %v6276_v31 }
 0x76d   : > { %v4738_v46 = vpack.i.bf16 %v4521_v35, %v4516_v11  ;;  %4709 = vrot.lane.b32.xlu1 %v4708_v29, %s4909_s19  ;;  %v2398_v8 = vsel %vm476_vm10, %v4522_v52, %v4561_v41  ;;  %v2397_v25 = vsel %vm476_vm10, %v4521_v35, %v4522_v52  ;;  %v4557_v35 = vunpack.i.h.bf16 %v6239_v60 }
 0x76e   : > { %v6246_v5 = vpop.permute.xlu0 %4524  ;;  %v4773_v6 = vpack.i.bf16 %v2398_v8, %v2397_v25  ;;  %v2840_v60 = vsel %vm370_vm0, %v4352_v39, %v4541_v4  ;;  %v3270_v25 = vld [vmem:[%s6486_s6 + $0x18] sm:$0xff] }
 0x76f   : > { %4739 = vrot.lane.b32.xlu0 %v4738_v46, %s4909_s19  ;;  %v4575_v37 = vpop.permute.xlu1 %4574  ;;  %v4788_v46 = vpack.i.bf16 %v4562_v57, %v4557_v35  ;;  %v4527_v13 = vunpack.i.h.bf16 %v6246_v5  ;;  %v4526_v52 = vunpack.i.l.bf16 %v6246_v5  ;;  %3272 = vmatprep.mubr.msk.f32.mxu0 %vm1109_vm13, %v3270_v25 }
 0x770   : > { %v4577_v63 = vunpack.i.h.bf16 %v4575_v37  ;;  %v4576_v0 = vunpack.i.l.bf16 %v4575_v37 }
 0x771   : > { %4714 = vrot.lane.b32.xlu1 %v4713_v62, %s4909_s19  ;;  %v2418_v15 = vsel %vm498_vm11, %v4527_v13, %v4566_v42 }
 0x772   : > { %v6254_v61 = vpop.permute.xlu0 %4544  ;;  %v2863_v62 = vsel %vm447_vm6, %v4576_v0, %v4577_v63  ;;  %v2862_v45 = vsel %vm447_vm6, %v4362_v17, %v4576_v0 }
 0x773   : > { %4744 = vrot.lane.b32.xlu0 %v4743_v56, %s4909_s19  ;;  %v4547_v21 = vunpack.i.h.bf16 %v6254_v61  ;;  %v4546_v28 = vunpack.i.l.bf16 %v6254_v61  ;;  %v4813_v10 = vpack.i.bf16 %v4577_v63, %v2863_v62  ;;  %v4585_v58 = vpop.permute.xlu1 %4584 }
 0x774   : > { %v4587_v8 = vunpack.i.h.bf16 %v4585_v58  ;;  %v4586_v5 = vunpack.i.l.bf16 %v4585_v58 }
 0x775   : > { %4734 = vrot.lane.b32.xlu1 %v4733_v47, %s4909_s19  ;;  %v2868_v54 = vsel %vm337_vm5, %v4546_v28, %v4547_v21  ;;  %v4798_v12 = vpack.i.bf16 %v4546_v28, %v2862_v45 }
 0x776   : > { %v6269_v34 = vpop.permute.xlu0 %4549  ;;  %v4783_v29 = vpack.i.bf16 %v4547_v21, %v2868_v54  ;;  %v2889_v16 = vsel %vm476_vm10, %v4562_v57, %v4586_v5  ;;  %v2890_v2 = vsel %vm476_vm10, %v4586_v5, %v4587_v8  ;;  %v4828_v54 = vpack.i.bf16 %v4526_v52, %v4501_v38 }
 0x777   : > { %4749 = vrot.lane.b32.xlu0 %v4748_v22, %s4909_s19  ;;  %v4552_v23 = vunpack.i.h.bf16 %v6269_v34  ;;  %v4551_v61 = vunpack.i.l.bf16 %v6269_v34  ;;  %v2417_v34 = vsel %vm498_vm11, %v4526_v52, %v4527_v13  ;;  %v4590_v28 = vpop.permute.xlu1 %4589 }
 0x778   : > { %v4591_v55 = vunpack.i.l.bf16 %v4590_v28 }
 0x779   : > { %4759 = vrot.lane.b32.xlu1 %v4758_v40, %s4909_s19  ;;  %v2898_v41 = vsel %vm486_vm8, %v4537_v48, %v4551_v61  ;;  %v2899_v30 = vsel %vm486_vm8, %v4551_v61, %v4552_v23 }
 0x77a   : > { %v4570_v43 = vpop.permute.xlu0 %4569  ;;  %v4823_v21 = vpack.i.bf16 %v2899_v30, %v2898_v41 }
 0x77b   : > { %4754 = vrot.lane.b32.xlu0 %v4753_v32, %s4909_s19  ;;  %v4571_v27 = vunpack.i.l.bf16 %v4570_v43  ;;  %v4572_v56 = vunpack.i.h.bf16 %v4570_v43  ;;  %v4808_v32 = vpack.i.bf16 %v2418_v15, %v2417_v34  ;;  %v4833_v43 = vpack.i.bf16 %v2890_v2, %v2889_v16 }
 0x77c   : > { %v4532_v16 = vunpack.i.h.bf16 %v6202_v36 }
 0x77d   : > { %4774 = vrot.lane.b32.xlu1 %v4773_v6, %s4909_s19  ;;  %v2851_v20 = vsel %vm435_vm7, %v4357_v14, %v4571_v27  ;;  %v2852_v33 = vsel %vm435_vm7, %v4571_v27, %v4572_v56  ;;  %v4592_v6 = vunpack.i.h.bf16 %v4590_v28  ;;  %v6349_v27 = vpop.permute.xlu1 %4594 }
 0x77e   : > { %v4580_v11 = vpop.permute.xlu0 %4579  ;;  %v4793_v53 = vpack.i.bf16 %v2851_v20, %v2840_v60  ;;  %v4803_v40 = vpack.i.bf16 %v4572_v56, %v2852_v33 }
 0x77f   : > { %4764 = vrot.lane.b32.xlu0 %v4763_v51, %s4909_s19  ;;  %v4582_v1 = vunpack.i.h.bf16 %v4580_v11  ;;  %v4581_v19 = vunpack.i.l.bf16 %v4580_v11  ;;  %v4567_v51 = vunpack.i.h.bf16 %v6276_v31  ;;  %v2910_v4 = vsel %vm498_vm11, %v4591_v55, %v4592_v6 }
 0x781   : > { %4784 = vrot.lane.b32.xlu1 %v4783_v29, %s4909_s19  ;;  %v2878_v49 = vsel %vm464_vm9, %v4557_v35, %v4581_v19  ;;  %v2879_v47 = vsel %vm464_vm9, %v4581_v19, %v4582_v1  ;;  %v2909_v26 = vsel %vm498_vm11, %v4567_v51, %v4591_v55  ;;  %v4843_v57 = vpack.i.bf16 %v4567_v51, %v4537_v48  ;;  %v3277_v29 = vld [vmem:[%s6487_s7 + $0x18] sm:$0xff] }
 0x782   : > { %v4818_v22 = vpack.i.bf16 %v2879_v47, %v2878_v49  ;;  %v4838_v38 = vpack.i.bf16 %v2910_v4, %v2909_v26  ;;  %v4407_v35 = vunpack.i.h.bf16 %v6116_v3  ;;  %v4531_v4 = vunpack.i.l.bf16 %v6202_v36 }
 0x783   : > { %4769 = vrot.lane.b32.xlu0 %v4768_v59, %s4909_s19  ;;  %v4406_v59 = vunpack.i.l.bf16 %v6116_v3 }
 0x785   : > { %4789 = vrot.lane.b32.xlu1 %v4788_v46, %s4909_s19 }
 0x787   : > { %4779 = vrot.lane.b32.xlu0 %v4778_v44, %s4909_s19  ;;  %v2544_v44 = vsel %vm407_vm4, %v4406_v59, %v4407_v35 }
 0x789   : > { %4794 = vrot.lane.b32.xlu1 %v4793_v53, %s4909_s19 }
 0x78b   : > { %4814 = vrot.lane.b32.xlu0 %v4813_v10, %s4909_s19 }
 0x78d   : > { %4799 = vrot.lane.b32.xlu1 %v4798_v12, %s4909_s19 }
 0x78f   : > { %4819 = vrot.lane.b32.xlu0 %v4818_v22, %s4909_s19 }
 0x791   : > { %4804 = vrot.lane.b32.xlu1 %v4803_v40, %s4909_s19 }
 0x793   : > { %4824 = vrot.lane.b32.xlu0 %v4823_v21, %s4909_s19 }
 0x795   : > { %4809 = vrot.lane.b32.xlu1 %v4808_v32, %s4909_s19 }
 0x797   : > { %4829 = vrot.lane.b32.xlu0 %v4828_v54, %s4909_s19 }
 0x799   : > { %4834 = vrot.lane.b32.xlu1 %v4833_v43, %s4909_s19 }
 0x79a   : > { %v4600_v24 = vpop.permute.xlu0 %4599 }
 0x79b   : > { %2426 = vperm.xlu0 %3597, %v3271_v50   ;;  %v4601_v14 = vunpack.i.l.bf16 %v4600_v24  ;;  %v4602_v0 = vunpack.i.h.bf16 %v4600_v24 }
 0x79d   : > { %4839 = vrot.lane.b32.xlu1 %v4838_v38, %s4909_s19  ;;  %v2543_v39 = vsel %vm407_vm4, %v4601_v14, %v4406_v59  ;;  %v4487_v59 = vunpack.i.h.bf16 %v6190_v18  ;;  %v4486_v14 = vunpack.i.l.bf16 %v6190_v18 }
 0x79e   : > { %v4610_v31 = vpop.permute.xlu0 %4609 }
 0x79f   : > { %v4612_v45 = vunpack.i.h.bf16 %v4610_v31  ;;  %v4611_v48 = vunpack.i.l.bf16 %v4610_v31 }
 0x7a1   : > { %4844 = vrot.lane.b32.xlu1 %v4843_v57, %s4909_s19  ;;  %v2552_v6 = vsel %vm407_vm4, %v4611_v48, %v4612_v45 }
 0x7a2   : > { %v4615_v37 = vpop.permute.xlu0 %4614 }
 0x7a3   : > { %v4616_v13 = vunpack.i.l.bf16 %v4615_v37  ;;  %v4617_v40 = vunpack.i.h.bf16 %v4615_v37 }
 0x7a5   : > { %2918 = vperm.xlu1 %3596, %v3277_v29   ;;  %v2551_v2 = vsel %vm407_vm4, %v4616_v13, %v4611_v48 }
 0x7a6   : > { %v6353_v7 = vpop.permute.xlu0 %4624 }
 0x7a7   : > { %v4605_v63 = vpop.permute.xlu1 %4604  ;;  %v4626_v50 = vunpack.i.l.bf16 %v6353_v7  ;;  %v4627_v57 = vunpack.i.h.bf16 %v6353_v7 }
 0x7a8   : > { %v4607_v46 = vunpack.i.h.bf16 %v4605_v63  ;;  %v4606_v11 = vunpack.i.l.bf16 %v4605_v63 }
 0x7aa   : > { %v2545_v20 = vsel %vm407_vm4, %v4602_v0, %v4606_v11  ;;  %v2546_v60 = vsel %vm407_vm4, %v4606_v11, %v4607_v46  ;;  %v6359_v19 = vpop.permute.xlu0 %4629 }
 0x7ab   : > { %v3409_v62 = vpack.c.bf16 %v2545_v20, %v2543_v39  ;;  %v3407_v1 = vpack.c.bf16 %v2546_v60, %v2544_v44  ;;  %v4620_v17 = vpop.permute.xlu1 %4619  ;;  %v4632_v0 = vunpack.i.h.bf16 %v6359_v19  ;;  %v4631_v46 = vunpack.i.l.bf16 %v6359_v19 }
 0x7ac   : > { %v4622_v25 = vunpack.i.h.bf16 %v4620_v17  ;;  %v4621_v21 = vunpack.i.l.bf16 %v4620_v17  ;;  %v2562_v39 = vsel %vm407_vm4, %v4531_v4, %v4532_v16  ;;  %v3036_v19 = vsel %vm407_vm4, %v4486_v14, %v4487_v59 }
 0x7ad   : > { %3408 = vmatprep.subr.bf16.mxu0 %v3407_v1 }
 0x7ae   : > { %3410 = vmatpush1.bf16.msra.mxu0 %v3409_v62  ;;  %v4635_v3 = vpop.permute.xlu0 %4634  ;;  %v2558_v31 = vsel %vm407_vm4, %v4621_v21, %v4622_v25  ;;  %v2557_v7 = vsel %vm407_vm4, %v4627_v57, %v4621_v21  ;;  %v4597_v25 = vunpack.i.h.bf16 %v6349_v27 }
 0x7af   : > { %v4637_v49 = vunpack.i.h.bf16 %v4635_v3  ;;  %v4636_v47 = vunpack.i.l.bf16 %v4635_v3 }
 0x7b7   : > { %v4640_v53 = vpop.permute.xlu0 %4639 }
 0x7b8   : > { %v4642_v56 = vunpack.i.h.bf16 %v4640_v53  ;;  %v4641_v10 = vunpack.i.l.bf16 %v4640_v53 }
 0x7ba   : > { %v2547_v22 = vsel %vm407_vm4, %v4636_v47, %v4641_v10  ;;  %v2548_v41 = vsel %vm407_vm4, %v4641_v10, %v4642_v56  ;;  %v2561_v56 = vsel %vm407_vm4, %v4632_v0, %v4531_v4 }
 0x7bb   : > { %v4645_v23 = vpop.permute.xlu1 %4644  ;;  %v4655_v61 = vpop.permute.xlu0 %4654 }
 0x7bc   : > { %v4647_v12 = vunpack.i.h.bf16 %v4645_v23  ;;  %v4646_v58 = vunpack.i.l.bf16 %v4645_v23  ;;  %v4657_v52 = vunpack.i.h.bf16 %v4655_v61  ;;  %v4656_v33 = vunpack.i.l.bf16 %v4655_v61 }
 0x7be   : > { %v2549_v42 = vsel %vm407_vm4, %v4637_v49, %v4646_v58  ;;  %v2550_v30 = vsel %vm407_vm4, %v4646_v58, %v4647_v12  ;;  %v2556_v55 = vsel %vm407_vm4, %v4656_v33, %v4657_v52  ;;  %v2555_v37 = vsel %vm407_vm4, %v4626_v50, %v4656_v33 }
 0x7bf   : > { %v3413_v15 = vpack.c.bf16 %v2549_v42, %v2547_v22  ;;  %v4660_v34 = vpop.permute.xlu0 %4659  ;;  %v4650_v8 = vpop.permute.xlu1 %4649  ;;  %v3411_v5 = vpack.c.bf16 %v2550_v30, %v2548_v41  ;;  %v3419_v35 = vpack.c.bf16 %v2558_v31, %v2556_v55  ;;  %v3421_v20 = vpack.c.bf16 %v2557_v7, %v2555_v37 }
 0x7c0   : > { %v4652_v28 = vunpack.i.h.bf16 %v4650_v8  ;;  %v4651_v32 = vunpack.i.l.bf16 %v4650_v8  ;;  %v4662_v54 = vunpack.i.h.bf16 %v4660_v34  ;;  %v4661_v51 = vunpack.i.l.bf16 %v4660_v34 }
 0x7c1   : > { %3412 = vmatprep.subr.bf16.mxu0 %v3411_v5 }
 0x7c2   : > { %v2553_v43 = vsel %vm407_vm4, %v4617_v40, %v4651_v32  ;;  %3414 = vmatpush1.bf16.msra.mxu0 %v3413_v15  ;;  %v2554_v26 = vsel %vm407_vm4, %v4651_v32, %v4652_v28  ;;  %v2560_v63 = vsel %vm407_vm4, %v4661_v51, %v4662_v54  ;;  %v2559_v18 = vsel %vm407_vm4, %v4631_v46, %v4661_v51 }
 0x7c3   : > { %v3417_v24 = vpack.c.bf16 %v2553_v43, %v2551_v2  ;;  %v4665_v9 = vpop.permute.xlu1 %4664  ;;  %v3415_v38 = vpack.c.bf16 %v2554_v26, %v2552_v6  ;;  %v6376_v29 = vpop.permute.xlu0 %4674  ;;  %v3423_v1 = vpack.c.bf16 %v2562_v39, %v2560_v63  ;;  %v3425_v49 = vpack.c.bf16 %v2561_v56, %v2559_v18 }
 0x7c4   : > { %v4666_v36 = vunpack.i.l.bf16 %v4665_v9  ;;  %v4667_v44 = vunpack.i.h.bf16 %v4665_v9  ;;  %v4677_v30 = vunpack.i.h.bf16 %v6376_v29  ;;  %v4676_v15 = vunpack.i.l.bf16 %v6376_v29 }
 0x7c5   : > { %3416 = vmatprep.subr.bf16.mxu0 %v3415_v38  ;;  %v4596_v46 = vunpack.i.l.bf16 %v6349_v27 }
 0x7c6   : > { %3418 = vmatpush1.bf16.msra.mxu0 %v3417_v24  ;;  %v3035_v3 = vsel %vm407_vm4, %v4666_v36, %v4486_v14  ;;  %v3044_v31 = vsel %vm407_vm4, %v4676_v15, %v4677_v30 }
 0x7c7   : > { %v4670_v11 = vpop.permute.xlu1 %4669  ;;  %3420 = vmatprep.subr.bf16.mxu0 %v3419_v35  ;;  %v4705_v10 = vpop.permute.xlu0 %4704 }
 0x7c8   : > { %v4672_v60 = vunpack.i.h.bf16 %v4670_v11  ;;  %v4671_v62 = vunpack.i.l.bf16 %v4670_v11  ;;  %v4707_v22 = vunpack.i.h.bf16 %v4705_v10  ;;  %v4706_v42 = vunpack.i.l.bf16 %v4705_v10 }
 0x7c9   : > { %v3054_v10 = vsel %vm407_vm4, %v4596_v46, %v4597_v25 }
 0x7ca   : > { %v3037_v17 = vsel %vm407_vm4, %v4667_v44, %v4671_v62  ;;  %3422 = vmatpush1.bf16.msra.mxu0 %v3421_v20  ;;  %v3038_v53 = vsel %vm407_vm4, %v4671_v62, %v4672_v60  ;;  %v3040_v55 = vsel %vm407_vm4, %v4706_v42, %v4707_v22 }
 0x7cb   : > { %v3445_v45 = vpack.c.bf16 %v3037_v17, %v3035_v3  ;;  %v4680_v23 = vpop.permute.xlu1 %4679  ;;  %3424 = vmatprep.subr.bf16.mxu0 %v3423_v1  ;;  %v3443_v61 = vpack.c.bf16 %v3038_v53, %v3036_v19  ;;  %v4720_v12 = vpop.permute.xlu0 %4719 }
 0x7cc   : > { %v4681_v21 = vunpack.i.l.bf16 %v4680_v23  ;;  %v4722_v51 = vunpack.i.h.bf16 %v4720_v12  ;;  %v4721_v43 = vunpack.i.l.bf16 %v4720_v12  ;;  %v4682_v24 = vunpack.i.h.bf16 %v4680_v23 }
 0x7cd   : > { %3444 = vmatprep.subr.bf16.mxu1 %v3443_v61 }
 0x7ce   : > { %3426 = vmatpush1.bf16.msra.mxu0 %v3425_v49  ;;  %3446 = vmatpush1.bf16.msra.mxu1 %v3445_v45  ;;  %v3043_v57 = vsel %vm407_vm4, %v4681_v21, %v4676_v15  ;;  %v3048_v20 = vsel %vm407_vm4, %v4721_v43, %v4722_v51 }
 0x7cf   : > { %v4685_v47 = vpop.permute.xlu1 %4684  ;;  %v6391_v48 = vpop.permute.xlu0 %4724 }
 0x7d0   : > { %v4687_v28 = vunpack.i.h.bf16 %v4685_v47  ;;  %v4686_v32 = vunpack.i.l.bf16 %v4685_v47  ;;  %v4727_v14 = vunpack.i.h.bf16 %v6391_v48  ;;  %v4726_v36 = vunpack.i.l.bf16 %v6391_v48 }
 0x7d2   : > { %v3050_v59 = vsel %vm407_vm4, %v4686_v32, %v4687_v28  ;;  %v3052_v53 = vsel %vm407_vm4, %v4726_v36, %v4727_v14 }
 0x7d3   : > { %v4690_v58 = vpop.permute.xlu1 %4689  ;;  %v6395_v33 = vpop.permute.xlu0 %4729  ;;  %v3455_v62 = vpack.c.bf16 %v3050_v59, %v3048_v20  ;;  %v3459_v48 = vpack.c.bf16 %v3054_v10, %v3052_v53 }
 0x7d4   : > { %v4692_v37 = vunpack.i.h.bf16 %v4690_v58  ;;  %v4691_v29 = vunpack.i.l.bf16 %v4690_v58  ;;  %v4732_v44 = vunpack.i.h.bf16 %v6395_v33  ;;  %v4731_v60 = vunpack.i.l.bf16 %v6395_v33 }
 0x7d6   : > { %v3047_v18 = vsel %vm407_vm4, %v4691_v29, %v4721_v43  ;;  %v3049_v1 = vsel %vm407_vm4, %v4692_v37, %v4686_v32 }
 0x7d7   : > { %v6393_v13 = vpop.permute.xlu1 %4694  ;;  %v3457_v45 = vpack.c.bf16 %v3049_v1, %v3047_v18 }
 0x7d8   : > { %v4697_v3 = vunpack.i.h.bf16 %v6393_v13  ;;  %v4696_v17 = vunpack.i.l.bf16 %v6393_v13  ;;  %v2564_v13 = vsel %vm407_vm4, %v4731_v60, %v4732_v44 }
 0x7da   : > { %v3053_v47 = vsel %vm407_vm4, %v4697_v3, %v4596_v46  ;;  %v3051_v12 = vsel %vm407_vm4, %v4696_v17, %v4726_v36 }
 0x7db   : > { %v4700_v52 = vpop.permute.xlu1 %4699 }
 0x7dc   : > { %v4701_v41 = vunpack.i.l.bf16 %v4700_v52  ;;  %v4702_v34 = vunpack.i.h.bf16 %v4700_v52 }
 0x7de   : > { %v3039_v2 = vsel %vm407_vm4, %v4701_v41, %v4706_v42 }
 0x7df   : > { %v4710_v40 = vpop.permute.xlu1 %4709 }
 0x7e0   : > { %v4712_v8 = vunpack.i.h.bf16 %v4710_v40  ;;  %v4711_v5 = vunpack.i.l.bf16 %v4710_v40 }
 0x7e1   : > { %v6400_v16 = vpop.permute.xlu0 %4739 }
 0x7e2   : > { %v3041_v6 = vsel %vm407_vm4, %v4702_v34, %v4711_v5  ;;  %v3042_v54 = vsel %vm407_vm4, %v4711_v5, %v4712_v8  ;;  %v3461_v8 = vpack.c.bf16 %v3053_v47, %v3051_v12 }
 0x7e3   : > { %v3449_v26 = vpack.c.bf16 %v3041_v6, %v3039_v2  ;;  %v4715_v4 = vpop.permute.xlu1 %4714  ;;  %v3447_v50 = vpack.c.bf16 %v3042_v54, %v3040_v55 }
 0x7e4   : > { %v4717_v9 = vunpack.i.h.bf16 %v4715_v4  ;;  %v4716_v38 = vunpack.i.l.bf16 %v4715_v4 }
 0x7e5   : > { %v6408_v35 = vpop.permute.xlu0 %4744  ;;  %3448 = vmatprep.subr.bf16.mxu1 %v3447_v50 }
 0x7e6   : > { %v3045_v63 = vsel %vm407_vm4, %v4682_v24, %v4716_v38  ;;  %3450 = vmatpush1.bf16.msra.mxu1 %v3449_v26  ;;  %v3046_v0 = vsel %vm407_vm4, %v4716_v38, %v4717_v9  ;;  %v4742_v24 = vunpack.i.h.bf16 %v6400_v16  ;;  %v4741_v9 = vunpack.i.l.bf16 %v6400_v16 }
 0x7e7   : > { %v3453_v7 = vpack.c.bf16 %v3045_v63, %v3043_v57  ;;  %v4735_v11 = vpop.permute.xlu1 %4734  ;;  %v3451_v39 = vpack.c.bf16 %v3046_v0, %v3044_v31  ;;  %v4747_v10 = vunpack.i.h.bf16 %v6408_v35 }
 0x7e8   : > { %v4737_v52 = vunpack.i.h.bf16 %v4735_v11  ;;  %v4736_v41 = vunpack.i.l.bf16 %v4735_v11 }
 0x7e9   : > { %v4750_v19 = vpop.permute.xlu0 %4749  ;;  %3452 = vmatprep.subr.bf16.mxu1 %v3451_v39 }
 0x7ea   : > { %v4751_v27 = vunpack.i.l.bf16 %v4750_v19  ;;  %3454 = vmatpush1.bf16.msra.mxu1 %v3453_v7  ;;  %v4752_v23 = vunpack.i.h.bf16 %v4750_v19  ;;  %v2570_v6 = vsel %vm407_vm4, %v4736_v41, %v4737_v52 }
 0x7eb   : > { %v4760_v56 = vpop.permute.xlu1 %4759  ;;  %3456 = vmatprep.subr.bf16.mxu1 %v3455_v62 }
 0x7ec   : > { %v4762_v61 = vunpack.i.h.bf16 %v4760_v56  ;;  %v4761_v49 = vunpack.i.l.bf16 %v4760_v56  ;;  %v2563_v33 = vsel %vm407_vm4, %v4751_v27, %v4731_v60 }
 0x7ed   : > { %v4755_v58 = vpop.permute.xlu0 %4754 }
 0x7ee   : > { %v2565_v22 = vsel %vm407_vm4, %v4752_v23, %v4761_v49  ;;  %3458 = vmatpush1.bf16.msra.mxu1 %v3457_v45  ;;  %v2566_v42 = vsel %vm407_vm4, %v4761_v49, %v4762_v61  ;;  %v4757_v40 = vunpack.i.h.bf16 %v4755_v58  ;;  %v4756_v25 = vunpack.i.l.bf16 %v4755_v58 }
 0x7ef   : > { %v3429_v30 = vpack.c.bf16 %v2565_v22, %v2563_v33  ;;  %v4775_v15 = vpop.permute.xlu1 %4774  ;;  %3460 = vmatprep.subr.bf16.mxu1 %v3459_v48  ;;  %v3427_v34 = vpack.c.bf16 %v2566_v42, %v2564_v13  ;;  %v4746_v45 = vunpack.i.l.bf16 %v6408_v35 }
 0x7f0   : > { %v2569_v32 = vsel %vm407_vm4, %v4757_v40, %v4736_v41  ;;  %v4777_v55 = vunpack.i.h.bf16 %v4775_v15  ;;  %v4776_v54 = vunpack.i.l.bf16 %v4775_v15 }
 0x7f1   : > { %v4765_v5 = vpop.permute.xlu0 %4764  ;;  %3428 = vmatprep.subr.bf16.mxu0 %v3427_v34 }
 0x7f2   : > { %v4767_v21 = vunpack.i.h.bf16 %v4765_v5  ;;  %v4766_v28 = vunpack.i.l.bf16 %v4765_v5  ;;  %3430 = vmatpush1.bf16.msra.mxu0 %v3429_v30  ;;  %3462 = vmatpush1.bf16.msra.mxu1 %v3461_v8  ;;  %v2573_v37 = vsel %vm407_vm4, %v4742_v24, %v4776_v54  ;;  %v2574_v14 = vsel %vm407_vm4, %v4776_v54, %v4777_v55 }
 0x7f3   : > { %v4785_v2 = vpop.permute.xlu1 %4784 }
 0x7f4   : > { %v2567_v51 = vsel %vm407_vm4, %v4756_v25, %v4766_v28  ;;  %v2568_v43 = vsel %vm407_vm4, %v4766_v28, %v4767_v21  ;;  %v4787_v18 = vunpack.i.h.bf16 %v4785_v2  ;;  %v4786_v1 = vunpack.i.l.bf16 %v4785_v2 }
 0x7f5   : > { %v3433_v26 = vpack.c.bf16 %v2569_v32, %v2567_v51  ;;  %v4770_v4 = vpop.permute.xlu0 %4769  ;;  %v3431_v50 = vpack.c.bf16 %v2570_v6, %v2568_v43  ;;  %v2576_v25 = vsel %vm407_vm4, %v4746_v45, %v4747_v10 }
 0x7f6   : > { %v4772_v38 = vunpack.i.h.bf16 %v4770_v4  ;;  %v4771_v31 = vunpack.i.l.bf16 %v4770_v4  ;;  %v3062_v33 = vsel %vm407_vm4, %v4786_v1, %v4787_v18 }
 0x7f7   : > { %v6437_v57 = vpop.permute.xlu1 %4789  ;;  %3432 = vmatprep.subr.bf16.mxu0 %v3431_v50 }
 0x7f8   : > { %v2571_v29 = vsel %vm407_vm4, %v4741_v9, %v4771_v31  ;;  %3434 = vmatpush1.bf16.msra.mxu0 %v3433_v26  ;;  %v2572_v59 = vsel %vm407_vm4, %v4771_v31, %v4772_v38  ;;  %v4792_v28 = vunpack.i.h.bf16 %v6437_v57  ;;  %v4791_v32 = vunpack.i.l.bf16 %v6437_v57 }
 0x7f9   : > { %v3437_v36 = vpack.c.bf16 %v2573_v37, %v2571_v29  ;;  %v4780_v63 = vpop.permute.xlu0 %4779  ;;  %v3435_v0 = vpack.c.bf16 %v2574_v14, %v2572_v59  ;;  %v3269_v14 = vld [vmem:[%s6486_s6 + $0x10] sm:$0xff] }
 0x7fa   : > { %v4782_v11 = vunpack.i.h.bf16 %v4780_v63  ;;  %v4781_v39 = vunpack.i.l.bf16 %v4780_v63 }
 0x7fb   : > { %v4795_v46 = vpop.permute.xlu1 %4794  ;;  %3436 = vmatprep.subr.bf16.mxu0 %v3435_v0 }
 0x7fc   : > { %3438 = vmatpush1.bf16.msra.mxu0 %v3437_v36  ;;  %v4796_v44 = vunpack.i.l.bf16 %v4795_v46  ;;  %v4797_v3 = vunpack.i.h.bf16 %v4795_v46  ;;  %v3056_v61 = vsel %vm407_vm4, %v4781_v39, %v4782_v11 }
 0x7fd   : > { %v4815_v16 = vpop.permute.xlu0 %4814 }
 0x7fe   : > { %v4817_v60 = vunpack.i.h.bf16 %v4815_v16  ;;  %v4816_v62 = vunpack.i.l.bf16 %v4815_v16  ;;  %v3055_v49 = vsel %vm407_vm4, %v4796_v44, %v4781_v39 }
 0x7ff   : > { %v4800_v7 = vpop.permute.xlu1 %4799 }
 0x800   : > { %v4802_v19 = vunpack.i.h.bf16 %v4800_v7  ;;  %v4801_v27 = vunpack.i.l.bf16 %v4800_v7  ;;  %v3060_v58 = vsel %vm407_vm4, %v4816_v62, %v4817_v60 }
 0x801   : > { %v4820_v20 = vpop.permute.xlu0 %4819  ;;  %v3467_v34 = vpack.c.bf16 %v3062_v33, %v3060_v58 }
 0x802   : > { %v3059_v22 = vsel %vm407_vm4, %v4801_v27, %v4816_v62  ;;  %v3061_v35 = vsel %vm407_vm4, %v4802_v19, %v4786_v1  ;;  %v4822_v30 = vunpack.i.h.bf16 %v4820_v20  ;;  %v4821_v40 = vunpack.i.l.bf16 %v4820_v20  ;;  %v3275_v62 = vld [vmem:[%s6486_s6 + $0x30] sm:$0xff] }
 0x803   : > { %v4805_v17 = vpop.permute.xlu1 %4804  ;;  %v3469_v2 = vpack.c.bf16 %v3061_v35, %v3059_v22 }
 0x804   : > { %v4807_v53 = vunpack.i.h.bf16 %v4805_v17  ;;  %v4806_v56 = vunpack.i.l.bf16 %v4805_v17  ;;  %v3063_v4 = vsel %vm407_vm4, %v4791_v32, %v4821_v40  ;;  %v3064_v24 = vsel %vm407_vm4, %v4821_v40, %v4822_v30 }
 0x805   : > { %v4825_v23 = vpop.permute.xlu0 %4824 }
 0x806   : > { %v3057_v47 = vsel %vm407_vm4, %v4797_v3, %v4806_v56  ;;  %v3058_v12 = vsel %vm407_vm4, %v4806_v56, %v4807_v53  ;;  %v4827_v9 = vunpack.i.h.bf16 %v4825_v23  ;;  %v4826_v38 = vunpack.i.l.bf16 %v4825_v23 }
 0x807   : > { %v3465_v48 = vpack.c.bf16 %v3057_v47, %v3055_v49  ;;  %v4810_v13 = vpop.permute.xlu1 %4809  ;;  %v3463_v52 = vpack.c.bf16 %v3058_v12, %v3056_v61 }
 0x808   : > { %v4812_v42 = vunpack.i.h.bf16 %v4810_v13  ;;  %v4811_v41 = vunpack.i.l.bf16 %v4810_v13  ;;  %v3068_v0 = vsel %vm407_vm4, %v4826_v38, %v4827_v9 }
 0x809   : > { %v4830_v15 = vpop.permute.xlu0 %4829  ;;  %3464 = vmatprep.subr.bf16.mxu1 %v3463_v52 }
 0x80a   : > { %v4832_v8 = vunpack.i.h.bf16 %v4830_v15  ;;  %v4831_v5 = vunpack.i.l.bf16 %v4830_v15  ;;  %3466 = vmatpush1.bf16.msra.mxu1 %v3465_v48  ;;  %v2578_v21 = vsel %vm407_vm4, %v4811_v41, %v4812_v42 }
 0x80b   : > { %v4835_v6 = vpop.permute.xlu1 %4834  ;;  %3468 = vmatprep.subr.bf16.mxu1 %v3467_v34  ;;  %v3439_v55 = vpack.c.bf16 %v2578_v21, %v2576_v25 }
 0x80c   : > { %v2575_v54 = vsel %vm407_vm4, %v4831_v5, %v4746_v45  ;;  %v2577_v51 = vsel %vm407_vm4, %v4832_v8, %v4811_v41  ;;  %v4837_v43 = vunpack.i.h.bf16 %v4835_v6  ;;  %v4836_v26 = vunpack.i.l.bf16 %v4835_v6 }
 0x80d   : > { %v3441_v50 = vpack.c.bf16 %v2577_v51, %v2575_v54  ;;  %3440 = vmatprep.subr.bf16.mxu0 %v3439_v55 }
 0x80e   : > { %v3065_v31 = vsel %vm407_vm4, %v4792_v28, %v4836_v26  ;;  %3470 = vmatpush1.bf16.msra.mxu1 %v3469_v2  ;;  %v3066_v57 = vsel %vm407_vm4, %v4836_v26, %v4837_v43 }
 0x80f   : > { %v3473_v37 = vpack.c.bf16 %v3065_v31, %v3063_v4  ;;  %v4840_v29 = vpop.permute.xlu1 %4839  ;;  %3442 = vmatpush1.bf16.msra.mxu0 %v3441_v50  ;;  %v3471_v59 = vpack.c.bf16 %v3066_v57, %v3064_v24 }
 0x810   : > { %v4842_v36 = vunpack.i.h.bf16 %v4840_v29  ;;  %v4841_v63 = vunpack.i.l.bf16 %v4840_v29 }
 0x811   : > { %3472 = vmatprep.subr.bf16.mxu1 %v3471_v59 }
 0x812   : > { %2683 = vmatmul.mubr.f32.vlgmr.msra.gmra.mrb[6].mxu0 %v3269_v14  ;;  %3474 = vmatpush1.bf16.msra.mxu1 %v3473_v37  ;;  %v3070_v46 = vsel %vm407_vm4, %v4841_v63, %v4842_v36 }
 0x813   : > { %v4845_v16 = vpop.permute.xlu1 %4844  ;;  %v3475_v7 = vpack.c.bf16 %v3070_v46, %v3068_v0 }
 0x814   : > { %v4847_v11 = vunpack.i.h.bf16 %v4845_v16  ;;  %v4846_v39 = vunpack.i.l.bf16 %v4845_v16 }
 0x815   : > { %3476 = vmatprep.subr.bf16.mxu1 %v3475_v7 }
 0x816   : > { %v3067_v20 = vsel %vm407_vm4, %v4846_v39, %v4826_v38  ;;  %v3069_v44 = vsel %vm407_vm4, %v4847_v11, %v4841_v63 }
 0x817   : > { %v3477_v60 = vpack.c.bf16 %v3069_v44, %v3067_v20 }
 0x819   : > { %3478 = vmatpush1.bf16.msra.mxu1 %v3477_v60 }
 0x81a   : > { %v2427_v18 = vpop.permute.xlu0 %2426 }
 0x81c   : > { %3175 = vmatmul.mubr.f32.vlgmr.msra.gmra.mrb[6].mxu1 %v3275_v62 }
 0x824   : > { %v2919_v27 = vpop.permute.xlu1 %2918 }
 0x8e5   : > { %v2684_v1 = vpop.f32.mrb[6].mxu0 }
 0x8e6   : > { %v2685_v3 = vadd.f32 %v2684_v1, %v2427_v18  ;;  %v2686_v17 = vpop.f32.mrb[7].mxu0 }
 0x8e7   : > { %v2687_v19 = vadd.f32 %v2686_v17, %v2427_v18 }
 0x8e8   : > { %3181 = vst [vmem:[%s305_s13] sm:$0xff] %v2685_v3 }
 0x8e9   : > { %3182 = vst [vmem:[%s305_s13 + $0x8] sm:$0xff] %v2687_v19 }
 0x8ef   : > { %v3176_v53 = vpop.f32.mrb[6].mxu1 }
 0x8f0   : > { %v3177_v56 = vadd.f32 %v3176_v53, %v2919_v27  ;;  %v3178_v10 = vpop.f32.mrb[7].mxu1 }
 0x8f1   : > { %v3179_v45 = vadd.f32 %v3178_v10, %v2919_v27 }
 0x8f2   : > { %3183 = vst [vmem:[%s305_s13 + $0x10] sm:$0xff] %v3177_v56 }
 0x8f3   : > { %3184 = vst [vmem:[%s305_s13 + $0x18] sm:$0xff] %v3179_v45 }
 0x8f4 PF: > { %s18_s27 = sadd.s32 1, %s4902_s27  }
 0x8f5   : > { %p15_p4 = scmp.ge.s32.totalorder %s18_s27, 4  }
 0x8f7   :  { %17 = sbr.rel (!%p15_p4) target bundleno = 1 (0x1), region = 90 }

</bundles_post_ra>
